<compile_context>
chip_gen: v7x
topology: tpu7x:2x2x1
jax: 0.10.0
libtpu: 0.0.40
codegen_flags: <defaults>
</compile_context>

<pallas_src>
import functools

import jax
import jax.numpy as jnp
from jax import lax
from jax.experimental import pallas as pl
from jax.experimental.pallas import tpu as pltpu

_LANE = 128


def _round_up(n, m):
    return ((n + m - 1) // m) * m


# ----------------------------------------------------------------------------
# Pallas kernel: one (batch, row-tile) per grid step.
# ----------------------------------------------------------------------------
def aspp_head_kernel(x_hbm_ref, g_ref, *refs, idx_1x1, idx_3x3, TH, W, P,
                     feats_p, cout_p):
    # refs = [w_1x1?, w_3x3?, w_proj, b_par, out_ref, xpad_scratch, dma_sem]
    n_params = (1 if idx_1x1 else 0) + (1 if idx_3x3 else 0) + 2
    param_refs = refs[:n_params]
    out_ref, xpad_ref, dma_sem = refs[n_params], refs[n_params + 1], refs[n_params + 2]

    pos = 0
    w1_ref = w3_ref = None
    if idx_1x1:
        w1_ref = param_refs[pos]
        pos += 1
    if idx_3x3:
        w3_ref = param_refs[pos]
        pos += 1
    wproj_ref, bpar_ref = param_refs[pos], param_refs[pos + 1]

    b = pl.program_id(0)
    t = pl.program_id(1)
    row0 = pl.multiple_of(t * TH, TH)

    # ---- row-windowed DMA: (TH + 2P) pre-padded rows, HBM -> VMEM scratch ----
    # The image is spatially pre-padded on the host, so the window always lies
    # fully inside the array and already contains the conv's zero padding: no
    # zero-fill, no halo special cases, no interior restage.
    cp = pltpu.make_async_copy(
        x_hbm_ref.at[b, pl.ds(row0, TH + 2 * P)], xpad_ref, dma_sem.at[0])
    cp.start()
    cp.wait()
    # TODO(synk): double-buffer this window DMA across grid steps.

    # Center tap, reused by the 1x1 branches and by every dilated branch.
    x_center = xpad_ref[P:P + TH, P:P + W, :].reshape(TH * W, -1)   # bf16

    # ---- branches: conv (BN scale pre-folded) + shift + ReLU, immediately ----
    # projected through the matching out_project block and accumulated in f32.
    proj = None

    def _accum(proj, y_f32, bidx):
        contrib = jnp.dot(y_f32.astype(jnp.bfloat16), wproj_ref[bidx],
                          preferred_element_type=jnp.float32)
        return contrib if proj is None else proj + contrib

    if idx_1x1:
        for j, bidx in enumerate(idx_1x1):
            y = jnp.dot(x_center, w1_ref[j], preferred_element_type=jnp.float32)
            y = jnp.maximum(y + bpar_ref[bidx:bidx + 1, :], 0.0)
            proj = _accum(proj, y, bidx)

    if idx_3x3:
        for j, (bidx, d) in enumerate(idx_3x3):
            # center tap first (reuse x_center, no zeros init)
            y = jnp.dot(x_center, w3_ref[j, 4],
                        preferred_element_type=jnp.float32)
            for a in range(3):
                for c in range(3):
                    if a == 1 and c == 1:
                        continue
                    oi = P + (a - 1) * d
                    oj = P + (c - 1) * d
                    # TODO(synk): verify (bundle dump) whether this strided
                    # slice+reshape relayouts; if so, matmul the full padded
                    # width and column-shift the result instead.
                    tap = xpad_ref[oi:oi + TH, oj:oj + W, :].reshape(TH * W, -1)
                    y = y + jnp.dot(tap, w3_ref[j, 3 * a + c],
                                    preferred_element_type=jnp.float32)
            y = jnp.maximum(y + bpar_ref[bidx:bidx + 1, :], 0.0)
            proj = _accum(proj, y, bidx)

    # ---- add hoisted global feats (out-BN shift already folded in), ReLU ----
    out = jnp.maximum(proj + g_ref[0], 0.0)
    out_ref[0] = out.reshape(TH, W, cout_p).astype(out_ref.dtype)


# ----------------------------------------------------------------------------
# Host-side parameter folding / padding / consolidation.
# ----------------------------------------------------------------------------
def prepare_kernel_params(params, dilations):
    nd = len(dilations)
    feats, cout = params["feats"], params["cout"]
    cin = params["w_g1"].shape[0]
    cin_p = _round_up(cin, _LANE)
    feats_p = _round_up(feats, _LANE)
    cout_p = _round_up(cout, _LANE)

    s_par = params["bn_par_scale"].reshape(-1)
    b_par = params["bn_par_shift"].reshape(-1)
    s_g = params["bn_g_scale"].reshape(-1)
    b_g = params["bn_g_shift"].reshape(-1)
    s_o = params["bn_out_scale"].reshape(-1)
    b_o = params["bn_out_shift"].reshape(-1)

    idx_1x1 = tuple(i for i, d in enumerate(dilations) if d == 1)
    idx_3x3 = tuple((i, d) for i, d in enumerate(dilations) if d != 1)

    def pad2(w, rows, cols):
        return jnp.pad(w, ((0, rows - w.shape[0]), (0, cols - w.shape[1])))

    # Fold the parallel-BN scale into each branch's conv weight columns.
    w1_list, w3_list = [], []
    for i, d in enumerate(dilations):
        scale_i = s_par[i * feats:(i + 1) * feats]
        w = params["w_branch"][i]
        if d == 1:
            w1_list.append(pad2(w * scale_i[None, :], cin_p, feats_p))
        else:
            wf = w * scale_i[None, None, :]
            w3_list.append(jnp.pad(
                wf, ((0, 0), (0, cin_p - cin), (0, feats_p - feats))))

    # Fold the out-BN scale into the per-branch projection blocks.
    w_projf = params["w_proj"] * s_o[None, :]
    wproj_blocks = [pad2(w_projf[i * feats:(i + 1) * feats, :], feats_p, cout_p)
                    for i in range(nd)]
    w_proj = jnp.stack(wproj_blocks)                        # (nd, feats_p, cout_p)

    # Per-branch parallel-BN shifts.
    bpar = jnp.zeros((nd, feats_p), jnp.float32)
    for i in range(nd):
        bpar = bpar.at[i, :feats].set(b_par[i * feats:(i + 1) * feats])

    # Global-branch weights (used wrapper-side), scales folded.
    w_g1 = (params["w_g1"] * s_g[None, :]).astype(jnp.bfloat16)
    w_g2 = (params["w_g2"] * s_o[None, :]).astype(jnp.bfloat16)

    return dict(
        idx_1x1=idx_1x1, idx_3x3=idx_3x3,
        cin_p=cin_p, feats_p=feats_p, cout_p=cout_p,
        w_1x1=jnp.stack(w1_list).astype(jnp.bfloat16) if w1_list else None,
        w_3x3=jnp.stack(w3_list).astype(jnp.bfloat16) if w3_list else None,
        w_proj=w_proj.astype(jnp.bfloat16),
        bpar=bpar,
        w_g1=w_g1, b_g=b_g, w_g2=w_g2, b_o=b_o,
    )


def _choose_row_tile(H, P, est_fn, budget):
    # Largest divisor of H that is sublane-aligned, covers the halo (when more
    # than one tile) and fits the generation-specific VMEM budget.
    valid = [th for th in range(1, H + 1)
             if H % th == 0 and (th == H or (th % 8 == 0 and th >= max(P, 1)))]
    if not valid:
        valid = [H]
    for th in sorted(valid, reverse=True):
        if est_fn(th) <= budget:
            return th
    return min(valid)


# ----------------------------------------------------------------------------
# Wrapper: NCHW in / NCHW out.
# ----------------------------------------------------------------------------
def aspp_head_forward(x_nchw, params, dilations, row_tile=None):
    dilations = tuple(dilations)
    feats, cout = params["feats"], params["cout"]
    assert cout == feats, "outputs + global_feats requires out_channels == feats_channels"

    kp = prepare_kernel_params(params, dilations)
    cin_p, feats_p, cout_p = kp["cin_p"], kp["feats_p"], kp["cout_p"]

    x_nhwc = jnp.transpose(x_nchw, (0, 2, 3, 1))
    B, H, W, cin = x_nhwc.shape

    # ---- global branch hoisted out of the kernel (once per batch, plain XLA) -
    # eval-mode globalpooling == spatial mean for H, W <= pooling_size.
    # TODO(synk): sliding-window avg_pool path / training-mode BN not implemented.
    xf = x_nhwc.astype(jnp.bfloat16).astype(jnp.float32)
    gmean = jnp.mean(xf.reshape(B, H * W, cin), axis=1)            # (B, cin)
    g = jnp.dot(gmean.astype(jnp.bfloat16), kp["w_g1"],
                preferred_element_type=jnp.float32) + kp["b_g"][None, :]
    g = jnp.maximum(g, 0.0)
    g = jnp.dot(g.astype(jnp.bfloat16), kp["w_g2"],
                preferred_element_type=jnp.float32) + kp["b_o"][None, :]
    g = jnp.pad(g, ((0, 0), (0, cout_p - cout))).reshape(B, 1, cout_p)

    # ---- bf16 NHWC input, channel-padded to lanes, spatially pre-padded by P -
    dil3 = [d for d in dilations if d != 1]
    P = max(dil3) if dil3 else 0
    x_pad = jnp.pad(x_nhwc.astype(jnp.bfloat16),
                    ((0, 0), (P, P), (P, P), (0, cin_p - cin)))

    param_arrays = []
    if kp["w_1x1"] is not None:
        param_arrays.append(kp["w_1x1"])
    if kp["w_3x3"] is not None:
        param_arrays.append(kp["w_3x3"])
    param_arrays += [kp["w_proj"], kp["bpar"]]
    param_bytes = sum(a.size * a.dtype.itemsize for a in param_arrays)

    # ---- generation-aware VMEM budget (64 MiB v7x, 128 MiB v5e/v6e) ----------
    try:
        vmem_cap = int(pltpu.get_tpu_info().vmem_capacity_bytes)
    except Exception:
        vmem_cap = 64 * 1024 * 1024
    budget = int(vmem_cap * 0.85)

    def vmem_est(th):
        xpad = (th + 2 * P) * (W + 2 * P) * cin_p * 2          # window scratch
        outb = 2 * th * W * cout_p * 2                          # bf16 out, dbl-buf
        tmp = th * W * (2 * 2 * cin_p + 4 * feats_p + 4 * cout_p)  # live vregs/spill
        return xpad + outb + tmp + 2 * param_bytes + 2 * 4 * cout_p

    TH = _choose_row_tile(H, P, vmem_est, budget) if row_tile is None else row_tile
    assert H % TH == 0
    n_tiles = H // TH
    assert n_tiles == 1 or TH >= P, "row tile must cover the dilation halo"

    in_specs = [
        pl.BlockSpec(memory_space=pl.ANY),                       # image stays in HBM
        pl.BlockSpec((1, 1, cout_p), lambda b, t: (b, 0, 0)),    # per-batch global feats
    ]
    for arr in param_arrays:
        in_specs.append(
            pl.BlockSpec(arr.shape, lambda b, t, _n=arr.ndim: (0,) * _n))
    out_specs = pl.BlockSpec((1, TH, W, cout_p), lambda b, t: (b, t, 0, 0))

    scratch_shapes = [
        pltpu.VMEM((TH + 2 * P, W + 2 * P, cin_p), jnp.bfloat16),  # row window
        pltpu.SemaphoreType.DMA((1,)),
    ]

    kernel = functools.partial(
        aspp_head_kernel,
        idx_1x1=kp["idx_1x1"], idx_3x3=kp["idx_3x3"],
        TH=TH, W=W, P=P, feats_p=feats_p, cout_p=cout_p)

    vmem_limit = int(max(32 * 1024 * 1024, min(budget, 2 * vmem_est(TH))))

    out_nhwc = pl.pallas_call(
        kernel,
        out_shape=jax.ShapeDtypeStruct((B, H, W, cout_p), jnp.bfloat16),
        grid=(B, n_tiles),
        in_specs=in_specs,
        out_specs=out_specs,
        scratch_shapes=scratch_shapes,
        compiler_params=pltpu.CompilerParams(
            dimension_semantics=("parallel", "parallel"),
            vmem_limit_bytes=vmem_limit),
    )(x_pad, g, *param_arrays)

    out = out_nhwc[..., :cout].astype(jnp.float32)
    return jnp.transpose(out, (0, 3, 1, 2))                      # back to NCHW


# ----------------------------------------------------------------------------
# Pure-JAX reference (same eval-mode semantics, matching bf16 matmul operands).
# ----------------------------------------------------------------------------
def aspp_head_reference(x_nchw, params, dilations):
    f32, bf16 = jnp.float32, jnp.bfloat16
    x = jnp.transpose(x_nchw, (0, 2, 3, 1)).astype(bf16).astype(f32)
    B, H, W, cin = x.shape
    feats, cout = params["feats"], params["cout"]

    outs = []
    for i, d in enumerate(dilations):
        w = params["w_branch"][i].astype(bf16).astype(f32)
        if d == 1:
            y = lax.conv_general_dilated(
                x, w.reshape(1, 1, cin, feats), (1, 1), [(0, 0), (0, 0)],
                dimension_numbers=("NHWC", "HWIO", "NHWC"))
        else:
            y = lax.conv_general_dilated(
                x, w.reshape(3, 3, cin, feats), (1, 1), [(d, d), (d, d)],
                rhs_dilation=(d, d),
                dimension_numbers=("NHWC", "HWIO", "NHWC"))
        outs.append(y)
    cat = jnp.concatenate(outs, axis=-1)
    cat = jnp.maximum(cat * params["bn_par_scale"].reshape(1, 1, 1, -1)
                      + params["bn_par_shift"].reshape(1, 1, 1, -1), 0.0)
    cat = cat.astype(bf16).astype(f32)
    proj = jnp.einsum("bhwc,cd->bhwd", cat,
                      params["w_proj"].astype(bf16).astype(f32))

    gmean = jnp.mean(x, axis=(1, 2)).astype(bf16).astype(f32)
    g = gmean @ params["w_g1"].astype(bf16).astype(f32)
    g = jnp.maximum(g * params["bn_g_scale"].reshape(1, -1)
                    + params["bn_g_shift"].reshape(1, -1), 0.0)
    g = g.astype(bf16).astype(f32) @ params["w_g2"].astype(bf16).astype(f32)

    out = proj + g[:, None, None, :]
    out = jnp.maximum(out * params["bn_out_scale"].reshape(1, 1, 1, -1)
                      + params["bn_out_shift"].reshape(1, 1, 1, -1), 0.0)
    return jnp.transpose(out, (0, 3, 1, 2))


# ----------------------------------------------------------------------------
# Deterministic parameter construction (eval-mode BN folded to scale/shift).
# ----------------------------------------------------------------------------
def make_params(key, in_channels, feats_channels, out_channels, dilations, eps=1e-5):
    nd = len(dilations)
    keys = iter(jax.random.split(key, 32))

    def nrm(shape, scale=0.1):
        return scale * jax.random.normal(next(keys), shape, jnp.float32)

    def bn_fold(c):
        gamma = 1.0 + nrm((c,))
        beta = nrm((c,))
        rmean = nrm((c,))
        rvar = 1.0 + jnp.abs(nrm((c,)))
        scale = gamma / jnp.sqrt(rvar + eps)
        shift = beta - rmean * scale
        return scale.reshape(1, c), shift.reshape(1, c)

    w_branch = []
    for d in dilations:
        if d == 1:
            w_branch.append(nrm((in_channels, feats_channels)))
        else:
            w_branch.append(nrm((9, in_channels, feats_channels)))

    bn_par_scale, bn_par_shift = bn_fold(feats_channels * nd)
    w_proj = nrm((feats_channels * nd, out_channels))
    w_g1 = nrm((in_channels, feats_channels))
    bn_g_scale, bn_g_shift = bn_fold(feats_channels)
    w_g2 = nrm((feats_channels, feats_channels))
    bn_out_scale, bn_out_shift = bn_fold(out_channels)

    return dict(feats=feats_channels, cout=out_channels,
                w_branch=w_branch,
                bn_par_scale=bn_par_scale, bn_par_shift=bn_par_shift,
                w_proj=w_proj,
                w_g1=w_g1, bn_g_scale=bn_g_scale, bn_g_shift=bn_g_shift,
                w_g2=w_g2,
                bn_out_scale=bn_out_scale, bn_out_shift=bn_out_shift)


if __name__ == "__main__":
    B, Cin, H, W = 2, 4, 16, 16
    feats_channels = 8
    out_channels = 8          # must equal feats_channels for `outputs + global_feats`
    dilations = (1, 2, 4)     # small dilations consistent with 16x16 features

    key = jax.random.PRNGKey(0)
    kx, kp = jax.random.split(key)
    x = jax.random.normal(kx, (B, Cin, H, W), jnp.float32)
    params = make_params(kp, Cin, feats_channels, out_channels, dilations)

    ref = jax.block_until_ready(aspp_head_reference(x, params, dilations))

    # auto tile (single row tile) and forced multi-tile (exercises windowed DMA)
    for row_tile in (None, 8):
        out = jax.block_until_ready(
            aspp_head_forward(x, params, dilations, row_tile=row_tile))
        assert out.shape == (B, out_channels, H, W)
        err = float(jnp.max(jnp.abs(out - ref)))
        assert err < 3e-2, (row_tile, err)

    print("KERNEL_OK")
</pallas_src>

<mosaic_0001>
module attributes {stable_mosaic.version = 11 : i64} {
  func.func @aspp_head_kernel(%arg0: i32, %arg1: i32, %arg2: memref<2x24x24x128xbf16, #tpu.memory_space<any>>, %arg3: memref<1x1x128xf32, #tpu.memory_space<vmem>>, %arg4: memref<1x128x128xbf16, #tpu.memory_space<vmem>>, %arg5: memref<2x9x128x128xbf16, #tpu.memory_space<vmem>>, %arg6: memref<3x128x128xbf16, #tpu.memory_space<vmem>>, %arg7: memref<3x128xf32, #tpu.memory_space<vmem>>, %arg8: memref<1x16x16x128xbf16, #tpu.memory_space<vmem>>, %arg9: memref<24x24x128xbf16, #tpu.memory_space<vmem>>, %arg10: memref<1x!tpu.dma_semaphore, #tpu.memory_space<semaphore_mem>>) attributes {dimension_semantics = [#tpu.dimension_semantics<parallel>, #tpu.dimension_semantics<parallel>], iteration_bounds = array<i64: 2, 1>, scalar_prefetch = 0 : i64, scratch_operands = 2 : i64, tpu.core_type = #tpu.core_type<tc>, window_params = [{}, {transform_indices = @transform_1, window_bounds = array<i64: 1, 1, 128>}, {pipeline_mode = #tpu.pipeline_mode<synchronous>, transform_indices = @transform_2, window_bounds = array<i64: 1, 128, 128>}, {pipeline_mode = #tpu.pipeline_mode<synchronous>, transform_indices = @transform_3, window_bounds = array<i64: 2, 9, 128, 128>}, {pipeline_mode = #tpu.pipeline_mode<synchronous>, transform_indices = @transform_4, window_bounds = array<i64: 3, 128, 128>}, {pipeline_mode = #tpu.pipeline_mode<synchronous>, transform_indices = @transform_5, window_bounds = array<i64: 3, 128>}, {transform_indices = @transform_6, window_bounds = array<i64: 1, 16, 16, 128>}]} {
    %c16_i32 = arith.constant 16 : i32
    %0 = arith.muli %arg1, %c16_i32 : i32
    %1 = tpu.assume_multiple %0, 16 : i32
    %c0_i32 = arith.constant 0 : i32
    %c0_i32_0 = arith.constant 0 : i32
    %c0_i32_1 = arith.constant 0 : i32
    %2 = tpu.memref_slice %arg2[%arg0, %1, %c0_i32_0, %c0_i32_1] : memref<2x24x24x128xbf16, #tpu.memory_space<any>> -> memref<1x24x24x128xbf16, #tpu.memory_space<any>>
    %3 = tpu.memref_squeeze %2 : memref<1x24x24x128xbf16, #tpu.memory_space<any>> -> memref<24x24x128xbf16, #tpu.memory_space<any>>
    %4 = tpu.memref_slice %arg10[%c0_i32] : memref<1x!tpu.dma_semaphore, #tpu.memory_space<semaphore_mem>> -> memref<1x!tpu.dma_semaphore, #tpu.memory_space<semaphore_mem>>
    %5 = tpu.memref_squeeze %4 : memref<1x!tpu.dma_semaphore, #tpu.memory_space<semaphore_mem>> -> memref<!tpu.dma_semaphore, #tpu.memory_space<semaphore_mem>>
    tpu.enqueue_dma source(%3 : memref<24x24x128xbf16, #tpu.memory_space<any>>) target(%arg9 : memref<24x24x128xbf16, #tpu.memory_space<vmem>>) target_semaphore(%5 : memref<!tpu.dma_semaphore, #tpu.memory_space<semaphore_mem>>)
    %c0_i32_2 = arith.constant 0 : i32
    %c0_i32_3 = arith.constant 0 : i32
    %c0_i32_4 = arith.constant 0 : i32
    %6 = tpu.memref_slice %arg2[%arg0, %1, %c0_i32_3, %c0_i32_4] : memref<2x24x24x128xbf16, #tpu.memory_space<any>> -> memref<1x24x24x128xbf16, #tpu.memory_space<any>>
    %7 = tpu.memref_squeeze %6 : memref<1x24x24x128xbf16, #tpu.memory_space<any>> -> memref<24x24x128xbf16, #tpu.memory_space<any>>
    %8 = tpu.memref_slice %arg10[%c0_i32_2] : memref<1x!tpu.dma_semaphore, #tpu.memory_space<semaphore_mem>> -> memref<1x!tpu.dma_semaphore, #tpu.memory_space<semaphore_mem>>
    %9 = tpu.memref_squeeze %8 : memref<1x!tpu.dma_semaphore, #tpu.memory_space<semaphore_mem>> -> memref<!tpu.dma_semaphore, #tpu.memory_space<semaphore_mem>>
    tpu.wait_dma2 semaphore(%9 : memref<!tpu.dma_semaphore, #tpu.memory_space<semaphore_mem>>) src(%7 : memref<24x24x128xbf16, #tpu.memory_space<any>>) dst(%arg9 : memref<24x24x128xbf16, #tpu.memory_space<vmem>>)
    %c4 = arith.constant 4 : index
    %c4_5 = arith.constant 4 : index
    %c0 = arith.constant 0 : index
    %10 = vector.load %arg9[%c4, %c4_5, %c0] : memref<24x24x128xbf16, #tpu.memory_space<vmem>>, vector<16x16x128xbf16>
    %11 = vector.shape_cast %10 : vector<16x16x128xbf16> to vector<256x128xbf16>
    %c0_6 = arith.constant 0 : index
    %c0_7 = arith.constant 0 : index
    %c0_8 = arith.constant 0 : index
    %12 = vector.load %arg4[%c0_6, %c0_7, %c0_8] : memref<1x128x128xbf16, #tpu.memory_space<vmem>>, vector<1x128x128xbf16>
    %13 = vector.shape_cast %12 : vector<1x128x128xbf16> to vector<128x128xbf16>
    %cst = arith.constant dense<0.000000e+00> : vector<256x128xf32>
    %14 = tpu.matmul %11, %13, %cst {dimension_numbers = #tpu.dot_dimension_numbers<[1], [0], [0], [1], [0, 0, 1, 1], [], []>} : vector<256x128xbf16>, vector<128x128xbf16>, vector<256x128xf32> -> vector<256x128xf32>
    %c0_9 = arith.constant 0 : index
    %c0_10 = arith.constant 0 : index
    %15 = vector.load %arg7[%c0_9, %c0_10] : memref<3x128xf32, #tpu.memory_space<vmem>>, vector<1x128xf32>
    %16 = vector.broadcast %15 : vector<1x128xf32> to vector<256x128xf32>
    %17 = arith.addf %14, %16 : vector<256x128xf32>
    %cst_11 = arith.constant 0.000000e+00 : f32
    %18 = vector.broadcast %cst_11 : f32 to vector<256x128xf32>
    %19 = arith.maximumf %17, %18 : vector<256x128xf32>
    %20 = arith.truncf %19 : vector<256x128xf32> to vector<256x128xbf16>
    %c0_12 = arith.constant 0 : index
    %c0_13 = arith.constant 0 : index
    %c0_14 = arith.constant 0 : index
    %21 = vector.load %arg6[%c0_12, %c0_13, %c0_14] : memref<3x128x128xbf16, #tpu.memory_space<vmem>>, vector<1x128x128xbf16>
    %22 = vector.shape_cast %21 : vector<1x128x128xbf16> to vector<128x128xbf16>
    %cst_15 = arith.constant dense<0.000000e+00> : vector<256x128xf32>
    %23 = tpu.matmul %20, %22, %cst_15 {dimension_numbers = #tpu.dot_dimension_numbers<[1], [0], [0], [1], [0, 0, 1, 1], [], []>} : vector<256x128xbf16>, vector<128x128xbf16>, vector<256x128xf32> -> vector<256x128xf32>
    %c0_16 = arith.constant 0 : index
    %c4_17 = arith.constant 4 : index
    %c0_18 = arith.constant 0 : index
    %c0_19 = arith.constant 0 : index
    %24 = vector.load %arg5[%c0_16, %c4_17, %c0_18, %c0_19] : memref<2x9x128x128xbf16, #tpu.memory_space<vmem>>, vector<1x1x128x128xbf16>
    %25 = vector.shape_cast %24 : vector<1x1x128x128xbf16> to vector<128x128xbf16>
    %cst_20 = arith.constant dense<0.000000e+00> : vector<256x128xf32>
    %26 = tpu.matmul %11, %25, %cst_20 {dimension_numbers = #tpu.dot_dimension_numbers<[1], [0], [0], [1], [0, 0, 1, 1], [], []>} : vector<256x128xbf16>, vector<128x128xbf16>, vector<256x128xf32> -> vector<256x128xf32>
    %c2 = arith.constant 2 : index
    %c2_21 = arith.constant 2 : index
    %c0_22 = arith.constant 0 : index
    %27 = vector.load %arg9[%c2, %c2_21, %c0_22] : memref<24x24x128xbf16, #tpu.memory_space<vmem>>, vector<16x16x128xbf16>
    %28 = vector.shape_cast %27 : vector<16x16x128xbf16> to vector<256x128xbf16>
    %c0_23 = arith.constant 0 : index
    %c0_24 = arith.constant 0 : index
    %c0_25 = arith.constant 0 : index
    %c0_26 = arith.constant 0 : index
    %29 = vector.load %arg5[%c0_23, %c0_24, %c0_25, %c0_26] : memref<2x9x128x128xbf16, #tpu.memory_space<vmem>>, vector<1x1x128x128xbf16>
    %30 = vector.shape_cast %29 : vector<1x1x128x128xbf16> to vector<128x128xbf16>
    %cst_27 = arith.constant dense<0.000000e+00> : vector<256x128xf32>
    %31 = tpu.matmul %28, %30, %cst_27 {dimension_numbers = #tpu.dot_dimension_numbers<[1], [0], [0], [1], [0, 0, 1, 1], [], []>} : vector<256x128xbf16>, vector<128x128xbf16>, vector<256x128xf32> -> vector<256x128xf32>
    %32 = arith.addf %26, %31 : vector<256x128xf32>
    %c2_28 = arith.constant 2 : index
    %c4_29 = arith.constant 4 : index
    %c0_30 = arith.constant 0 : index
    %33 = vector.load %arg9[%c2_28, %c4_29, %c0_30] : memref<24x24x128xbf16, #tpu.memory_space<vmem>>, vector<16x16x128xbf16>
    %34 = vector.shape_cast %33 : vector<16x16x128xbf16> to vector<256x128xbf16>
    %c0_31 = arith.constant 0 : index
    %c1 = arith.constant 1 : index
    %c0_32 = arith.constant 0 : index
    %c0_33 = arith.constant 0 : index
    %35 = vector.load %arg5[%c0_31, %c1, %c0_32, %c0_33] : memref<2x9x128x128xbf16, #tpu.memory_space<vmem>>, vector<1x1x128x128xbf16>
    %36 = vector.shape_cast %35 : vector<1x1x128x128xbf16> to vector<128x128xbf16>
    %cst_34 = arith.constant dense<0.000000e+00> : vector<256x128xf32>
    %37 = tpu.matmul %34, %36, %cst_34 {dimension_numbers = #tpu.dot_dimension_numbers<[1], [0], [0], [1], [0, 0, 1, 1], [], []>} : vector<256x128xbf16>, vector<128x128xbf16>, vector<256x128xf32> -> vector<256x128xf32>
    %38 = arith.addf %32, %37 : vector<256x128xf32>
    %c2_35 = arith.constant 2 : index
    %c6 = arith.constant 6 : index
    %c0_36 = arith.constant 0 : index
    %39 = vector.load %arg9[%c2_35, %c6, %c0_36] : memref<24x24x128xbf16, #tpu.memory_space<vmem>>, vector<16x16x128xbf16>
    %40 = vector.shape_cast %39 : vector<16x16x128xbf16> to vector<256x128xbf16>
    %c0_37 = arith.constant 0 : index
    %c2_38 = arith.constant 2 : index
    %c0_39 = arith.constant 0 : index
    %c0_40 = arith.constant 0 : index
    %41 = vector.load %arg5[%c0_37, %c2_38, %c0_39, %c0_40] : memref<2x9x128x128xbf16, #tpu.memory_space<vmem>>, vector<1x1x128x128xbf16>
    %42 = vector.shape_cast %41 : vector<1x1x128x128xbf16> to vector<128x128xbf16>
    %cst_41 = arith.constant dense<0.000000e+00> : vector<256x128xf32>
    %43 = tpu.matmul %40, %42, %cst_41 {dimension_numbers = #tpu.dot_dimension_numbers<[1], [0], [0], [1], [0, 0, 1, 1], [], []>} : vector<256x128xbf16>, vector<128x128xbf16>, vector<256x128xf32> -> vector<256x128xf32>
    %44 = arith.addf %38, %43 : vector<256x128xf32>
    %c4_42 = arith.constant 4 : index
    %c2_43 = arith.constant 2 : index
    %c0_44 = arith.constant 0 : index
    %45 = vector.load %arg9[%c4_42, %c2_43, %c0_44] : memref<24x24x128xbf16, #tpu.memory_space<vmem>>, vector<16x16x128xbf16>
    %46 = vector.shape_cast %45 : vector<16x16x128xbf16> to vector<256x128xbf16>
    %c0_45 = arith.constant 0 : index
    %c3 = arith.constant 3 : index
    %c0_46 = arith.constant 0 : index
    %c0_47 = arith.constant 0 : index
    %47 = vector.load %arg5[%c0_45, %c3, %c0_46, %c0_47] : memref<2x9x128x128xbf16, #tpu.memory_space<vmem>>, vector<1x1x128x128xbf16>
    %48 = vector.shape_cast %47 : vector<1x1x128x128xbf16> to vector<128x128xbf16>
    %cst_48 = arith.constant dense<0.000000e+00> : vector<256x128xf32>
    %49 = tpu.matmul %46, %48, %cst_48 {dimension_numbers = #tpu.dot_dimension_numbers<[1], [0], [0], [1], [0, 0, 1, 1], [], []>} : vector<256x128xbf16>, vector<128x128xbf16>, vector<256x128xf32> -> vector<256x128xf32>
    %50 = arith.addf %44, %49 : vector<256x128xf32>
    %c4_49 = arith.constant 4 : index
    %c6_50 = arith.constant 6 : index
    %c0_51 = arith.constant 0 : index
    %51 = vector.load %arg9[%c4_49, %c6_50, %c0_51] : memref<24x24x128xbf16, #tpu.memory_space<vmem>>, vector<16x16x128xbf16>
    %52 = vector.shape_cast %51 : vector<16x16x128xbf16> to vector<256x128xbf16>
    %c0_52 = arith.constant 0 : index
    %c5 = arith.constant 5 : index
    %c0_53 = arith.constant 0 : index
    %c0_54 = arith.constant 0 : index
    %53 = vector.load %arg5[%c0_52, %c5, %c0_53, %c0_54] : memref<2x9x128x128xbf16, #tpu.memory_space<vmem>>, vector<1x1x128x128xbf16>
    %54 = vector.shape_cast %53 : vector<1x1x128x128xbf16> to vector<128x128xbf16>
    %cst_55 = arith.constant dense<0.000000e+00> : vector<256x128xf32>
    %55 = tpu.matmul %52, %54, %cst_55 {dimension_numbers = #tpu.dot_dimension_numbers<[1], [0], [0], [1], [0, 0, 1, 1], [], []>} : vector<256x128xbf16>, vector<128x128xbf16>, vector<256x128xf32> -> vector<256x128xf32>
    %56 = arith.addf %50, %55 : vector<256x128xf32>
    %c6_56 = arith.constant 6 : index
    %c2_57 = arith.constant 2 : index
    %c0_58 = arith.constant 0 : index
    %57 = vector.load %arg9[%c6_56, %c2_57, %c0_58] : memref<24x24x128xbf16, #tpu.memory_space<vmem>>, vector<16x16x128xbf16>
    %58 = vector.shape_cast %57 : vector<16x16x128xbf16> to vector<256x128xbf16>
    %c0_59 = arith.constant 0 : index
    %c6_60 = arith.constant 6 : index
    %c0_61 = arith.constant 0 : index
    %c0_62 = arith.constant 0 : index
    %59 = vector.load %arg5[%c0_59, %c6_60, %c0_61, %c0_62] : memref<2x9x128x128xbf16, #tpu.memory_space<vmem>>, vector<1x1x128x128xbf16>
    %60 = vector.shape_cast %59 : vector<1x1x128x128xbf16> to vector<128x128xbf16>
    %cst_63 = arith.constant dense<0.000000e+00> : vector<256x128xf32>
    %61 = tpu.matmul %58, %60, %cst_63 {dimension_numbers = #tpu.dot_dimension_numbers<[1], [0], [0], [1], [0, 0, 1, 1], [], []>} : vector<256x128xbf16>, vector<128x128xbf16>, vector<256x128xf32> -> vector<256x128xf32>
    %62 = arith.addf %56, %61 : vector<256x128xf32>
    %c6_64 = arith.constant 6 : index
    %c4_65 = arith.constant 4 : index
    %c0_66 = arith.constant 0 : index
    %63 = vector.load %arg9[%c6_64, %c4_65, %c0_66] : memref<24x24x128xbf16, #tpu.memory_space<vmem>>, vector<16x16x128xbf16>
    %64 = vector.shape_cast %63 : vector<16x16x128xbf16> to vector<256x128xbf16>
    %c0_67 = arith.constant 0 : index
    %c7 = arith.constant 7 : index
    %c0_68 = arith.constant 0 : index
    %c0_69 = arith.constant 0 : index
    %65 = vector.load %arg5[%c0_67, %c7, %c0_68, %c0_69] : memref<2x9x128x128xbf16, #tpu.memory_space<vmem>>, vector<1x1x128x128xbf16>
    %66 = vector.shape_cast %65 : vector<1x1x128x128xbf16> to vector<128x128xbf16>
    %cst_70 = arith.constant dense<0.000000e+00> : vector<256x128xf32>
    %67 = tpu.matmul %64, %66, %cst_70 {dimension_numbers = #tpu.dot_dimension_numbers<[1], [0], [0], [1], [0, 0, 1, 1], [], []>} : vector<256x128xbf16>, vector<128x128xbf16>, vector<256x128xf32> -> vector<256x128xf32>
    %68 = arith.addf %62, %67 : vector<256x128xf32>
    %c6_71 = arith.constant 6 : index
    %c6_72 = arith.constant 6 : index
    %c0_73 = arith.constant 0 : index
    %69 = vector.load %arg9[%c6_71, %c6_72, %c0_73] : memref<24x24x128xbf16, #tpu.memory_space<vmem>>, vector<16x16x128xbf16>
    %70 = vector.shape_cast %69 : vector<16x16x128xbf16> to vector<256x128xbf16>
    %c0_74 = arith.constant 0 : index
    %c8 = arith.constant 8 : index
    %c0_75 = arith.constant 0 : index
    %c0_76 = arith.constant 0 : index
    %71 = vector.load %arg5[%c0_74, %c8, %c0_75, %c0_76] : memref<2x9x128x128xbf16, #tpu.memory_space<vmem>>, vector<1x1x128x128xbf16>
    %72 = vector.shape_cast %71 : vector<1x1x128x128xbf16> to vector<128x128xbf16>
    %cst_77 = arith.constant dense<0.000000e+00> : vector<256x128xf32>
    %73 = tpu.matmul %70, %72, %cst_77 {dimension_numbers = #tpu.dot_dimension_numbers<[1], [0], [0], [1], [0, 0, 1, 1], [], []>} : vector<256x128xbf16>, vector<128x128xbf16>, vector<256x128xf32> -> vector<256x128xf32>
    %74 = arith.addf %68, %73 : vector<256x128xf32>
    %c1_78 = arith.constant 1 : index
    %c0_79 = arith.constant 0 : index
    %75 = vector.load %arg7[%c1_78, %c0_79] : memref<3x128xf32, #tpu.memory_space<vmem>>, vector<1x128xf32>
    %76 = vector.broadcast %75 : vector<1x128xf32> to vector<256x128xf32>
    %77 = arith.addf %74, %76 : vector<256x128xf32>
    %cst_80 = arith.constant 0.000000e+00 : f32
    %78 = vector.broadcast %cst_80 : f32 to vector<256x128xf32>
    %79 = arith.maximumf %77, %78 : vector<256x128xf32>
    %80 = arith.truncf %79 : vector<256x128xf32> to vector<256x128xbf16>
    %c1_81 = arith.constant 1 : index
    %c0_82 = arith.constant 0 : index
    %c0_83 = arith.constant 0 : index
    %81 = vector.load %arg6[%c1_81, %c0_82, %c0_83] : memref<3x128x128xbf16, #tpu.memory_space<vmem>>, vector<1x128x128xbf16>
    %82 = vector.shape_cast %81 : vector<1x128x128xbf16> to vector<128x128xbf16>
    %cst_84 = arith.constant dense<0.000000e+00> : vector<256x128xf32>
    %83 = tpu.matmul %80, %82, %cst_84 {dimension_numbers = #tpu.dot_dimension_numbers<[1], [0], [0], [1], [0, 0, 1, 1], [], []>} : vector<256x128xbf16>, vector<128x128xbf16>, vector<256x128xf32> -> vector<256x128xf32>
    %84 = arith.addf %23, %83 : vector<256x128xf32>
    %c1_85 = arith.constant 1 : index
    %c4_86 = arith.constant 4 : index
    %c0_87 = arith.constant 0 : index
    %c0_88 = arith.constant 0 : index
    %85 = vector.load %arg5[%c1_85, %c4_86, %c0_87, %c0_88] : memref<2x9x128x128xbf16, #tpu.memory_space<vmem>>, vector<1x1x128x128xbf16>
    %86 = vector.shape_cast %85 : vector<1x1x128x128xbf16> to vector<128x128xbf16>
    %cst_89 = arith.constant dense<0.000000e+00> : vector<256x128xf32>
    %87 = tpu.matmul %11, %86, %cst_89 {dimension_numbers = #tpu.dot_dimension_numbers<[1], [0], [0], [1], [0, 0, 1, 1], [], []>} : vector<256x128xbf16>, vector<128x128xbf16>, vector<256x128xf32> -> vector<256x128xf32>
    %c0_90 = arith.constant 0 : index
    %c0_91 = arith.constant 0 : index
    %c0_92 = arith.constant 0 : index
    %88 = vector.load %arg9[%c0_90, %c0_91, %c0_92] : memref<24x24x128xbf16, #tpu.memory_space<vmem>>, vector<16x16x128xbf16>
    %89 = vector.shape_cast %88 : vector<16x16x128xbf16> to vector<256x128xbf16>
    %c1_93 = arith.constant 1 : index
    %c0_94 = arith.constant 0 : index
    %c0_95 = arith.constant 0 : index
    %c0_96 = arith.constant 0 : index
    %90 = vector.load %arg5[%c1_93, %c0_94, %c0_95, %c0_96] : memref<2x9x128x128xbf16, #tpu.memory_space<vmem>>, vector<1x1x128x128xbf16>
    %91 = vector.shape_cast %90 : vector<1x1x128x128xbf16> to vector<128x128xbf16>
    %cst_97 = arith.constant dense<0.000000e+00> : vector<256x128xf32>
    %92 = tpu.matmul %89, %91, %cst_97 {dimension_numbers = #tpu.dot_dimension_numbers<[1], [0], [0], [1], [0, 0, 1, 1], [], []>} : vector<256x128xbf16>, vector<128x128xbf16>, vector<256x128xf32> -> vector<256x128xf32>
    %93 = arith.addf %87, %92 : vector<256x128xf32>
    %c0_98 = arith.constant 0 : index
    %c4_99 = arith.constant 4 : index
    %c0_100 = arith.constant 0 : index
    %94 = vector.load %arg9[%c0_98, %c4_99, %c0_100] : memref<24x24x128xbf16, #tpu.memory_space<vmem>>, vector<16x16x128xbf16>
    %95 = vector.shape_cast %94 : vector<16x16x128xbf16> to vector<256x128xbf16>
    %c1_101 = arith.constant 1 : index
    %c1_102 = arith.constant 1 : index
    %c0_103 = arith.constant 0 : index
    %c0_104 = arith.constant 0 : index
    %96 = vector.load %arg5[%c1_101, %c1_102, %c0_103, %c0_104] : memref<2x9x128x128xbf16, #tpu.memory_space<vmem>>, vector<1x1x128x128xbf16>
    %97 = vector.shape_cast %96 : vector<1x1x128x128xbf16> to vector<128x128xbf16>
    %cst_105 = arith.constant dense<0.000000e+00> : vector<256x128xf32>
    %98 = tpu.matmul %95, %97, %cst_105 {dimension_numbers = #tpu.dot_dimension_numbers<[1], [0], [0], [1], [0, 0, 1, 1], [], []>} : vector<256x128xbf16>, vector<128x128xbf16>, vector<256x128xf32> -> vector<256x128xf32>
    %99 = arith.addf %93, %98 : vector<256x128xf32>
    %c0_106 = arith.constant 0 : index
    %c8_107 = arith.constant 8 : index
    %c0_108 = arith.constant 0 : index
    %100 = vector.load %arg9[%c0_106, %c8_107, %c0_108] : memref<24x24x128xbf16, #tpu.memory_space<vmem>>, vector<16x16x128xbf16>
    %101 = vector.shape_cast %100 : vector<16x16x128xbf16> to vector<256x128xbf16>
    %c1_109 = arith.constant 1 : index
    %c2_110 = arith.constant 2 : index
    %c0_111 = arith.constant 0 : index
    %c0_112 = arith.constant 0 : index
    %102 = vector.load %arg5[%c1_109, %c2_110, %c0_111, %c0_112] : memref<2x9x128x128xbf16, #tpu.memory_space<vmem>>, vector<1x1x128x128xbf16>
    %103 = vector.shape_cast %102 : vector<1x1x128x128xbf16> to vector<128x128xbf16>
    %cst_113 = arith.constant dense<0.000000e+00> : vector<256x128xf32>
    %104 = tpu.matmul %101, %103, %cst_113 {dimension_numbers = #tpu.dot_dimension_numbers<[1], [0], [0], [1], [0, 0, 1, 1], [], []>} : vector<256x128xbf16>, vector<128x128xbf16>, vector<256x128xf32> -> vector<256x128xf32>
    %105 = arith.addf %99, %104 : vector<256x128xf32>
    %c4_114 = arith.constant 4 : index
    %c0_115 = arith.constant 0 : index
    %c0_116 = arith.constant 0 : index
    %106 = vector.load %arg9[%c4_114, %c0_115, %c0_116] : memref<24x24x128xbf16, #tpu.memory_space<vmem>>, vector<16x16x128xbf16>
    %107 = vector.shape_cast %106 : vector<16x16x128xbf16> to vector<256x128xbf16>
    %c1_117 = arith.constant 1 : index
    %c3_118 = arith.constant 3 : index
    %c0_119 = arith.constant 0 : index
    %c0_120 = arith.constant 0 : index
    %108 = vector.load %arg5[%c1_117, %c3_118, %c0_119, %c0_120] : memref<2x9x128x128xbf16, #tpu.memory_space<vmem>>, vector<1x1x128x128xbf16>
    %109 = vector.shape_cast %108 : vector<1x1x128x128xbf16> to vector<128x128xbf16>
    %cst_121 = arith.constant dense<0.000000e+00> : vector<256x128xf32>
    %110 = tpu.matmul %107, %109, %cst_121 {dimension_numbers = #tpu.dot_dimension_numbers<[1], [0], [0], [1], [0, 0, 1, 1], [], []>} : vector<256x128xbf16>, vector<128x128xbf16>, vector<256x128xf32> -> vector<256x128xf32>
    %111 = arith.addf %105, %110 : vector<256x128xf32>
    %c4_122 = arith.constant 4 : index
    %c8_123 = arith.constant 8 : index
    %c0_124 = arith.constant 0 : index
    %112 = vector.load %arg9[%c4_122, %c8_123, %c0_124] : memref<24x24x128xbf16, #tpu.memory_space<vmem>>, vector<16x16x128xbf16>
    %113 = vector.shape_cast %112 : vector<16x16x128xbf16> to vector<256x128xbf16>
    %c1_125 = arith.constant 1 : index
    %c5_126 = arith.constant 5 : index
    %c0_127 = arith.constant 0 : index
    %c0_128 = arith.constant 0 : index
    %114 = vector.load %arg5[%c1_125, %c5_126, %c0_127, %c0_128] : memref<2x9x128x128xbf16, #tpu.memory_space<vmem>>, vector<1x1x128x128xbf16>
    %115 = vector.shape_cast %114 : vector<1x1x128x128xbf16> to vector<128x128xbf16>
    %cst_129 = arith.constant dense<0.000000e+00> : vector<256x128xf32>
    %116 = tpu.matmul %113, %115, %cst_129 {dimension_numbers = #tpu.dot_dimension_numbers<[1], [0], [0], [1], [0, 0, 1, 1], [], []>} : vector<256x128xbf16>, vector<128x128xbf16>, vector<256x128xf32> -> vector<256x128xf32>
    %117 = arith.addf %111, %116 : vector<256x128xf32>
    %c8_130 = arith.constant 8 : index
    %c0_131 = arith.constant 0 : index
    %c0_132 = arith.constant 0 : index
    %118 = vector.load %arg9[%c8_130, %c0_131, %c0_132] : memref<24x24x128xbf16, #tpu.memory_space<vmem>>, vector<16x16x128xbf16>
    %119 = vector.shape_cast %118 : vector<16x16x128xbf16> to vector<256x128xbf16>
    %c1_133 = arith.constant 1 : index
    %c6_134 = arith.constant 6 : index
    %c0_135 = arith.constant 0 : index
    %c0_136 = arith.constant 0 : index
    %120 = vector.load %arg5[%c1_133, %c6_134, %c0_135, %c0_136] : memref<2x9x128x128xbf16, #tpu.memory_space<vmem>>, vector<1x1x128x128xbf16>
    %121 = vector.shape_cast %120 : vector<1x1x128x128xbf16> to vector<128x128xbf16>
    %cst_137 = arith.constant dense<0.000000e+00> : vector<256x128xf32>
    %122 = tpu.matmul %119, %121, %cst_137 {dimension_numbers = #tpu.dot_dimension_numbers<[1], [0], [0], [1], [0, 0, 1, 1], [], []>} : vector<256x128xbf16>, vector<128x128xbf16>, vector<256x128xf32> -> vector<256x128xf32>
    %123 = arith.addf %117, %122 : vector<256x128xf32>
    %c8_138 = arith.constant 8 : index
    %c4_139 = arith.constant 4 : index
    %c0_140 = arith.constant 0 : index
    %124 = vector.load %arg9[%c8_138, %c4_139, %c0_140] : memref<24x24x128xbf16, #tpu.memory_space<vmem>>, vector<16x16x128xbf16>
    %125 = vector.shape_cast %124 : vector<16x16x128xbf16> to vector<256x128xbf16>
    %c1_141 = arith.constant 1 : index
    %c7_142 = arith.constant 7 : index
    %c0_143 = arith.constant 0 : index
    %c0_144 = arith.constant 0 : index
    %126 = vector.load %arg5[%c1_141, %c7_142, %c0_143, %c0_144] : memref<2x9x128x128xbf16, #tpu.memory_space<vmem>>, vector<1x1x128x128xbf16>
    %127 = vector.shape_cast %126 : vector<1x1x128x128xbf16> to vector<128x128xbf16>
    %cst_145 = arith.constant dense<0.000000e+00> : vector<256x128xf32>
    %128 = tpu.matmul %125, %127, %cst_145 {dimension_numbers = #tpu.dot_dimension_numbers<[1], [0], [0], [1], [0, 0, 1, 1], [], []>} : vector<256x128xbf16>, vector<128x128xbf16>, vector<256x128xf32> -> vector<256x128xf32>
    %129 = arith.addf %123, %128 : vector<256x128xf32>
    %c8_146 = arith.constant 8 : index
    %c8_147 = arith.constant 8 : index
    %c0_148 = arith.constant 0 : index
    %130 = vector.load %arg9[%c8_146, %c8_147, %c0_148] : memref<24x24x128xbf16, #tpu.memory_space<vmem>>, vector<16x16x128xbf16>
    %131 = vector.shape_cast %130 : vector<16x16x128xbf16> to vector<256x128xbf16>
    %c1_149 = arith.constant 1 : index
    %c8_150 = arith.constant 8 : index
    %c0_151 = arith.constant 0 : index
    %c0_152 = arith.constant 0 : index
    %132 = vector.load %arg5[%c1_149, %c8_150, %c0_151, %c0_152] : memref<2x9x128x128xbf16, #tpu.memory_space<vmem>>, vector<1x1x128x128xbf16>
    %133 = vector.shape_cast %132 : vector<1x1x128x128xbf16> to vector<128x128xbf16>
    %cst_153 = arith.constant dense<0.000000e+00> : vector<256x128xf32>
    %134 = tpu.matmul %131, %133, %cst_153 {dimension_numbers = #tpu.dot_dimension_numbers<[1], [0], [0], [1], [0, 0, 1, 1], [], []>} : vector<256x128xbf16>, vector<128x128xbf16>, vector<256x128xf32> -> vector<256x128xf32>
    %135 = arith.addf %129, %134 : vector<256x128xf32>
    %c2_154 = arith.constant 2 : index
    %c0_155 = arith.constant 0 : index
    %136 = vector.load %arg7[%c2_154, %c0_155] : memref<3x128xf32, #tpu.memory_space<vmem>>, vector<1x128xf32>
    %137 = vector.broadcast %136 : vector<1x128xf32> to vector<256x128xf32>
    %138 = arith.addf %135, %137 : vector<256x128xf32>
    %cst_156 = arith.constant 0.000000e+00 : f32
    %139 = vector.broadcast %cst_156 : f32 to vector<256x128xf32>
    %140 = arith.maximumf %138, %139 : vector<256x128xf32>
    %141 = arith.truncf %140 : vector<256x128xf32> to vector<256x128xbf16>
    %c2_157 = arith.constant 2 : index
    %c0_158 = arith.constant 0 : index
    %c0_159 = arith.constant 0 : index
    %142 = vector.load %arg6[%c2_157, %c0_158, %c0_159] : memref<3x128x128xbf16, #tpu.memory_space<vmem>>, vector<1x128x128xbf16>
    %143 = vector.shape_cast %142 : vector<1x128x128xbf16> to vector<128x128xbf16>
    %cst_160 = arith.constant dense<0.000000e+00> : vector<256x128xf32>
    %144 = tpu.matmul %141, %143, %cst_160 {dimension_numbers = #tpu.dot_dimension_numbers<[1], [0], [0], [1], [0, 0, 1, 1], [], []>} : vector<256x128xbf16>, vector<128x128xbf16>, vector<256x128xf32> -> vector<256x128xf32>
    %145 = arith.addf %84, %144 : vector<256x128xf32>
    %c0_161 = arith.constant 0 : index
    %c0_162 = arith.constant 0 : index
    %c0_163 = arith.constant 0 : index
    %146 = vector.load %arg3[%c0_161, %c0_162, %c0_163] : memref<1x1x128xf32, #tpu.memory_space<vmem>>, vector<1x1x128xf32>
    %147 = vector.shape_cast %146 : vector<1x1x128xf32> to vector<1x128xf32>
    %148 = vector.broadcast %147 : vector<1x128xf32> to vector<256x128xf32>
    %149 = arith.addf %145, %148 : vector<256x128xf32>
    %cst_164 = arith.constant 0.000000e+00 : f32
    %150 = vector.broadcast %cst_164 : f32 to vector<256x128xf32>
    %151 = arith.maximumf %149, %150 : vector<256x128xf32>
    %152 = vector.shape_cast %151 : vector<256x128xf32> to vector<16x16x128xf32>
    %153 = arith.truncf %152 : vector<16x16x128xf32> to vector<16x16x128xbf16>
    %c0_165 = arith.constant 0 : index
    %c0_166 = arith.constant 0 : index
    %c0_167 = arith.constant 0 : index
    %c0_168 = arith.constant 0 : index
    %154 = vector.load %arg8[%c0_165, %c0_166, %c0_167, %c0_168] : memref<1x16x16x128xbf16, #tpu.memory_space<vmem>>, vector<1x16x16x128xbf16>
    %155 = vector.shape_cast %154 : vector<1x16x16x128xbf16> to vector<16x16x128xbf16>
    %156 = vector.shape_cast %153 : vector<16x16x128xbf16> to vector<1x16x16x128xbf16>
    tpu.vector_store %arg8[%c0_165, %c0_166, %c0_167, %c0_168], %156 {strides = array<i32>} : memref<1x16x16x128xbf16, #tpu.memory_space<vmem>>, vector<1x16x16x128xbf16>,
    return
  }
  func.func @transform_1(%arg0: i32, %arg1: i32) -> (i32, i32, i32) {
    %c0_i32 = arith.constant 0 : i32
    %c0_i32_0 = arith.constant 0 : i32
    %c0_i32_1 = arith.constant 0 : i32
    return %arg0, %c0_i32, %c0_i32_0 : i32, i32, i32
  }
  func.func @transform_2(%arg0: i32, %arg1: i32) -> (i32, i32, i32) {
    %c0_i32 = arith.constant 0 : i32
    %c0_i32_0 = arith.constant 0 : i32
    %c0_i32_1 = arith.constant 0 : i32
    %c0_i32_2 = arith.constant 0 : i32
    return %c0_i32, %c0_i32_0, %c0_i32_1 : i32, i32, i32
  }
  func.func @transform_3(%arg0: i32, %arg1: i32) -> (i32, i32, i32, i32) {
    %c0_i32 = arith.constant 0 : i32
    %c0_i32_0 = arith.constant 0 : i32
    %c0_i32_1 = arith.constant 0 : i32
    %c0_i32_2 = arith.constant 0 : i32
    %c0_i32_3 = arith.constant 0 : i32
    return %c0_i32, %c0_i32_0, %c0_i32_1, %c0_i32_2 : i32, i32, i32, i32
  }
  func.func @transform_4(%arg0: i32, %arg1: i32) -> (i32, i32, i32) {
    %c0_i32 = arith.constant 0 : i32
    %c0_i32_0 = arith.constant 0 : i32
    %c0_i32_1 = arith.constant 0 : i32
    %c0_i32_2 = arith.constant 0 : i32
    return %c0_i32, %c0_i32_0, %c0_i32_1 : i32, i32, i32
  }
  func.func @transform_5(%arg0: i32, %arg1: i32) -> (i32, i32) {
    %c0_i32 = arith.constant 0 : i32
    %c0_i32_0 = arith.constant 0 : i32
    %c0_i32_1 = arith.constant 0 : i32
    return %c0_i32, %c0_i32_0 : i32, i32
  }
  func.func @transform_6(%arg0: i32, %arg1: i32) -> (i32, i32, i32, i32) {
    %c0_i32 = arith.constant 0 : i32
    %c0_i32_0 = arith.constant 0 : i32
    %c0_i32_1 = arith.constant 0 : i32
    return %arg0, %arg1, %c0_i32, %c0_i32_0 : i32, i32, i32, i32
  }
}

</mosaic_0001>

<bundles_post_ra>
// kernel: tpu_custom_call.1
= control target key start
LH: loop header
LB: loop body
LE: loop exit
PB: predicated region body
PF: predicated region fallthrough
CT: control target
= control target key end

     0   :  { %s15166_s0 = inlined_call_operand.hbm [shape: bf16[2,24,24,128], index: 0, kind: input, shape index: {}]   ;;  %s15167_s1 = inlined_call_operand.vmem [shape: f32[2,1,128], index: 1, kind: input, shape index: {}]   ;;  %s15168_s2 = inlined_call_operand.hbm [shape: bf16[1,128,128], index: 2, kind: input, shape index: {}]   ;;  %s15169_s3 = inlined_call_operand.hbm [shape: bf16[2,9,128,128], index: 3, kind: input, shape index: {}]   ;;  %s15170_s4 = inlined_call_operand.hbm [shape: bf16[3,128,128], index: 4, kind: input, shape index: {}]   ;;  %s15171_s5 = inlined_call_operand.vmem [shape: f32[3,128], index: 5, kind: input, shape index: {}]   ;;  %s15172_s6 = inlined_call_operand.hbm [shape: bf16[2,16,16,128], index: 6, kind: output, shape index: {}]  }
   0x1   :  { %15179 = sst [smem:[#allocation22_spill]] %s15169_s3 }
   0x2   :  { %11 = vsyncpa [#allocation5], 0 }
   0x3   :  { %12 = vsyncpa [#allocation8], 0 }
   0x4   :  { %13 = vsyncpa [#allocation6], 0 }
   0x5   :  { %15 = vsyncpa [#allocation6 + $0x1], 0  ;;  %s13447_s21 = smov 0   ;;  %s13449_s22 = smov 0  }
   0x6   :  { %s13451_s23 = smov 0   ;;  %s13453_s24 = smov 0  }
   0x7   :  { %s13455_s25 = smov 0   ;;  %s13457_s26 = smov 0  }
   0x8 LB: > { %15180 = sst [smem:[#allocation19_spill]] %s13397_s25  ;;  %s9817_s27 = sadd.s32 4294967295, %s13401_s26   ;;  %s13401_s26 = sphi %s13457_s26, %s21_s26   ;;  %s13397_s25 = sphi %s13455_s25, %s15202_s25   ;;  %s13393_s24 = sphi %s13453_s24, %s15201_s24   ;;  %s13389_s23 = sphi %s13451_s23, %s15205_s23   ;;  %s13385_s22 = sphi %s13449_s22, %s15204_s22   ;;  %s13381_s21 = sphi %s13447_s21, %s15203_s21  }
   0x9   : > { %s9818_s28 = sadd.s32 4294967294, %s13401_s26   ;;  %s33_s29 = sadd.s32 1, %s13397_s25 }
   0xa   : > { %s152_s30 = sadd.s32 1, %s13389_s23  ;;  %p35_p0 = scmp.ge.s32.totalorder %s33_s29, 2 }
   0xb   : > { %p162_p1 = scmp.ne.s32.totalorder %s13389_s23, %s13385_s22  ;;  %p163_p2 = scmp.eq.s32.totalorder %s9817_s27, 1 }
   0xc   : > { %p168_p3 = scmp.ne.s32.totalorder %s13385_s22, %s13381_s21  ;;  %s15207_s29 = smov (%p35_p0, %s33_s29), 0 }
   0xd   : > { %15181 = sst [smem:[#allocation20_spill]] %s15207_s29  ;;  %p13487_p4 = por %p163_p2, %p162_p1 }
   0xe   : > { %p169_p5 = scmp.eq.s32.totalorder %s9818_s28, 1  ;;  %s147_s8 = ssub.s32 %s13397_s25, %s15207_s29 }
   0xf   : > { %s15182_s7 = scalar_select %p13487_p4, 1, 0 }
  0x10   : > { %p9819_p6 = scmp.ge.s32.totalorder %s13401_s26, 1  ;;  %p150_p7 = scmp.eq.s32.totalorder %s147_s8, 0 }
  0x11   : > { %p13494_p8 = por %p169_p5, %p168_p3  ;;  %p176_p9 = scmp.lt.s32.totalorder %s13401_s26, 3 }
  0x12   : > { %s13500_s10 = scalar_select %p150_p7, %s13389_s23, %s152_s30  }
  0x13   : > { %s15183_s9 = scalar_select %p13494_p8, 1, 0 }
  0x14   : > { %15184 = sst [smem:[#allocation21_spill]] %s13500_s10  ;;  %p13502_p10 = pnand %p9819_p6, %p176_p9 }
  0x15   : > { %p13506_p11 = scmp.eq.s32.totalorder %s9817_s27, 0  ;;  %s13403_s13 = smov [#allocation7]  }
  0x16   : > { %s15185_s11 = scalar_select %p13502_p10, 1, 0 }
  0x17   : > { %s15186_s12 = scalar_select %p13506_p11, 1, 0 }
  0x18   : > { %p12799_p12 = pneg %p13502_p10  ;;  %s201_s14 = sshll.u32 %s13403_s13, 4  ;;  %s202_s14 = int_to_ptr.vmem [resolvable:$true] %s201_s14 }
  0x19   : > { %s13404_s16 = smov [#allocation4]   ;;  %s15188_s3 = sld [smem:[#allocation22_spill]] }
  0x1a   : > { %p13514_p13 = pnand %p13506_p11, %p12799_p12  ;;  %s188_s17 = sshll.u32 %s13404_s16, 4  ;;  %s189_s17 = int_to_ptr.vmem [resolvable:$true] %s188_s17 }
  0x1c   : > { %p13526_p1 = pneg %p13514_p13 }
  0x1f   : > { %s13205_s20 = scalar_lea.hbm %s15188_s3, 18432 }
  0x20   : > { %p13206_p0 = scmp.ne.s32.totalorder %s15188_s3, %s13205_s20  ;;  %p13212_p5 = scmp.lt.u32.totalorder %s13205_s20, %s15188_s3 }
  0x22   : > { %p13208_p2 = pnand %p13526_p1, %p13206_p0 }
  0x24   : > { %p13209_p3 = pneg %p13208_p2 }
  0x26   : > { %p13214_p6 = pnand %p13212_p5, %p13209_p3 }
  0x28   : > { %13217 = shalt.err (!%p13214_p6)
}
  0x29   : > { %s13218_s16 = scalar_lea.vmem %s202_s14, 18432  ;;  %p13226_p8 = scmp.lt.s32.totalorder %s202_s14, %s202_s14 }
  0x2a   : > { %p13219_p7 = scmp.ne.s32.totalorder %s202_s14, %s13218_s16  ;;  %p13227_p4 = scmp.lt.s32.totalorder %s13218_s16, %s13218_s16 }
  0x2c   : > { %p13221_p9 = pnand %p13219_p7, %p13526_p1  ;;  %p13228_p11 = por %p13227_p4, %p13226_p8 }
  0x2e   : > { %p13222_p12 = pneg %p13221_p9 }
  0x30   : > { %p13229_p10 = pnand %p13228_p11, %p13222_p12 }
  0x32   : > { %13232 = shalt.err (!%p13229_p10)
}
  0x33   : > { %s13405_s18 = smov 64   ;;  %s13406_s19 = smov 4  }
  0x34   : > { %12805 = dma.hbm_to_vmem [thread:$0]  (!%p13514_p13), %s15188_s3, 18432, %s202_s14, [#allocation8], %s13405_s18, %s13405_s18, %s13406_s19  }
  0x35   : > { %s13233_s13 = scalar_lea.hbm %s15168_s2, 1024 }
  0x36   : > { %p13234_p4 = scmp.ne.s32.totalorder %s15168_s2, %s13233_s13  ;;  %p13240_p11 = scmp.lt.u32.totalorder %s13233_s13, %s15168_s2 }
  0x38   : > { %p13236_p8 = pnand %p13234_p4, %p13526_p1 }
  0x3a   : > { %p13237_p10 = pneg %p13236_p8 }
  0x3c   : > { %p13242_p0 = pnand %p13240_p11, %p13237_p10 }
  0x3e   : > { %13245 = shalt.err (!%p13242_p0)
}
  0x3f   : > { %s13246_s20 = scalar_lea.vmem %s189_s17, 1024  ;;  %p13254_p6 = scmp.lt.s32.totalorder %s189_s17, %s189_s17 }
  0x40   : > { %p13247_p2 = scmp.ne.s32.totalorder %s189_s17, %s13246_s20  ;;  %p13255_p7 = scmp.lt.s32.totalorder %s13246_s20, %s13246_s20 }
  0x42   : > { %p13249_p3 = pnand %p13247_p2, %p13526_p1  ;;  %p13256_p9 = por %p13255_p7, %p13254_p6 }
  0x44   : > { %p13250_p5 = pneg %p13249_p3 }
  0x46   : > { %p13257_p12 = pnand %p13256_p9, %p13250_p5 }
  0x48   : > { %13260 = shalt.err (!%p13257_p12)
}
  0x49   : > { %12802 = dma.hbm_to_vmem [thread:$0]  (!%p13514_p13), %s15168_s2, 1024, %s189_s17, [#allocation5], %s13405_s18, %s13405_s18, %s13406_s19  }
  0x4a   : > { %s13407_s10 = smov [#allocation9]   ;;  %s13261_s8 = scalar_lea.hbm %s15170_s4, 3072 }
  0x4b   : > { %s214_s14 = sshll.u32 %s13407_s10, 4  ;;  %p13262_p4 = scmp.ne.s32.totalorder %s15170_s4, %s13261_s8  ;;  %s215_s14 = int_to_ptr.vmem [resolvable:$true] %s214_s14 }
  0x4c   : > { %p13268_p11 = scmp.lt.u32.totalorder %s13261_s8, %s15170_s4 }
  0x4d   : > { %p13264_p8 = pnand %p13262_p4, %p13526_p1 }
  0x4f   : > { %p13265_p10 = pneg %p13264_p8 }
  0x51   : > { %p13270_p0 = pnand %p13268_p11, %p13265_p10 }
  0x53   : > { %13273 = shalt.err (!%p13270_p0)
}
  0x54   : > { %s13274_s17 = scalar_lea.vmem %s215_s14, 3072  ;;  %p13282_p6 = scmp.lt.s32.totalorder %s215_s14, %s215_s14 }
  0x55   : > { %p13275_p2 = scmp.ne.s32.totalorder %s215_s14, %s13274_s17  ;;  %p13283_p7 = scmp.lt.s32.totalorder %s13274_s17, %s13274_s17 }
  0x57   : > { %p13277_p3 = pnand %p13275_p2, %p13526_p1  ;;  %p13284_p9 = por %p13283_p7, %p13282_p6 }
  0x59   : > { %p13278_p5 = pneg %p13277_p3 }
  0x5b   : > { %p13285_p12 = pnand %p13284_p9, %p13278_p5 }
  0x5d   : > { %13288 = shalt.err (!%p13285_p12)
}
  0x5e   : > { %12808 = dma.hbm_to_vmem [thread:$0]  (!%p13514_p13), %s15170_s4, 3072, %s215_s14, [#allocation8], %s13405_s18, %s13405_s18, %s13406_s19  }
  0x5f   : > { %p15190_p4 = scmp.ne.s32.totalorder %s15185_s11, 0 }
  0x60   : > { %p15191_p1 = scmp.ne.s32.totalorder (!%p15190_p4), %s15186_s12, 0 }
  0x61   : > { %239 = sbr.rel (%p15190_p4) target bundleno = 1481 (0x5c9), region = 40 }
  0x68   : > { %13366 = dma.done.wait (%p15191_p1), [#allocation5], 1024  }
  0x69   : > { %13368 = vsyncadd (%p15191_p1), [#allocation5], 4294966272 }
  0x6a   : > { %13370 = dma.done.wait (%p15191_p1), [#allocation8], 21504  }
  0x6b   : > { %13372 = vsyncadd (%p15191_p1), [#allocation8], 4294945792  ;;  %s270_s15 = sand.u32 1, %s13385_s22   ;;  %p273_p13 = scmp.lt.s32.totalorder %s13393_s24, 1 }
  0x6c   : > { %s9828_s11 = sshll.u32 %s270_s15, 7  ;;  %s10496_s30 = smul.u32 4608, %s13393_s24 }
  0x6d   : > { %s13603_s18 = scalar_select %p273_p13, %s13393_s24, 1 }
  0x6e   : > { %s283_s10 = scalar_lea.hbm %s15166_s0, %s10496_s30  ;;  %s13408_s14 = smov [#allocation2]  }
  0x6f   : > { %s291_s12 = sshll.u32 %s13408_s14, 4  ;;  %s275_s8 = scalar_lea.vmem %s15167_s1, %s13603_s18  ;;  %s292_s12 = int_to_ptr.vmem [resolvable:$true] %s291_s12 }
  0x70   : > { %s13289_s13 = scalar_lea.hbm %s283_s10, 4608  ;;  %s13291_s17 = scalar_lea.hbm %s15166_s0, 9216 }
  0x71   : > { %p13290_p8 = scmp.ne.s32.totalorder %s283_s10, %s13289_s13  ;;  %p13292_p10 = scmp.lt.u32.totalorder %s283_s10, %s15166_s0 }
  0x72   : > { %p13293_p11 = scmp.lt.u32.totalorder %s13291_s17, %s13289_s13  ;;  %p13295_p2 = scmp.lt.u32.totalorder %s13289_s13, %s283_s10 }
  0x74   : > { %p13294_p0 = por %p13293_p11, %p13292_p10 }
  0x76   : > { %p13296_p3 = por %p13295_p2, %p13294_p0 }
  0x78   : > { %p13297_p5 = pnand %p13296_p3, %p13290_p8 }
  0x7a   : > { %13300 = shalt.err (!%p13297_p5)  }
  0x7b   : > { %s13301_s30 = scalar_lea.vmem %s292_s12, 4608  ;;  %p13306_p7 = scmp.lt.s32.totalorder %s292_s12, %s292_s12 }
  0x7c   : > { %p13302_p6 = scmp.ne.s32.totalorder %s292_s12, %s13301_s30  ;;  %p13307_p9 = scmp.lt.s32.totalorder %s13301_s30, %s13301_s30 }
  0x7e   : > { %p13308_p12 = por %p13307_p9, %p13306_p7 }
  0x80   : > { %p13309_p4 = pnand %p13308_p12, %p13302_p6 }
  0x82   : > { %13312 = shalt.err (!%p13309_p4)  }
  0x83   : > { %294 = dma.hbm_to_vmem [thread:$0]  %s283_s10, 4608, %s292_s12, [#allocation3] }
  0x84   : > { %s13618_s19 = scalar_lea.vmem [#allocation10], %s9828_s11 }
  0x85   : > { %13373 = dma.done.wait [#allocation3], 4608 }
  0x86   : > { %13374 = vsyncadd [#allocation3], 4294962688  ;;  %v12876_v0 = vld [vmem:[#allocation4] sm:$0xff]   ;;  %v12877_v1 = vld [vmem:[#allocation4 + $0x8] sm:$0xff]   ;;  %vm397_vm0 = vcmask 1041408   ;;  %vm398_vm1 = vcmask 1045508  }
  0x87   : > { %11153 = vmatprep.subr.bf16.mxu1 %v12876_v0  ;;  %v12878_v2 = vld [vmem:[#allocation4 + $0x10] sm:$0xff]   ;;  %vm13620_vm2 = vmor %vm397_vm0, %vm398_vm1  ;;  %v12879_v4 = vld [vmem:[#allocation4 + $0x18] sm:$0xff]   ;;  %vm984_vm3 = vcmask 1042432   ;;  %vm985_vm4 = vcmask 1046532   ;;  %vm2159_vm6 = vcmask 1040384   ;;  %vm2160_vm7 = vcmask 1044484  }
  0x88   : > { %11154 = vmatpush3.bf16.msra.mxu1 %v12876_v0  ;;  %v301_v5 = vld [vmem:[#allocation2 + $0x30] sm:$0xc]  ;;  %v302_v6 = vld [vmem:[#allocation2 + $0x34] sm:$0xf]  ;;  %v303_v7 = vld [vmem:[#allocation2 + $0x38] sm:$0x3] }
  0x89   : > { %11155 = vmatprep.subr.bf16.mxu1 %v12877_v1  ;;  %v9830_v8 = vrot.slane %v301_v5, 10  ;;  %v402_v9 = vrot.slane %v302_v6, 6  ;;  %v405_v10 = vrot.slane %v303_v7, 6  ;;  %v12880_v13 = vld [vmem:[#allocation4 + $0x20] sm:$0xff]   ;;  %v12881_v16 = vld [vmem:[#allocation4 + $0x28] sm:$0xff]   ;;  %v12882_v20 = vld [vmem:[#allocation4 + $0x30] sm:$0xff]  }
  0x8a   : > { %v305_v17 = vld [vmem:[#allocation2 + $0x40] sm:$0xf]  ;;  %v308_v18 = vld [vmem:[#allocation2 + $0x4c] sm:$0xf]  ;;  %v304_v21 = vld [vmem:[#allocation2 + $0x3c] sm:$0xc] }
  0x8b   : > { %v403_v11 = vsel %vm13620_vm2, %v9830_v8, %v402_v9  ;;  %v404_v12 = vrot.slane %v402_v9, 4  ;;  %v409_v19 = vrot.slane %v305_v17, 6  ;;  %v306_v22 = vld [vmem:[#allocation2 + $0x44] sm:$0x3]  ;;  %v416_v23 = vrot.slane %v308_v18, 6  ;;  %v12883_v29 = vld [vmem:[#allocation4 + $0x38] sm:$0xff]   ;;  %vm13741_vm5 = vmor %vm984_vm3, %vm985_vm4 }
  0x8c   : > { %11156 = vmatpush3.bf16.msra.mxu1 %v12877_v1  ;;  %v307_v24 = vld [vmem:[#allocation2 + $0x48] sm:$0xc]  ;;  %v309_v25 = vld [vmem:[#allocation2 + $0x50] sm:$0x3]  ;;  %v9831_v26 = vrot.slane %v304_v21, 10  ;;  %v412_v28 = vrot.slane %v306_v22, 6  ;;  %vm13990_vm8 = vmor %vm2159_vm6, %vm2160_vm7 }
  0x8d   : > { %11157 = vmatprep.subr.bf16.mxu1 %v12878_v2  ;;  %v406_v14 = vsel %vm13620_vm2, %v404_v12, %v405_v10  ;;  %v411_v27 = vrot.slane %v409_v19, 4  ;;  %v9832_v30 = vrot.slane %v307_v24, 10  ;;  %v418_v31 = vrot.slane %v416_v23, 4  ;;  %v311_v33 = vld [vmem:[#allocation2 + $0x58] sm:$0xf]  ;;  %v12884_v44 = vld [vmem:[#allocation7] sm:$0xff]  }
  0x8e   : > { %v13628_v15 = vcombine.low %v403_v11, %v406_v14  ;;  %v419_v32 = vrot.slane %v309_v25, 6  ;;  %v314_v34 = vld [vmem:[#allocation2 + $0x64] sm:$0xf]  ;;  %v310_v35 = vld [vmem:[#allocation2 + $0x54] sm:$0xc]  ;;  %v410_v36 = vsel %vm13620_vm2, %v9831_v26, %v409_v19  ;;  %v423_v39 = vrot.slane %v311_v33, 6 }
  0x8f   : > { %v413_v37 = vsel %vm13620_vm2, %v411_v27, %v412_v28  ;;  %v312_v38 = vld [vmem:[#allocation2 + $0x5c] sm:$0x3]  ;;  %v417_v40 = vsel %vm13620_vm2, %v9832_v30, %v416_v23  ;;  %v313_v42 = vld [vmem:[#allocation2 + $0x60] sm:$0xc]  ;;  %v430_v43 = vrot.slane %v314_v34, 6  ;;  %v9833_v47 = vrot.slane %v310_v35, 10 }
  0x90   : > { %11158 = vmatpush3.bf16.msra.mxu1 %v12878_v2  ;;  %11169 = vmatprep.mubr.bf16.mxu1 %v13628_v15  ;;  %v420_v41 = vsel %vm13620_vm2, %v418_v31, %v419_v32  ;;  %v315_v45 = vld [vmem:[#allocation2 + $0x68] sm:$0x3]  ;;  %v13639_v46 = vcombine.low %v410_v36, %v413_v37  ;;  %v426_v48 = vrot.slane %v312_v38, 6  ;;  %v425_v51 = vrot.slane %v423_v39, 4  ;;  %v317_v55 = vld [vmem:[#allocation2 + $0x70] sm:$0xf] }
  0x91   : > { %11159 = vmatprep.subr.bf16.mxu1 %v12879_v4  ;;  %v12885_v49 = vld [vmem:[#allocation7 + $0x8] sm:$0xff]   ;;  %v13641_v50 = vcombine.low %v417_v40, %v420_v41  ;;  %v9834_v52 = vrot.slane %v313_v42, 10  ;;  %v432_v53 = vrot.slane %v430_v43, 4  ;;  %v433_v54 = vrot.slane %v315_v45, 6  ;;  %v320_v56 = vld [vmem:[#allocation2 + $0x7c] sm:$0xf] }
  0x92   : > { %v316_v57 = vld [vmem:[#allocation2 + $0x6c] sm:$0xc]  ;;  %v318_v58 = vld [vmem:[#allocation2 + $0x74] sm:$0x3]  ;;  %v424_v59 = vsel %vm13620_vm2, %v9833_v47, %v423_v39  ;;  %v427_v60 = vsel %vm13620_vm2, %v425_v51, %v426_v48  ;;  %v437_v61 = vrot.slane %v317_v55, 6  ;;  %v444_v1 = vrot.slane %v320_v56, 6 }
  0x93   : > { %v319_v62 = vld [vmem:[#allocation2 + $0x78] sm:$0xc]  ;;  %v431_v63 = vsel %vm13620_vm2, %v9834_v52, %v430_v43  ;;  %v434_v0 = vsel %vm13620_vm2, %v432_v53, %v433_v54  ;;  %v12886_v2 = vld [vmem:[#allocation7 + $0x10] sm:$0xff]   ;;  %v13653_v5 = vcombine.low %v424_v59, %v427_v60  ;;  %v9835_v6 = vrot.slane %v316_v57, 10  ;;  %v323_v14 = vld [vmem:[#allocation2 + $0x88] sm:$0xf] }
  0x94   : > { %11160 = vmatpush3.bf16.msra.mxu1 %v12879_v4  ;;  %v321_v4 = vld [vmem:[#allocation2 + $0x80] sm:$0x3]  ;;  %v13655_v7 = vcombine.low %v431_v63, %v434_v0  ;;  %v439_v8 = vrot.slane %v437_v61, 4  ;;  %v440_v9 = vrot.slane %v318_v58, 6  ;;  %v9836_v10 = vrot.slane %v319_v62, 10  ;;  %v12887_v11 = vld [vmem:[#allocation7 + $0x18] sm:$0xff]  }
  0x95   : > { %11161 = vmatprep.subr.bf16.mxu1 %v12880_v13  ;;  %v446_v12 = vrot.slane %v444_v1, 4  ;;  %v438_v17 = vsel %vm13620_vm2, %v9835_v6, %v437_v61  ;;  %v451_v19 = vrot.slane %v323_v14, 6  ;;  %v322_v22 = vld [vmem:[#allocation2 + $0x84] sm:$0xc]  ;;  %v324_v23 = vld [vmem:[#allocation2 + $0x8c] sm:$0x3] }
  0x96   : > { %v441_v18 = vsel %vm13620_vm2, %v439_v8, %v440_v9  ;;  %v12888_v25 = vld [vmem:[#allocation7 + $0x20] sm:$0xff]   ;;  %v325_v26 = vld [vmem:[#allocation2 + $0x90] sm:$0xc]  ;;  %v327_v27 = vld [vmem:[#allocation2 + $0x98] sm:$0x3]  ;;  %v9837_v30 = vrot.slane %v322_v22, 10 }
  0x97   : > { %v13667_v28 = vcombine.low %v438_v17, %v441_v18  ;;  %v453_v31 = vrot.slane %v451_v19, 4  ;;  %v454_v32 = vrot.slane %v324_v23, 6  ;;  %v9838_v33 = vrot.slane %v325_v26, 10  ;;  %v329_v36 = vld [vmem:[#allocation2 + $0xa0] sm:$0xf]  ;;  %v12889_v37 = vld [vmem:[#allocation7 + $0x28] sm:$0xff]  }
  0x98   : > { %11162 = vmatpush3.bf16.msra.mxu1 %v12880_v13  ;;  %v447_v13 = vrot.slane %v321_v4, 6  ;;  %v461_v35 = vrot.slane %v327_v27, 6  ;;  %v332_v38 = vld [vmem:[#allocation2 + $0xac] sm:$0xf]  ;;  %v452_v39 = vsel %vm13620_vm2, %v9837_v30, %v451_v19  ;;  %v465_v41 = vrot.slane %v329_v36, 6  ;;  %v12890_v48 = vld [vmem:[#allocation7 + $0x30] sm:$0xff]  }
  0x99   : > { %11163 = vmatprep.subr.bf16.mxu1 %v12881_v16  ;;  %v455_v40 = vsel %vm13620_vm2, %v453_v31, %v454_v32  ;;  %v330_v45 = vld [vmem:[#allocation2 + $0xa4] sm:$0x3]  ;;  %v472_v47 = vrot.slane %v332_v38, 6  ;;  %v333_v51 = vld [vmem:[#allocation2 + $0xb0] sm:$0x3]  ;;  %v12891_v61 = vld [vmem:[#allocation7 + $0x38] sm:$0xff]  }
  0x9a   : > { %v448_v21 = vsel %vm13620_vm2, %v446_v12, %v447_v13  ;;  %v13681_v52 = vcombine.low %v452_v39, %v455_v40  ;;  %v467_v55 = vrot.slane %v465_v41, 4  ;;  %v468_v56 = vrot.slane %v330_v45, 6  ;;  %v335_v60 = vld [vmem:[#allocation2 + $0xb8] sm:$0xf]  ;;  %v338_v62 = vld [vmem:[#allocation2 + $0xc4] sm:$0xf] }
  0x9b   : > { %v474_v58 = vrot.slane %v472_v47, 4  ;;  %v475_v59 = vrot.slane %v333_v51, 6  ;;  %v334_v63 = vld [vmem:[#allocation2 + $0xb4] sm:$0xc]  ;;  %v336_v0 = vld [vmem:[#allocation2 + $0xbc] sm:$0x3] }
  0x9c   : > { %11164 = vmatpush3.bf16.msra.mxu1 %v12881_v16  ;;  %v326_v16 = vld [vmem:[#allocation2 + $0x94] sm:$0xf]  ;;  %v479_v4 = vrot.slane %v335_v60, 6  ;;  %v337_v6 = vld [vmem:[#allocation2 + $0xc0] sm:$0xc]  ;;  %v482_v17 = vrot.slane %v336_v0, 6 }
  0x9d   : > { %11165 = vmatprep.subr.bf16.mxu1 %v12882_v20  ;;  %v458_v24 = vrot.slane %v326_v16, 6  ;;  %v476_v9 = vsel %vm13620_vm2, %v474_v58, %v475_v59  ;;  %v13695_v12 = vld [vmem:[#allocation7 + $0x100] sm:$0xff]   ;;  %v341_v13 = vld [vmem:[#allocation2 + $0xd0] sm:$0xf]  ;;  %v9841_v16 = vrot.slane %v334_v63, 10  ;;  %s10529_s18 = sshll.u32 %s13393_s24, 11 }
  0x9e   : > { %v481_v19 = vrot.slane %v479_v4, 4  ;;  %v340_v23 = vld [vmem:[#allocation2 + $0xcc] sm:$0xc]  ;;  %v344_v26 = vld [vmem:[#allocation2 + $0xdc] sm:$0xf]  ;;  %s15112_s17 = scalar_lea.hbm %s15172_s6, %s10529_s18  ;;  %s15120_s24 = scalar_lea.sflag [#allocation6], %s270_s15 }
  0x9f   : > { %v460_v34 = vrot.slane %v458_v24, 4  ;;  %v459_v42 = vsel %vm13620_vm2, %v9838_v33, %v458_v24  ;;  %v342_v24 = vld [vmem:[#allocation2 + $0xd4] sm:$0x3]  ;;  %v347_v27 = vld [vmem:[#allocation2 + $0xe8] sm:$0xf]  ;;  %v480_v30 = vsel %vm13620_vm2, %v9841_v16, %v479_v4  ;;  %v9843_v32 = vrot.slane %v340_v23, 10 }
  0xa0   : > { %11166 = vmatpush3.bf16.msra.mxu1 %v12882_v20  ;;  %v445_v20 = vsel %vm13620_vm2, %v9836_v10, %v444_v1  ;;  %v339_v10 = vld [vmem:[#allocation2 + $0xc8] sm:$0x3]  ;;  %v483_v31 = vsel %vm13620_vm2, %v481_v19, %v482_v17  ;;  %v343_v33 = vld [vmem:[#allocation2 + $0xd8] sm:$0xc]  ;;  %v500_v38 = vrot.slane %v344_v26, 6  ;;  %p15198_p13 = scmp.ne.s32.totalorder %s15182_s7, 0 }
  0xa1   : > { %11167 = vmatprep.subr.bf16.mxu1 %v12883_v29  ;;  %v462_v43 = vsel %vm13620_vm2, %v460_v34, %v461_v35  ;;  %v345_v34 = vld [vmem:[#allocation2 + $0xe0] sm:$0x3]  ;;  %v346_v39 = vld [vmem:[#allocation2 + $0xe4] sm:$0xc]  ;;  %v348_v40 = vld [vmem:[#allocation2 + $0xec] sm:$0x3]  ;;  %v13714_v45 = vcombine.low %v480_v30, %v483_v31 }
  0xa2   : > { %v13683_v53 = vcombine.low %v459_v42, %v462_v43  ;;  %v507_v42 = vrot.slane %v347_v27, 6  ;;  %v888_v43 = vld [vmem:[#allocation2 + $0x18] sm:$0xe]  ;;  %v9844_v51 = vrot.slane %v343_v33, 10  ;;  %v510_v59 = vrot.slane %v348_v40, 6  ;;  %s13409_s25 = smov [#allocation10]  }
  0xa3   : > { %v9871_v60 = vrot.slane %v888_v43, 9  ;;  %v893_v63 = vld [vmem:[#allocation2 + $0x2c] sm:$0x1]  ;;  %v896_v16 = vld [vmem:[#allocation2 + $0x38] sm:$0x1]  ;;  %s13317_s30 = sshll.u32 %s13409_s25, 4  ;;  %s13318_s30 = int_to_ptr.vmem [resolvable:$false] %s13317_s30 }
  0xa4   : > { %11168 = vmatpush3.bf16.msra.mxu1 %v12883_v29  ;;  %v13669_v29 = vcombine.low %v445_v20, %v448_v21  ;;  %v9842_v20 = vrot.slane %v337_v6, 10  ;;  %v489_v21 = vrot.slane %v339_v10, 6  ;;  %v509_v58 = vrot.slane %v507_v42, 4  ;;  %v894_v6 = vld [vmem:[#allocation2 + $0x30] sm:$0xe]  ;;  %s13319_s11 = scalar_lea.vmem %s13318_s30, 4096 }
  0xa5   : > { %11201 = vmatprep.subr.bf16.mxu1 %v12884_v44  ;;  %v9873_v23 = vrot.slane %v894_v6, 9  ;;  %v13751_v30 = vld [vmem:[#allocation2 + $0x40] sm:$0xf]  ;;  %v13753_v31 = vld [vmem:[#allocation2 + $0x4c] sm:$0xf] }
  0xa6   : > { %v511_v27 = vsel %vm13620_vm2, %v509_v58, %v510_v59  ;;  %v1010_v40 = vrot.slane %v13751_v30, 5  ;;  %v905_v6 = vld [vmem:[#allocation2 + $0x5c] sm:$0x1] }
  0xa7   : > { %11170 = vmatmul.mubr.bf16.vlgmr.msra.gmra.mrb[0].mxu1 %v13639_v46 }
  0xa8   : > { %11173 = vmatprep.mubr.bf16.mxu1 %v13641_v50  ;;  %11202 = vmatpush3.bf16.msra.mxu1 %v12884_v44  ;;  %v328_v44 = vld [vmem:[#allocation2 + $0x9c] sm:$0xc]  ;;  %v1012_v59 = vrot.slane %v1010_v40, 4 }
  0xa9   : > { %11203 = vmatprep.subr.bf16.mxu1 %v12885_v49  ;;  %v9839_v54 = vrot.slane %v328_v44, 10  ;;  %v13712_v44 = vld [vmem:[#allocation2 + $0x1c] sm:$0xf] }
  0xab   : > { %v466_v1 = vsel %vm13620_vm2, %v9839_v54, %v465_v41  ;;  %v502_v54 = vrot.slane %v500_v38, 4 }
  0xac   : > { %11204 = vmatpush3.bf16.msra.mxu1 %v12885_v49  ;;  %v331_v49 = vld [vmem:[#allocation2 + $0xa8] sm:$0xc] }
  0xad   : > { %11205 = vmatprep.subr.bf16.mxu1 %v12886_v2  ;;  %v9840_v57 = vrot.slane %v331_v49, 10  ;;  %v891_v49 = vld [vmem:[#allocation2 + $0x24] sm:$0xe] }
  0xae   : > { %v9872_v0 = vrot.slane %v891_v49, 9  ;;  %v13768_v49 = vld [vmem:[#allocation2 + $0x64] sm:$0xf] }
  0xaf   : > { %11174 = vmatmul.mubr.bf16.gmra.mrb[4].mxu1 %v13653_v5  ;;  %v473_v8 = vsel %vm13620_vm2, %v9840_v57, %v472_v47  ;;  %v890_v47 = vld [vmem:[#allocation2 + $0x20] sm:$0x1]  ;;  %v9845_v57 = vrot.slane %v346_v39, 10  ;;  %v902_v39 = vld [vmem:[#allocation2 + $0x50] sm:$0x1] }
  0xb0   : > { %11177 = vmatprep.mubr.bf16.mxu1 %v13655_v7  ;;  %11206 = vmatpush3.bf16.msra.mxu1 %v12886_v2  ;;  %v469_v2 = vsel %vm13620_vm2, %v467_v55, %v468_v56  ;;  %v13699_v18 = vcombine.low %v473_v8, %v476_v9  ;;  %v503_v55 = vrot.slane %v345_v34, 6  ;;  %v989_v56 = vrot.slane %v13712_v44, 5  ;;  %v897_v34 = vld [vmem:[#allocation2 + $0x3c] sm:$0xe] }
  0xb1   : > { %11207 = vmatprep.subr.bf16.mxu1 %v12887_v11  ;;  %v13697_v14 = vcombine.low %v466_v1, %v469_v2  ;;  %v13722_v1 = vld [vmem:[#allocation2 + $0x34] sm:$0xf]  ;;  %v501_v8 = vsel %vm13620_vm2, %v9844_v51, %v500_v38  ;;  %v508_v26 = vsel %vm13620_vm2, %v9845_v57, %v507_v42  ;;  %v9874_v43 = vrot.slane %v897_v34, 9  ;;  %v12908_v51 = vld [vmem:[#allocation9] sm:$0xff]  }
  0xb2   : > { %v504_v9 = vsel %vm13620_vm2, %v502_v54, %v503_v55  ;;  %v991_v10 = vrot.slane %v989_v56, 4  ;;  %v1003_v17 = vrot.slane %v13722_v1, 5  ;;  %11681 = vmatprep.subr.bf16.mxu0 %v12908_v51 }
  0xb3   : > { %11682 = vmatpush3.bf16.msra.mxu0 %v12908_v51  ;;  %v12895_v51 = vld [vmem:[#allocation7 + $0x118] sm:$0xff]  }
  0xb4   : > { %11208 = vmatpush3.bf16.msra.mxu1 %v12887_v11  ;;  %v486_v11 = vrot.slane %v338_v62, 6  ;;  %v992_v62 = vrot.slane %v890_v47, 5  ;;  %v13766_v47 = vld [vmem:[#allocation2 + $0x58] sm:$0xf]  ;;  %v1004_v55 = vsel %vm13741_vm5, %v9873_v23, %v1003_v17  ;;  %v12909_v23 = vld [vmem:[#allocation9 + $0x8] sm:$0xff]  }
  0xb5   : > { %11209 = vmatprep.subr.bf16.mxu1 %v12888_v25  ;;  %11683 = vmatprep.subr.bf16.mxu0 %v12909_v23 }
  0xb6   : > { %v488_v22 = vrot.slane %v486_v11, 4  ;;  %v487_v35 = vsel %vm13620_vm2, %v9842_v20, %v486_v11  ;;  %v13737_v20 = vcombine.low %v501_v8, %v504_v9  ;;  %v993_v33 = vsel %vm13741_vm5, %v991_v10, %v992_v62  ;;  %v906_v8 = vld [vmem:[#allocation2 + $0x60] sm:$0xe]  ;;  %v12893_v9 = vld [vmem:[#allocation7 + $0x108] sm:$0xff]  }
  0xb7   : > { %11178 = vmatmul.mubr.bf16.gmra.mrb[8].mxu1 %v13667_v28  ;;  %v1020_v62 = vrot.slane %v902_v39, 5  ;;  %11684 = vmatpush3.bf16.msra.mxu0 %v12909_v23 }
  0xb8   : > { %11181 = vmatprep.mubr.bf16.mxu1 %v13669_v29  ;;  %11210 = vmatpush3.bf16.msra.mxu1 %v12888_v25  ;;  %v493_v25 = vrot.slane %v341_v13, 6  ;;  %v490_v36 = vsel %vm13620_vm2, %v488_v22, %v489_v21  ;;  %v999_v13 = vrot.slane %v893_v63, 5  ;;  %v903_v63 = vld [vmem:[#allocation2 + $0x54] sm:$0xe]  ;;  %v4128_v21 = vld [vmem:[#allocation2 + $0x68] sm:$0x3] }
  0xb9   : > { %11211 = vmatprep.subr.bf16.mxu1 %v12889_v37 }
  0xba   : > { %v495_v41 = vrot.slane %v493_v25, 4  ;;  %v494_v2 = vsel %vm13620_vm2, %v9843_v32, %v493_v25  ;;  %v1006_v25 = vrot.slane %v896_v16, 5  ;;  %v990_v32 = vsel %vm13741_vm5, %v9871_v60, %v989_v56 }
  0xbb   : > { %v9887_v38 = vcombine.low %v990_v32, %v993_v33  ;;  %v1011_v16 = vsel %vm13741_vm5, %v9874_v43, %v1010_v40  ;;  %v9877_v32 = vrot.slane %v906_v8, 9  ;;  %v911_v43 = vld [vmem:[#allocation2 + $0x74] sm:$0x1] }
  0xbc   : > { %11212 = vmatpush3.bf16.msra.mxu1 %v12889_v37  ;;  %v496_v37 = vrot.slane %v342_v24, 6  ;;  %v1005_v24 = vrot.slane %v1003_v17, 4  ;;  %v9876_v17 = vrot.slane %v903_v63, 9  ;;  %v1041_v8 = vrot.slane %v911_v43, 5 }
  0xbd   : > { %11213 = vmatprep.subr.bf16.mxu1 %v12890_v48 }
  0xbe   : > { %v497_v4 = vsel %vm13620_vm2, %v495_v41, %v496_v37  ;;  %v900_v37 = vld [vmem:[#allocation2 + $0x48] sm:$0xe]  ;;  %v1017_v41 = vrot.slane %v13753_v31, 5  ;;  %v1007_v58 = vsel %vm13741_vm5, %v1005_v24, %v1006_v25  ;;  %v12910_v24 = vld [vmem:[#allocation9 + $0x10] sm:$0xff]  }
  0xbf   : > { %11182 = vmatmul.mubr.bf16.gmra.mrb[12].mxu1 %v13681_v52  ;;  %v13735_v19 = vcombine.low %v494_v2, %v497_v4  ;;  %v9875_v57 = vrot.slane %v900_v37, 9  ;;  %v1031_v2 = vrot.slane %v13768_v49, 5  ;;  %v9889_v10 = vcombine.low %v1004_v55, %v1007_v58  ;;  %11685 = vmatprep.subr.bf16.mxu0 %v12910_v24  ;;  %v914_v55 = vld [vmem:[#allocation2 + $0x80] sm:$0x1] }
  0xc0   : > { %11185 = vmatprep.mubr.bf16.mxu1 %v13683_v53  ;;  %11214 = vmatpush3.bf16.msra.mxu1 %v12890_v48  ;;  %v13716_v48 = vcombine.low %v487_v35, %v490_v36  ;;  %v13759_v35 = vcombine.low %v508_v26, %v511_v27  ;;  %v899_v36 = vld [vmem:[#allocation2 + $0x44] sm:$0x1]  ;;  %v1019_v60 = vrot.slane %v1017_v41, 4  ;;  %v1027_v27 = vrot.slane %v905_v6, 5 }
  0xc1   : > { %11215 = vmatprep.subr.bf16.mxu1 %v12891_v61  ;;  %v1013_v56 = vrot.slane %v899_v36, 5  ;;  %v1018_v26 = vsel %vm13741_vm5, %v9875_v57, %v1017_v41  ;;  %v1033_v36 = vrot.slane %v1031_v2, 4  ;;  %v909_v41 = vld [vmem:[#allocation2 + $0x6c] sm:$0xe]  ;;  %11686 = vmatpush3.bf16.msra.mxu0 %v12910_v24  ;;  %v1032_v58 = vsel %vm13741_vm5, %v9877_v32, %v1031_v2  ;;  %v12896_v2 = vld [vmem:[#allocation7 + $0x120] sm:$0xff]  }
  0xc2   : > { %v1021_v33 = vsel %vm13741_vm5, %v1019_v60, %v1020_v62  ;;  %v12911_v60 = vld [vmem:[#allocation9 + $0x18] sm:$0xff]   ;;  %v12912_v62 = vld [vmem:[#allocation9 + $0x20] sm:$0xff]   ;;  %v9878_v6 = vrot.slane %v909_v41, 9  ;;  %v12897_v24 = vld [vmem:[#allocation7 + $0x128] sm:$0xff]  }
  0xc3   : > { %v1014_v25 = vsel %vm13741_vm5, %v1012_v59, %v1013_v56  ;;  %v13793_v56 = vld [vmem:[#allocation2 + $0x88] sm:$0xf]  ;;  %v13799_v59 = vld [vmem:[#allocation2 + $0x94] sm:$0xf]  ;;  %11687 = vmatprep.subr.bf16.mxu0 %v12911_v60  ;;  %v918_v32 = vld [vmem:[#allocation2 + $0x90] sm:$0xe] }
  0xc4   : > { %11216 = vmatpush3.bf16.msra.mxu1 %v12891_v61  ;;  %v13719_v61 = vld [vmem:[#allocation2 + $0x28] sm:$0xf] }
  0xc5   : > { %11249 = vmatprep.subr.bf16.mxu1 %v13695_v12  ;;  %v996_v11 = vrot.slane %v13719_v61, 5  ;;  %11688 = vmatpush3.bf16.msra.mxu0 %v12911_v60 }
  0xc6   : > { %11689 = vmatprep.subr.bf16.mxu0 %v12912_v62 }
  0xc7   : > { %11186 = vmatmul.mubr.bf16.gmra.mrb[16].mxu1 %v13697_v14  ;;  %v998_v22 = vrot.slane %v996_v11, 4  ;;  %v997_v42 = vsel %vm13741_vm5, %v9872_v0, %v996_v11  ;;  %v1024_v0 = vrot.slane %v13766_v47, 5  ;;  %v908_v11 = vld [vmem:[#allocation2 + $0x68] sm:$0x1] }
  0xc8   : > { %11189 = vmatprep.mubr.bf16.mxu1 %v13699_v18  ;;  %v1034_v37 = vrot.slane %v908_v11, 5  ;;  %v1048_v11 = vrot.slane %v914_v55, 5  ;;  %v9881_v55 = vrot.slane %v918_v32, 9  ;;  %v12900_v32 = vld [vmem:[#allocation7 + $0x40] sm:$0xff]  }
  0xc9   : > { %v1000_v54 = vsel %vm13741_vm5, %v998_v22, %v999_v13  ;;  %v13778_v13 = vld [vmem:[#allocation2 + $0x70] sm:$0xf]  ;;  %v13782_v22 = vld [vmem:[#allocation2 + $0x7c] sm:$0xf]  ;;  %v1026_v34 = vrot.slane %v1024_v0, 4  ;;  %v1025_v57 = vsel %vm13741_vm5, %v9876_v17, %v1024_v0  ;;  %v1059_v17 = vrot.slane %v13799_v59, 5  ;;  %11690 = vmatpush3.bf16.msra.mxu0 %v12912_v62 }
  0xca   : > { %v9888_v4 = vcombine.low %v997_v42, %v1000_v54  ;;  %v1038_v39 = vrot.slane %v13778_v13, 5  ;;  %v1045_v40 = vrot.slane %v13782_v22, 5  ;;  %v9890_v42 = vcombine.low %v1011_v16, %v1014_v25  ;;  %v912_v54 = vld [vmem:[#allocation2 + $0x78] sm:$0xe] }
  0xcb   : > { %v1028_v63 = vsel %vm13741_vm5, %v1026_v34, %v1027_v27  ;;  %v1052_v16 = vrot.slane %v13793_v56, 5  ;;  %v917_v27 = vld [vmem:[#allocation2 + $0x8c] sm:$0x1] }
  0xcc   : > { %v1047_v0 = vrot.slane %v1045_v40, 4  ;;  %v9892_v23 = vcombine.low %v1025_v57, %v1028_v63  ;;  %v12913_v34 = vld [vmem:[#allocation9 + $0x28] sm:$0xff]   ;;  %v12899_v63 = vld [vmem:[#allocation7 + $0x138] sm:$0xff]  }
  0xcd   : > { %11691 = vmatprep.subr.bf16.mxu0 %v12913_v34 }
  0xce   : > { %v1049_v41 = vsel %vm13741_vm5, %v1047_v0, %v1048_v11  ;;  %11692 = vmatpush3.bf16.msra.mxu0 %v12913_v34  ;;  %v12915_v11 = vld [vmem:[#allocation9 + $0x38] sm:$0xff]  }
  0xcf   : > { %11190 = vmatmul.mubr.bf16.gmra.mrb[20].mxu1 %v13714_v45 }
  0xd0   : > { %11193 = vmatprep.mubr.bf16.mxu1 %v13716_v48 }
  0xd7   : > { %11194 = vmatmul.mubr.bf16.gmra.mrb[24].mxu1 %v13735_v19 }
  0xd8   : > { %11197 = vmatprep.mubr.bf16.mxu1 %v13737_v20 }
  0xdf   : > { %11198 = vmatmul.mubr.bf16.gmra.mrb[28].mxu1 %v13759_v35 }
  0xe0   : > { %11217 = vmatprep.mubr.bf16.mxu1 %v9887_v38  ;;  %v12894_v38 = vld [vmem:[#allocation7 + $0x110] sm:$0xff]  }
  0xe7   : > { %11218 = vmatmul.mubr.bf16.vlgmr.msra.gmra.mrb[32].mxu1 %v9888_v4  ;;  %v1035_v4 = vsel %vm13741_vm5, %v1033_v36, %v1034_v37  ;;  %v1039_v36 = vsel %vm13741_vm5, %v9878_v6, %v1038_v39  ;;  %v921_v6 = vld [vmem:[#allocation2 + $0x9c] sm:$0xe] }
  0xe8   : > { %11221 = vmatprep.mubr.bf16.mxu1 %v9889_v10  ;;  %11250 = vmatpush3.bf16.msra.mxu1 %v13695_v12  ;;  %v9891_v12 = vcombine.low %v1018_v26, %v1021_v33  ;;  %v9879_v10 = vrot.slane %v912_v54, 9  ;;  %v9893_v25 = vcombine.low %v1032_v58, %v1035_v4  ;;  %v915_v26 = vld [vmem:[#allocation2 + $0x84] sm:$0xe]  ;;  %v920_v33 = vld [vmem:[#allocation2 + $0x98] sm:$0x1]  ;;  %v1054_v54 = vrot.slane %v1052_v16, 4 }
  0xe9   : > { %11251 = vmatprep.subr.bf16.mxu1 %v12893_v9  ;;  %v9880_v43 = vrot.slane %v915_v26, 9  ;;  %v1062_v57 = vrot.slane %v920_v33, 5  ;;  %v13817_v58 = vld [vmem:[#allocation2 + $0xac] sm:$0xf] }
  0xea   : > { %v1073_v0 = vrot.slane %v13817_v58, 5 }
  0xec   : > { %11252 = vmatpush3.bf16.msra.mxu1 %v12893_v9  ;;  %v1040_v9 = vrot.slane %v1038_v39, 4  ;;  %v1061_v39 = vrot.slane %v1059_v17, 4 }
  0xed   : > { %11253 = vmatprep.subr.bf16.mxu1 %v12894_v38 }
  0xee   : > { %v1042_v37 = vsel %vm13741_vm5, %v1040_v9, %v1041_v8  ;;  %v923_v8 = vld [vmem:[#allocation2 + $0xa4] sm:$0x1]  ;;  %v924_v9 = vld [vmem:[#allocation2 + $0xa8] sm:$0xe]  ;;  %v1063_v26 = vsel %vm13741_vm5, %v1061_v39, %v1062_v57 }
  0xef   : > { %11222 = vmatmul.mubr.bf16.gmra.mrb[36].mxu1 %v9890_v42  ;;  %v1046_v42 = vsel %vm13741_vm5, %v9879_v10, %v1045_v40  ;;  %v9894_v60 = vcombine.low %v1039_v36, %v1042_v37  ;;  %v12914_v40 = vld [vmem:[#allocation9 + $0x30] sm:$0xff]   ;;  %v1069_v34 = vrot.slane %v923_v8, 5  ;;  %v9883_v36 = vrot.slane %v924_v9, 9  ;;  %v932_v9 = vld [vmem:[#allocation2 + $0xc8] sm:$0x1] }
  0xf0   : > { %11225 = vmatprep.mubr.bf16.mxu1 %v9891_v12  ;;  %11254 = vmatpush3.bf16.msra.mxu1 %v12894_v38  ;;  %v13811_v38 = vld [vmem:[#allocation2 + $0xa0] sm:$0xf]  ;;  %v12898_v12 = vld [vmem:[#allocation7 + $0x130] sm:$0xff]   ;;  %v9895_v4 = vcombine.low %v1046_v42, %v1049_v41  ;;  %v1075_v42 = vrot.slane %v1073_v0, 4 }
  0xf1   : > { %11255 = vmatprep.subr.bf16.mxu1 %v12895_v51  ;;  %v1066_v62 = vrot.slane %v13811_v38, 5  ;;  %v926_v10 = vld [vmem:[#allocation2 + $0xb0] sm:$0x1]  ;;  %11693 = vmatprep.subr.bf16.mxu0 %v12914_v40  ;;  %v1074_v57 = vsel %vm13741_vm5, %v9883_v36, %v1073_v0  ;;  %v1090_v0 = vrot.slane %v932_v9, 5  ;;  %v1597_v9 = vld [vmem:[#allocation2 + $0x18] sm:$0xc] }
  0xf2   : > { %11694 = vmatpush3.bf16.msra.mxu0 %v12914_v40  ;;  %v13843_v40 = vld [vmem:[#allocation7 + $0x240] sm:$0xff]  }
  0xf3   : > { %11695 = vmatprep.subr.bf16.mxu0 %v12915_v11  ;;  %v1068_v33 = vrot.slane %v1066_v62, 4 }
  0xf4   : > { %11256 = vmatpush3.bf16.msra.mxu1 %v12895_v51  ;;  %v1055_v51 = vrot.slane %v917_v27, 5  ;;  %v9882_v27 = vrot.slane %v921_v6, 9 }
  0xf5   : > { %11257 = vmatprep.subr.bf16.mxu1 %v12896_v2  ;;  %v1070_v39 = vsel %vm13741_vm5, %v1068_v33, %v1069_v34  ;;  %v935_v34 = vld [vmem:[#allocation2 + $0xd4] sm:$0x1] }
  0xf6   : > { %11696 = vmatpush3.bf16.msra.mxu0 %v12915_v11 }
  0xf7   : > { %11226 = vmatmul.mubr.bf16.gmra.mrb[40].mxu1 %v9892_v23  ;;  %v1056_v23 = vsel %vm13741_vm5, %v1054_v54, %v1055_v51  ;;  %v927_v51 = vld [vmem:[#allocation2 + $0xb4] sm:$0xe]  ;;  %v930_v54 = vld [vmem:[#allocation2 + $0xc0] sm:$0xe]  ;;  %11729 = vmatprep.subr.bf16.mxu0 %v13843_v40 }
  0xf8   : > { %11229 = vmatprep.mubr.bf16.mxu1 %v9893_v25  ;;  %11258 = vmatpush3.bf16.msra.mxu1 %v12896_v2  ;;  %v1053_v2 = vsel %vm13741_vm5, %v9880_v43, %v1052_v16  ;;  %v13825_v25 = vld [vmem:[#allocation2 + $0xb8] sm:$0xf]  ;;  %v1076_v16 = vrot.slane %v926_v10, 5  ;;  %v9885_v10 = vrot.slane %v930_v54, 9 }
  0xf9   : > { %11259 = vmatprep.subr.bf16.mxu1 %v12897_v24  ;;  %v9896_v37 = vcombine.low %v1053_v2, %v1056_v23  ;;  %v1080_v41 = vrot.slane %v13825_v25, 5 }
  0xfb   : > { %v1082_v6 = vrot.slane %v1080_v41, 4 }
  0xfc   : > { %11260 = vmatpush3.bf16.msra.mxu1 %v12897_v24  ;;  %v1060_v24 = vsel %vm13741_vm5, %v9881_v55, %v1059_v17  ;;  %v929_v17 = vld [vmem:[#allocation2 + $0xbc] sm:$0x1]  ;;  %v1067_v55 = vsel %vm13741_vm5, %v9882_v27, %v1066_v62  ;;  %v13845_v62 = vld [vmem:[#allocation2 + $0xd0] sm:$0xf] }
  0xfd   : > { %11261 = vmatprep.subr.bf16.mxu1 %v12898_v12  ;;  %v9897_v43 = vcombine.low %v1060_v24, %v1063_v26  ;;  %v1083_v8 = vrot.slane %v929_v17, 5  ;;  %v9898_v11 = vcombine.low %v1067_v55, %v1070_v39  ;;  %v933_v24 = vld [vmem:[#allocation2 + $0xcc] sm:$0xe]  ;;  %v1094_v26 = vrot.slane %v13845_v62, 5 }
  0xfe   : > { %v12901_v39 = vld [vmem:[#allocation7 + $0x48] sm:$0xff]  }
  0xff   : > { %11230 = vmatmul.mubr.bf16.gmra.mrb[44].mxu1 %v9894_v60  ;;  %v1077_v60 = vsel %vm13741_vm5, %v1075_v42, %v1076_v16  ;;  %v1084_v33 = vsel %vm13741_vm5, %v1082_v6, %v1083_v8  ;;  %v12907_v6 = vld [vmem:[#allocation7 + $0x78] sm:$0xff]   ;;  %v12917_v8 = vld [vmem:[#allocation7 + $0x80] sm:$0xff]  }
 0x100   : > { %11233 = vmatprep.mubr.bf16.mxu1 %v9895_v4  ;;  %11262 = vmatpush3.bf16.msra.mxu1 %v12898_v12  ;;  %v13832_v12 = vld [vmem:[#allocation2 + $0xc4] sm:$0xf]  ;;  %v9884_v4 = vrot.slane %v927_v51, 9  ;;  %v9899_v2 = vcombine.low %v1074_v57, %v1077_v60  ;;  %v1097_v51 = vrot.slane %v935_v34, 5  ;;  %v12902_v57 = vld [vmem:[#allocation7 + $0x50] sm:$0xff]   ;;  %v12903_v60 = vld [vmem:[#allocation7 + $0x58] sm:$0xff]  }
 0x101   : > { %11263 = vmatprep.subr.bf16.mxu1 %v12899_v63  ;;  %v1677_v34 = vrot.slane %v13722_v1, 6 }
 0x102   : > { %v1081_v27 = vsel %vm13741_vm5, %v9884_v4, %v1080_v41  ;;  %v12905_v4 = vld [vmem:[#allocation7 + $0x68] sm:$0xff]  }
 0x103   : > { %v9900_v42 = vcombine.low %v1081_v27, %v1084_v33  ;;  %v1600_v27 = vld [vmem:[#allocation2 + $0x2c] sm:$0x3]  ;;  %v1601_v33 = vld [vmem:[#allocation2 + $0x30] sm:$0xc] }
 0x104   : > { %11264 = vmatpush3.bf16.msra.mxu1 %v12899_v63  ;;  %v1087_v63 = vrot.slane %v13832_v12, 5 }
 0x105   : > { %11297 = vmatprep.subr.bf16.mxu1 %v12900_v32 }
 0x106   : > { %v1089_v23 = vrot.slane %v1087_v63, 4  ;;  %v1088_v36 = vsel %vm13741_vm5, %v9885_v10, %v1087_v63  ;;  %v12904_v63 = vld [vmem:[#allocation7 + $0x60] sm:$0xff]   ;;  %v1663_v10 = vrot.slane %v13712_v44, 6 }
 0x107   : > { %11234 = vmatmul.mubr.bf16.gmra.mrb[48].mxu1 %v9896_v37  ;;  %v9886_v37 = vrot.slane %v933_v24, 9 }
 0x108   : > { %11237 = vmatprep.mubr.bf16.mxu1 %v9897_v43  ;;  %v1091_v16 = vsel %vm13741_vm5, %v1089_v23, %v1090_v0  ;;  %v1096_v43 = vrot.slane %v1094_v26, 4  ;;  %v1670_v23 = vrot.slane %v13719_v61, 6  ;;  %v1599_v0 = vld [vmem:[#allocation2 + $0x24] sm:$0xc]  ;;  %v1665_v24 = vrot.slane %v1663_v10, 4 }
 0x109   : > { %v9901_v17 = vcombine.low %v1088_v36, %v1091_v16  ;;  %v1095_v41 = vsel %vm13741_vm5, %v9886_v37, %v1094_v26  ;;  %v9920_v16 = vrot.slane %v1599_v0, 10  ;;  %v1673_v61 = vrot.slane %v1600_v27, 6  ;;  %v12918_v27 = vld [vmem:[#allocation7 + $0x88] sm:$0xff]  }
 0x10a   : > { %v1098_v54 = vsel %vm13741_vm5, %v1096_v43, %v1097_v51  ;;  %v1672_v37 = vrot.slane %v1670_v23, 4  ;;  %v9921_v43 = vrot.slane %v1601_v33, 10  ;;  %v1679_v51 = vrot.slane %v1677_v34, 4 }
 0x10b   : > { %v9902_v55 = vcombine.low %v1095_v41, %v1098_v54  ;;  %v1684_v41 = vrot.slane %v13751_v30, 6  ;;  %v1698_v0 = vrot.slane %v13766_v47, 6 }
 0x10c   : > { %v1678_v30 = vsel %vm13620_vm2, %v9921_v43, %v1677_v34  ;;  %v1610_v34 = vld [vmem:[#allocation2 + $0x68] sm:$0x3] }
 0x10f   : > { %11238 = vmatmul.mubr.bf16.gmra.mrb[52].mxu1 %v9898_v11  ;;  %v1598_v11 = vld [vmem:[#allocation2 + $0x20] sm:$0x3] }
 0x110   : > { %11241 = vmatprep.mubr.bf16.mxu1 %v9899_v2  ;;  %v9919_v2 = vrot.slane %v1597_v9, 10  ;;  %v1666_v26 = vrot.slane %v1598_v11, 6  ;;  %v1686_v9 = vrot.slane %v1684_v41, 4 }
 0x112   : > { %v1664_v36 = vsel %vm13620_vm2, %v9919_v2, %v1663_v10  ;;  %v1667_v44 = vsel %vm13620_vm2, %v1665_v24, %v1666_v26  ;;  %v1607_v26 = vld [vmem:[#allocation2 + $0x54] sm:$0xc] }
 0x113   : > { %v9935_v54 = vcombine.low %v1664_v36, %v1667_v44  ;;  %v1608_v36 = vld [vmem:[#allocation2 + $0x5c] sm:$0x3]  ;;  %v1609_v44 = vld [vmem:[#allocation2 + $0x60] sm:$0xc] }
 0x114   : > { %v1701_v43 = vrot.slane %v1608_v36, 6 }
 0x117   : > { %11242 = vmatmul.mubr.bf16.gmra.mrb[56].mxu1 %v9900_v42  ;;  %v1602_v42 = vld [vmem:[#allocation2 + $0x38] sm:$0x3] }
 0x118   : > { %11245 = vmatprep.mubr.bf16.mxu1 %v9901_v17  ;;  %v1603_v17 = vld [vmem:[#allocation2 + $0x3c] sm:$0xc]  ;;  %v1680_v1 = vrot.slane %v1602_v42, 6  ;;  %v1700_v42 = vrot.slane %v1698_v0, 4 }
 0x11f   : > { %11246 = vmatmul.mubr.bf16.gmra.mrb[60].mxu1 %v9902_v55  ;;  %v1604_v55 = vld [vmem:[#allocation2 + $0x44] sm:$0x3] }
 0x120   : > { %11265 = vmatprep.mubr.bf16.mxu1 %v13628_v15 }
 0x127   : > { %11266 = vmatmul.mubr.bf16.vlgmr.msra.gmra.mrb[32].mxu1 %v13639_v46 }
 0x128   : > { %11269 = vmatprep.mubr.bf16.mxu1 %v13641_v50  ;;  %11298 = vmatpush3.bf16.msra.mxu1 %v12900_v32  ;;  %v12906_v32 = vld [vmem:[#allocation7 + $0x70] sm:$0xff]  }
 0x129   : > { %11299 = vmatprep.subr.bf16.mxu1 %v12901_v39 }
 0x12c   : > { %11300 = vmatpush3.bf16.msra.mxu1 %v12901_v39  ;;  %v1691_v39 = vrot.slane %v13753_v31, 6  ;;  %v1687_v31 = vrot.slane %v1604_v55, 6  ;;  %v1708_v55 = vrot.slane %v1610_v34, 6  ;;  %v1617_v34 = vld [vmem:[#allocation2 + $0x90] sm:$0xc] }
 0x12d   : > { %11301 = vmatprep.subr.bf16.mxu1 %v12902_v57 }
 0x12e   : > { %v1693_v11 = vrot.slane %v1691_v39, 4 }
 0x12f   : > { %11270 = vmatmul.mubr.bf16.gmra.mrb[36].mxu1 %v13653_v5 }
 0x130   : > { %11273 = vmatprep.mubr.bf16.mxu1 %v13655_v7  ;;  %11302 = vmatpush3.bf16.msra.mxu1 %v12902_v57  ;;  %v1605_v57 = vld [vmem:[#allocation2 + $0x48] sm:$0xc] }
 0x131   : > { %11303 = vmatprep.subr.bf16.mxu1 %v12903_v60  ;;  %v9923_v10 = vrot.slane %v1605_v57, 10  ;;  %v1719_v57 = vrot.slane %v13782_v22, 6 }
 0x133   : > { %v1692_v47 = vsel %vm13620_vm2, %v9923_v10, %v1691_v39  ;;  %v1612_v39 = vld [vmem:[#allocation2 + $0x74] sm:$0x3]  ;;  %v12923_v10 = vld [vmem:[#allocation7 + $0xa0] sm:$0xff]  }
 0x134   : > { %11304 = vmatpush3.bf16.msra.mxu1 %v12903_v60  ;;  %v1606_v60 = vld [vmem:[#allocation2 + $0x50] sm:$0x3] }
 0x135   : > { %11305 = vmatprep.subr.bf16.mxu1 %v12904_v63  ;;  %v1694_v2 = vrot.slane %v1606_v60, 6  ;;  %v12921_v60 = vld [vmem:[#allocation7 + $0x98] sm:$0xff]  }
 0x137   : > { %11274 = vmatmul.mubr.bf16.gmra.mrb[40].mxu1 %v13667_v28 }
 0x138   : > { %11277 = vmatprep.mubr.bf16.mxu1 %v13669_v29  ;;  %11306 = vmatpush3.bf16.msra.mxu1 %v12904_v63  ;;  %v1671_v63 = vsel %vm13620_vm2, %v9920_v16, %v1670_v23  ;;  %v1705_v23 = vrot.slane %v13768_v49, 6  ;;  %v1695_v49 = vsel %vm13620_vm2, %v1693_v11, %v1694_v2  ;;  %v1715_v11 = vrot.slane %v1612_v39, 6 }
 0x139   : > { %11307 = vmatprep.subr.bf16.mxu1 %v12905_v4 }
 0x13c   : > { %11308 = vmatpush3.bf16.msra.mxu1 %v12905_v4  ;;  %v1674_v4 = vsel %vm13620_vm2, %v1672_v37, %v1673_v61  ;;  %v1688_v37 = vsel %vm13620_vm2, %v1686_v9, %v1687_v31  ;;  %v9924_v61 = vrot.slane %v1607_v26, 10 }
 0x13d   : > { %11309 = vmatprep.subr.bf16.mxu1 %v12906_v32  ;;  %v9936_v24 = vcombine.low %v1671_v63, %v1674_v4  ;;  %v1611_v63 = vld [vmem:[#allocation2 + $0x6c] sm:$0xc]  ;;  %v1613_v4 = vld [vmem:[#allocation2 + $0x78] sm:$0xc] }
 0x13e   : > { %v9926_v9 = vrot.slane %v1611_v63, 10  ;;  %v9927_v2 = vrot.slane %v1613_v4, 10 }
 0x13f   : > { %11278 = vmatmul.mubr.bf16.gmra.mrb[44].mxu1 %v13681_v52 }
 0x140   : > { %11281 = vmatprep.mubr.bf16.mxu1 %v13683_v53  ;;  %11310 = vmatpush3.bf16.msra.mxu1 %v12906_v32  ;;  %v9922_v32 = vrot.slane %v1603_v17, 10  ;;  %v9925_v17 = vrot.slane %v1609_v44, 10  ;;  %v1615_v44 = vld [vmem:[#allocation2 + $0x84] sm:$0xc] }
 0x141   : > { %11311 = vmatprep.subr.bf16.mxu1 %v12907_v6 }
 0x142   : > { %v1685_v16 = vsel %vm13620_vm2, %v9922_v32, %v1684_v41  ;;  %v1712_v41 = vrot.slane %v13778_v13, 6  ;;  %v1699_v32 = vsel %vm13620_vm2, %v9924_v61, %v1698_v0  ;;  %v1706_v13 = vsel %vm13620_vm2, %v9925_v17, %v1705_v23 }
 0x143   : > { %v1726_v0 = vrot.slane %v13793_v56, 6 }
 0x144   : > { %11312 = vmatpush3.bf16.msra.mxu1 %v12907_v6  ;;  %v1681_v6 = vsel %vm13620_vm2, %v1679_v51, %v1680_v1  ;;  %v12920_v51 = vld [vmem:[#allocation7 + $0x90] sm:$0xff]   ;;  %v9938_v1 = vcombine.low %v1685_v16, %v1688_v37  ;;  %v1714_v31 = vrot.slane %v1712_v41, 4  ;;  %v1733_v16 = vrot.slane %v13799_v59, 6  ;;  %v13919_v37 = vld [vmem:[%s15171_s5] ss:$0 sm:$0xff] }
 0x145   : > { %11345 = vmatprep.subr.bf16.mxu1 %v12917_v8  ;;  %v9937_v33 = vcombine.low %v1678_v30, %v1681_v6  ;;  %v1702_v30 = vsel %vm13620_vm2, %v1700_v42, %v1701_v43  ;;  %v1614_v6 = vld [vmem:[#allocation2 + $0x80] sm:$0x3]  ;;  %v1713_v56 = vsel %vm13620_vm2, %v9926_v9, %v1712_v41  ;;  %v9928_v59 = vrot.slane %v1615_v44, 10  ;;  %v1618_v42 = vld [vmem:[#allocation2 + $0x98] sm:$0x3]  ;;  %v12926_v43 = vld [vmem:[#allocation7 + $0xb0] sm:$0xff]  }
 0x146   : > { %v9940_v26 = vcombine.low %v1699_v32, %v1702_v30  ;;  %v1716_v61 = vsel %vm13620_vm2, %v1714_v31, %v1715_v11  ;;  %v1728_v17 = vrot.slane %v1726_v0, 4  ;;  %v1740_v41 = vrot.slane %v13811_v38, 6  ;;  %v1619_v30 = vld [vmem:[#allocation2 + $0x9c] sm:$0xc] }
 0x147   : > { %11282 = vmatmul.mubr.bf16.gmra.mrb[48].mxu1 %v13697_v14  ;;  %v1735_v63 = vrot.slane %v1733_v16, 4  ;;  %v1736_v32 = vrot.slane %v1618_v42, 6  ;;  %v12927_v9 = vld [vmem:[#allocation7 + $0xb8] sm:$0xff]  }
 0x148   : > { %11285 = vmatprep.mubr.bf16.mxu1 %v13699_v18  ;;  %v1742_v44 = vrot.slane %v1740_v41, 4 }
 0x14f   : > { %11286 = vmatmul.mubr.bf16.gmra.mrb[52].mxu1 %v13714_v45 }
 0x150   : > { %11289 = vmatprep.mubr.bf16.mxu1 %v13716_v48 }
 0x157   : > { %11290 = vmatmul.mubr.bf16.gmra.mrb[56].mxu1 %v13735_v19 }
 0x158   : > { %11293 = vmatprep.mubr.bf16.mxu1 %v13737_v20 }
 0x15f   : > { %11294 = vmatmul.mubr.bf16.gmra.mrb[60].mxu1 %v13759_v35 }
 0x160   : > { %11313 = vmatprep.mubr.bf16.mxu1 %v9935_v54  ;;  %v1707_v54 = vrot.slane %v1705_v23, 4  ;;  %v1616_v23 = vld [vmem:[#allocation2 + $0x8c] sm:$0x3] }
 0x162   : > { %v1709_v22 = vsel %vm13620_vm2, %v1707_v54, %v1708_v55  ;;  %v1729_v54 = vrot.slane %v1616_v23, 6  ;;  %v9929_v55 = vrot.slane %v1617_v34, 10  ;;  %v1737_v34 = vsel %vm13620_vm2, %v1735_v63, %v1736_v32  ;;  %v1624_v32 = vld [vmem:[#allocation2 + $0xbc] sm:$0x3] }
 0x163   : > { %v9941_v36 = vcombine.low %v1706_v13, %v1709_v22  ;;  %v1620_v22 = vld [vmem:[#allocation2 + $0xa4] sm:$0x3]  ;;  %v1757_v38 = vrot.slane %v1624_v32, 6 }
 0x164   : > { %v1743_v42 = vrot.slane %v1620_v22, 6 }
 0x167   : > { %11314 = vmatmul.mubr.bf16.vlgmr.msra.gmra.mrb[32].mxu1 %v9936_v24  ;;  %v1721_v24 = vrot.slane %v1719_v57, 4 }
 0x168   : > { %11317 = vmatprep.mubr.bf16.mxu1 %v9937_v33  ;;  %11346 = vmatpush3.bf16.msra.mxu1 %v12917_v8  ;;  %v9939_v8 = vcombine.low %v1692_v47, %v1695_v49  ;;  %v12924_v33 = vld [vmem:[#allocation7 + $0xa8] sm:$0xff]   ;;  %v1720_v47 = vsel %vm13620_vm2, %v9927_v2, %v1719_v57 }
 0x169   : > { %11347 = vmatprep.subr.bf16.mxu1 %v12918_v27 }
 0x16c   : > { %11348 = vmatpush3.bf16.msra.mxu1 %v12918_v27  ;;  %v1722_v27 = vrot.slane %v1614_v6, 6 }
 0x16d   : > { %11349 = vmatprep.subr.bf16.mxu1 %v12920_v51 }
 0x16e   : > { %v1723_v49 = vsel %vm13620_vm2, %v1721_v24, %v1722_v27  ;;  %v1727_v24 = vsel %vm13620_vm2, %v9928_v59, %v1726_v0  ;;  %v1622_v0 = vld [vmem:[#allocation2 + $0xb0] sm:$0x3]  ;;  %v12919_v59 = vld [vmem:[#allocation7 + $0x248] sm:$0xff]  }
 0x16f   : > { %11318 = vmatmul.mubr.bf16.gmra.mrb[36].mxu1 %v9938_v1  ;;  %v9943_v4 = vcombine.low %v1720_v47, %v1723_v49  ;;  %v1750_v63 = vrot.slane %v1622_v0, 6 }
 0x170   : > { %11321 = vmatprep.mubr.bf16.mxu1 %v9939_v8  ;;  %11350 = vmatpush3.bf16.msra.mxu1 %v12920_v51  ;;  %v9942_v8 = vcombine.low %v1713_v56, %v1716_v61  ;;  %v9930_v56 = vrot.slane %v1619_v30, 10  ;;  %v13945_v61 = vld [vmem:[#allocation7 + $0xc0] sm:$0xff]  }
 0x171   : > { %11351 = vmatprep.subr.bf16.mxu1 %v12921_v60 }
 0x174   : > { %11352 = vmatpush3.bf16.msra.mxu1 %v12921_v60 }
 0x175   : > { %11353 = vmatprep.subr.bf16.mxu1 %v12923_v10 }
 0x177   : > { %11322 = vmatmul.mubr.bf16.gmra.mrb[40].mxu1 %v9940_v26  ;;  %v1621_v26 = vld [vmem:[#allocation2 + $0xa8] sm:$0xc] }
 0x178   : > { %11325 = vmatprep.mubr.bf16.mxu1 %v9941_v36  ;;  %11354 = vmatpush3.bf16.msra.mxu1 %v12923_v10  ;;  %v1747_v10 = vrot.slane %v13817_v58, 6  ;;  %v1734_v58 = vsel %vm13620_vm2, %v9929_v55, %v1733_v16 }
 0x179   : > { %11355 = vmatprep.subr.bf16.mxu1 %v12924_v33 }
 0x17a   : > { %v11171_v51 = vpop.f32.mrb[0].mxu1  ;;  %v1749_v16 = vrot.slane %v1747_v10, 4 }
 0x17b   : > { %v688_v1 = vadd.f32 %v11171_v51, %v13919_v37  ;;  %v679_v60 = vpop.f32.mrb[1].mxu1  ;;  %v9931_v51 = vrot.slane %v1621_v26, 10 }
 0x17c   : > { %v680_v57 = vadd.f32 %v13919_v37, %v679_v60  ;;  %v11172_v39 = vpop.f32.mrb[2].mxu1  ;;  %11356 = vmatpush3.bf16.msra.mxu1 %v12924_v33  ;;  %v1730_v33 = vsel %vm13620_vm2, %v1728_v17, %v1729_v54  ;;  %v1754_v17 = vrot.slane %v13825_v25, 6  ;;  %v1761_v25 = vrot.slane %v13832_v12, 6  ;;  %v12922_v12 = vld [vmem:[#allocation7 + $0x250] sm:$0xff]  }
 0x17d   : > { %v691_v6 = vadd.f32 %v11172_v39, %v13919_v37  ;;  %v682_v13 = vpop.f32.mrb[3].mxu1  ;;  %11357 = vmatprep.subr.bf16.mxu1 %v12926_v43  ;;  %v808_v11 = vmax.f32 %v688_v1, 0.0  ;;  %v9944_v1 = vcombine.low %v1727_v24, %v1730_v33  ;;  %v1626_v33 = vld [vmem:[#allocation2 + $0xc8] sm:$0x3] }
 0x17e   : > { %v683_v31 = vadd.f32 %v13919_v37, %v682_v13  ;;  %v806_v27 = vmax.f32 %v680_v57, 0.0  ;;  %v1623_v57 = vld [vmem:[#allocation2 + $0xb4] sm:$0xc]  ;;  %v1756_v24 = vrot.slane %v1754_v17, 4 }
 0x17f   : > { %v809_v2 = vmax.f32 %v691_v6, 0.0  ;;  %11326 = vmatmul.mubr.bf16.gmra.mrb[44].mxu1 %v9942_v8  ;;  %v9945_v8 = vcombine.low %v1734_v58, %v1737_v34  ;;  %v1625_v6 = vld [vmem:[#allocation2 + $0xc0] sm:$0xc]  ;;  %v1768_v34 = vrot.slane %v13845_v62, 6 }
 0x180   : > { %v807_v36 = vmax.f32 %v683_v31, 0.0  ;;  %11329 = vmatprep.mubr.bf16.mxu1 %v9943_v4  ;;  %11358 = vmatpush3.bf16.msra.mxu1 %v12926_v43  ;;  %v1744_v31 = vsel %vm13620_vm2, %v1742_v44, %v1743_v42  ;;  %v9933_v58 = vrot.slane %v1625_v6, 10  ;;  %v1763_v44 = vrot.slane %v1761_v25, 4 }
 0x181   : > { %v839_v23 = vpack.c.bf16 %v809_v2, %v808_v11  ;;  %11359 = vmatprep.subr.bf16.mxu1 %v12927_v9  ;;  %v1770_v32 = vrot.slane %v1768_v34, 4 }
 0x182   : > { %v11175_v47 = vpop.f32.mrb[4].mxu1  ;;  %v838_v49 = vpack.c.bf16 %v807_v36, %v806_v27  ;;  %v1751_v27 = vsel %vm13620_vm2, %v1749_v16, %v1750_v63  ;;  %v9932_v36 = vrot.slane %v1623_v57, 10  ;;  %v1628_v16 = vld [vmem:[#allocation2 + $0xd4] sm:$0x3]  ;;  %v2095_v63 = vld [vmem:[#allocation2 + $0x18] sm:$0x8] }
 0x183   : > { %v704_v43 = vadd.f32 %v11175_v47, %v13919_v37  ;;  %v695_v54 = vpop.f32.mrb[5].mxu1 }
 0x184   : > { %v696_v55 = vadd.f32 %v13919_v37, %v695_v54  ;;  %v11176_v60 = vpop.f32.mrb[6].mxu1  ;;  %11697 = vmatprep.mubr.bf16.mxu0 %v838_v49  ;;  %11360 = vmatpush3.bf16.msra.mxu1 %v12927_v9  ;;  %v1741_v9 = vsel %vm13620_vm2, %v9930_v56, %v1740_v41  ;;  %v1627_v54 = vld [vmem:[#allocation2 + $0xcc] sm:$0xc] }
 0x185   : > { %v707_v39 = vadd.f32 %v11176_v60, %v13919_v37  ;;  %v698_v4 = vpop.f32.mrb[7].mxu1  ;;  %11698 = vmatmul.mubr.bf16.vlgmr.msra.gmra.mrb[0].mxu0 %v839_v23  ;;  %11393 = vmatprep.subr.bf16.mxu1 %v13945_v61  ;;  %v812_v13 = vmax.f32 %v704_v43, 0.0  ;;  %v9946_v47 = vcombine.low %v1741_v9, %v1744_v31  ;;  %v1764_v43 = vrot.slane %v1626_v33, 6 }
 0x186   : > { %v699_v30 = vadd.f32 %v13919_v37, %v698_v4  ;;  %11730 = vmatpush3.bf16.msra.mxu0 %v13843_v40  ;;  %v810_v11 = vmax.f32 %v696_v55, 0.0  ;;  %v1748_v40 = vsel %vm13620_vm2, %v9931_v51, %v1747_v10  ;;  %v12925_v10 = vld [vmem:[#allocation7 + $0x258] sm:$0xff]   ;;  %v1755_v60 = vsel %vm13620_vm2, %v9932_v36, %v1754_v17 }
 0x187   : > { %v813_v22 = vmax.f32 %v707_v39, 0.0  ;;  %11330 = vmatmul.mubr.bf16.gmra.mrb[48].mxu1 %v9944_v1  ;;  %11731 = vmatprep.subr.bf16.mxu0 %v12919_v59  ;;  %v9947_v51 = vcombine.low %v1748_v40, %v1751_v27  ;;  %v1762_v4 = vsel %vm13620_vm2, %v9933_v58, %v1761_v25  ;;  %v1765_v17 = vsel %vm13620_vm2, %v1763_v44, %v1764_v43 }
 0x188   : > { %v811_v2 = vmax.f32 %v699_v30, 0.0  ;;  %11333 = vmatprep.mubr.bf16.mxu1 %v9945_v8  ;;  %v1758_v8 = vsel %vm13620_vm2, %v1756_v24, %v1757_v38  ;;  %v12928_v30 = vld [vmem:[#allocation7 + $0x260] sm:$0xff]   ;;  %v9959_v27 = vrot.slane %v2095_v63, 11  ;;  %v9949_v44 = vcombine.low %v1762_v4, %v1765_v17 }
 0x189   : > { %v841_v26 = vpack.c.bf16 %v813_v22, %v812_v13  ;;  %v13148_v22 = vld [vmem:[#allocation2 + $0x1c] sm:$0xf]  ;;  %v9948_v33 = vcombine.low %v1755_v60, %v1758_v8  ;;  %v12930_v60 = vld [vmem:[#allocation7 + $0x270] sm:$0xff]  }
 0x18a   : > { %v840_v23 = vpack.c.bf16 %v811_v2, %v810_v11  ;;  %v11179_v41 = vpop.f32.mrb[8].mxu1  ;;  %11732 = vmatpush3.bf16.msra.mxu0 %v12919_v59  ;;  %v2164_v9 = vrot.slane %v13148_v22, 7  ;;  %v1771_v11 = vrot.slane %v1628_v16, 6  ;;  %v13980_v2 = vld [vmem:[#allocation2 + $0x28] sm:$0xf] }
 0x18b   : > { %v720_v56 = vadd.f32 %v11179_v41, %v13919_v37  ;;  %v711_v0 = vpop.f32.mrb[9].mxu1  ;;  %11733 = vmatprep.subr.bf16.mxu0 %v12922_v12  ;;  %v2171_v40 = vrot.slane %v13980_v2, 7  ;;  %v2100_v22 = vld [vmem:[#allocation2 + $0x38] sm:$0x7] }
 0x18c   : > { %v712_v49 = vadd.f32 %v13919_v37, %v711_v0  ;;  %v11180_v42 = vpop.f32.mrb[10].mxu1  ;;  %11701 = vmatprep.mubr.bf16.mxu0 %v840_v23  ;;  %v12929_v23 = vld [vmem:[#allocation7 + $0x268] sm:$0xff]   ;;  %v13985_v0 = vld [vmem:[#allocation2 + $0x24] sm:$0x8]  ;;  %v2165_v62 = vsel %vm13990_vm8, %v9959_v27, %v2164_v9 }
 0x18d   : > { %v723_v1 = vadd.f32 %v11180_v42, %v13919_v37  ;;  %v714_v59 = vpop.f32.mrb[11].mxu1  ;;  %11702 = vmatmul.mubr.bf16.gmra.mrb[4].mxu0 %v841_v26  ;;  %v816_v57 = vmax.f32 %v720_v56, 0.0  ;;  %v2096_v26 = vld [vmem:[#allocation2 + $0x20] sm:$0x7]  ;;  %v2166_v56 = vrot.slane %v2164_v9, 4  ;;  %v12931_v9 = vld [vmem:[#allocation7 + $0x278] sm:$0xff]  }
 0x18e   : > { %v715_v55 = vadd.f32 %v13919_v37, %v714_v59  ;;  %11734 = vmatpush3.bf16.msra.mxu0 %v12922_v12  ;;  %v814_v6 = vmax.f32 %v712_v49, 0.0  ;;  %v9934_v12 = vrot.slane %v1627_v54, 10  ;;  %v2167_v42 = vrot.slane %v2096_v26, 7  ;;  %v2099_v54 = vld [vmem:[#allocation2 + $0x30] sm:$0x8] }
 0x18f   : > { %v817_v39 = vmax.f32 %v723_v1, 0.0  ;;  %11334 = vmatmul.mubr.bf16.gmra.mrb[52].mxu1 %v9946_v47  ;;  %11735 = vmatprep.subr.bf16.mxu0 %v12925_v10  ;;  %v13198_v49 = vld [vmem:[#allocation2 + $0xa0] sm:$0xf] }
 0x190   : > { %v815_v13 = vmax.f32 %v715_v55, 0.0  ;;  %11337 = vmatprep.mubr.bf16.mxu1 %v9947_v51  ;;  %v2098_v51 = vld [vmem:[#allocation2 + $0x2c] sm:$0x7]  ;;  %v1769_v16 = vsel %vm13620_vm2, %v9934_v12, %v1768_v34  ;;  %v1772_v55 = vsel %vm13620_vm2, %v1770_v32, %v1771_v11  ;;  %v2168_v34 = vsel %vm13990_vm8, %v2166_v56, %v2167_v42  ;;  %v14008_v12 = vld [vmem:[#allocation2 + $0x40] sm:$0xf] }
 0x191   : > { %v843_v31 = vpack.c.bf16 %v817_v39, %v816_v57  ;;  %v2173_v57 = vrot.slane %v2171_v40, 4  ;;  %v13150_v39 = vld [vmem:[#allocation2 + $0x34] sm:$0xf]  ;;  %v2174_v17 = vrot.slane %v2098_v51, 7  ;;  %v2185_v11 = vrot.slane %v14008_v12, 7 }
 0x192   : > { %v842_v25 = vpack.c.bf16 %v815_v13, %v814_v6  ;;  %v11183_v24 = vpop.f32.mrb[12].mxu1  ;;  %11736 = vmatpush3.bf16.msra.mxu0 %v12925_v10  ;;  %v2178_v4 = vrot.slane %v13150_v39, 7  ;;  %v9960_v6 = vrot.slane %v13985_v0, 11  ;;  %v9950_v26 = vcombine.low %v1769_v16, %v1772_v55  ;;  %v2102_v56 = vld [vmem:[#allocation2 + $0x44] sm:$0x7]  ;;  %v12940_v12 = vld [vmem:[#allocation7 + $0xd0] sm:$0xff]  }
 0x193   : > { %v736_v36 = vadd.f32 %v11183_v24, %v13919_v37  ;;  %v727_v38 = vpop.f32.mrb[13].mxu1  ;;  %11737 = vmatprep.subr.bf16.mxu0 %v12928_v30  ;;  %v13152_v51 = vld [vmem:[#allocation2 + $0x4c] sm:$0xf]  ;;  %v2175_v55 = vsel %vm13990_vm8, %v2173_v57, %v2174_v17  ;;  %v2187_v2 = vrot.slane %v2185_v11, 4 }
 0x194   : > { %v728_v41 = vadd.f32 %v13919_v37, %v727_v38  ;;  %v11184_v58 = vpop.f32.mrb[14].mxu1  ;;  %11705 = vmatprep.mubr.bf16.mxu0 %v842_v25  ;;  %v9975_v38 = vcombine.low %v2165_v62, %v2168_v34  ;;  %v2172_v16 = vsel %vm13990_vm8, %v9960_v6, %v2171_v40 }
 0x195   : > { %v739_v47 = vadd.f32 %v11184_v58, %v13919_v37  ;;  %v730_v10 = vpop.f32.mrb[15].mxu1  ;;  %11706 = vmatmul.mubr.bf16.gmra.mrb[8].mxu0 %v843_v31  ;;  %v820_v1 = vmax.f32 %v736_v36, 0.0  ;;  %v9961_v31 = vrot.slane %v2099_v54, 11  ;;  %v14015_v54 = vld [vmem:[#allocation7 + $0x340] sm:$0xff]   ;;  %v9976_v6 = vcombine.low %v2172_v16, %v2175_v55 }
 0x196   : > { %v731_v43 = vadd.f32 %v13919_v37, %v730_v10  ;;  %11738 = vmatpush3.bf16.msra.mxu0 %v12928_v30  ;;  %v818_v8 = vmax.f32 %v728_v41, 0.0  ;;  %v2101_v41 = vld [vmem:[#allocation2 + $0x3c] sm:$0x8] }
 0x197   : > { %v821_v59 = vmax.f32 %v739_v47, 0.0  ;;  %11338 = vmatmul.mubr.bf16.gmra.mrb[56].mxu1 %v9948_v33  ;;  %11739 = vmatprep.subr.bf16.mxu0 %v12929_v23  ;;  %v2180_v33 = vrot.slane %v2178_v4, 4  ;;  %v2103_v47 = vld [vmem:[#allocation2 + $0x48] sm:$0x8]  ;;  %v9962_v39 = vrot.slane %v2101_v41, 11 }
 0x198   : > { %v819_v63 = vmax.f32 %v731_v43, 0.0  ;;  %11341 = vmatprep.mubr.bf16.mxu1 %v9949_v44  ;;  %v2181_v44 = vrot.slane %v2100_v22, 7  ;;  %v2192_v43 = vrot.slane %v13152_v51, 7 }
 0x199   : > { %v845_v30 = vpack.c.bf16 %v821_v59, %v820_v1 }
 0x19a   : > { %v844_v32 = vpack.c.bf16 %v819_v63, %v818_v8  ;;  %v11187_v13 = vpop.f32.mrb[16].mxu1  ;;  %11740 = vmatpush3.bf16.msra.mxu0 %v12929_v23  ;;  %v2179_v8 = vsel %vm13990_vm8, %v9961_v31, %v2178_v4  ;;  %v2182_v63 = vsel %vm13990_vm8, %v2180_v33, %v2181_v44  ;;  %v2194_v17 = vrot.slane %v2192_v43, 4  ;;  %v13153_v33 = vld [vmem:[#allocation2 + $0x58] sm:$0xf] }
 0x19b   : > { %v752_v25 = vadd.f32 %v11187_v13, %v13919_v37  ;;  %v743_v24 = vpop.f32.mrb[17].mxu1  ;;  %11741 = vmatprep.subr.bf16.mxu0 %v12930_v60  ;;  %v9963_v13 = vrot.slane %v2103_v47, 11  ;;  %v9977_v31 = vcombine.low %v2179_v8, %v2182_v63  ;;  %v2199_v41 = vrot.slane %v13153_v33, 7  ;;  %v2111_v33 = vld [vmem:[#allocation2 + $0x78] sm:$0x8] }
 0x19c   : > { %v744_v27 = vadd.f32 %v13919_v37, %v743_v24  ;;  %v11188_v36 = vpop.f32.mrb[18].mxu1  ;;  %11709 = vmatprep.mubr.bf16.mxu0 %v844_v32  ;;  %v2188_v32 = vrot.slane %v2102_v56, 7  ;;  %v14032_v24 = vld [vmem:[#allocation2 + $0x54] sm:$0x8] }
 0x19d   : > { %v755_v23 = vadd.f32 %v11188_v36, %v13919_v37  ;;  %v746_v58 = vpop.f32.mrb[19].mxu1  ;;  %11710 = vmatmul.mubr.bf16.gmra.mrb[12].mxu0 %v845_v30  ;;  %v824_v10 = vmax.f32 %v752_v25, 0.0  ;;  %v2104_v30 = vld [vmem:[#allocation2 + $0x50] sm:$0x7]  ;;  %v12936_v36 = vld [vmem:[#allocation7 + $0xc8] sm:$0xff]   ;;  %v9964_v55 = vrot.slane %v14032_v24, 11 }
 0x19e   : > { %v747_v0 = vadd.f32 %v13919_v37, %v746_v58  ;;  %11742 = vmatpush3.bf16.msra.mxu0 %v12930_v60  ;;  %v822_v1 = vmax.f32 %v744_v27, 0.0  ;;  %v2195_v25 = vrot.slane %v2104_v30, 7  ;;  %v2189_v51 = vsel %vm13990_vm8, %v2187_v2, %v2188_v32 }
 0x19f   : > { %v825_v42 = vmax.f32 %v755_v23, 0.0  ;;  %11342 = vmatmul.mubr.bf16.gmra.mrb[60].mxu1 %v9950_v26  ;;  %11743 = vmatprep.subr.bf16.mxu0 %v12931_v9  ;;  %v13154_v23 = vld [vmem:[#allocation2 + $0x64] sm:$0xf] }
 0x1a0   : > { %v823_v59 = vmax.f32 %v747_v0, 0.0  ;;  %11361 = vmatprep.mubr.bf16.mxu1 %v9975_v38  ;;  %v2206_v58 = vrot.slane %v13154_v23, 7  ;;  %v2107_v0 = vld [vmem:[#allocation2 + $0x60] sm:$0x8]  ;;  %v2196_v16 = vsel %vm13990_vm8, %v2194_v17, %v2195_v25  ;;  %v13155_v25 = vld [vmem:[#allocation2 + $0x70] sm:$0xf] }
 0x1a1   : > { %v847_v60 = vpack.c.bf16 %v825_v42, %v824_v10  ;;  %v2186_v42 = vsel %vm13990_vm8, %v9962_v39, %v2185_v11  ;;  %v2201_v11 = vrot.slane %v2199_v41, 4  ;;  %v9965_v30 = vrot.slane %v2107_v0, 11 }
 0x1a2   : > { %v846_v62 = vpack.c.bf16 %v823_v59, %v822_v1  ;;  %v11191_v34 = vpop.f32.mrb[20].mxu1  ;;  %11744 = vmatpush3.bf16.msra.mxu0 %v12931_v9  ;;  %v2106_v9 = vld [vmem:[#allocation2 + $0x5c] sm:$0x7]  ;;  %v2193_v59 = vsel %vm13990_vm8, %v9963_v13, %v2192_v43  ;;  %v2208_v2 = vrot.slane %v2206_v58, 4  ;;  %v2213_v24 = vrot.slane %v13155_v25, 7 }
 0x1a3   : > { %v768_v40 = vadd.f32 %v11191_v34, %v13919_v37  ;;  %v759_v57 = vpop.f32.mrb[21].mxu1  ;;  %11777 = vmatprep.subr.bf16.mxu0 %v14015_v54  ;;  %v2202_v39 = vrot.slane %v2106_v9, 7  ;;  %v9978_v34 = vcombine.low %v2186_v42, %v2189_v51  ;;  %v9979_v13 = vcombine.low %v2193_v59, %v2196_v16  ;;  %v2112_v51 = vld [vmem:[#allocation2 + $0x80] sm:$0x7] }
 0x1a4   : > { %v760_v4 = vadd.f32 %v13919_v37, %v759_v57  ;;  %v11192_v22 = vpop.f32.mrb[22].mxu1  ;;  %11713 = vmatprep.mubr.bf16.mxu0 %v846_v62  ;;  %v2109_v57 = vld [vmem:[#allocation2 + $0x6c] sm:$0x8] }
 0x1a5   : > { %v771_v26 = vadd.f32 %v11192_v22, %v13919_v37  ;;  %v762_v27 = vpop.f32.mrb[23].mxu1  ;;  %11714 = vmatmul.mubr.bf16.gmra.mrb[16].mxu0 %v847_v60  ;;  %v828_v44 = vmax.f32 %v768_v40, 0.0  ;;  %v2108_v60 = vld [vmem:[#allocation2 + $0x68] sm:$0x7]  ;;  %v12941_v22 = vld [vmem:[#allocation7 + $0xd8] sm:$0xff]   ;;  %v9966_v42 = vrot.slane %v2109_v57, 11 }
 0x1a6   : > { %v763_v38 = vadd.f32 %v13919_v37, %v762_v27  ;;  %v826_v47 = vmax.f32 %v760_v4, 0.0  ;;  %v2209_v40 = vrot.slane %v2108_v60, 7  ;;  %v2110_v4 = vld [vmem:[#allocation2 + $0x74] sm:$0x7]  ;;  %v2215_v60 = vrot.slane %v2213_v24, 4 }
 0x1a7   : > { %v829_v56 = vmax.f32 %v771_v26, 0.0  ;;  %11362 = vmatmul.mubr.bf16.vlgmr.msra.gmra.mrb[32].mxu1 %v9976_v6  ;;  %v13156_v26 = vld [vmem:[#allocation2 + $0x7c] sm:$0xf] }
 0x1a8   : > { %v827_v10 = vmax.f32 %v763_v38, 0.0  ;;  %11365 = vmatprep.mubr.bf16.mxu1 %v9977_v31  ;;  %11394 = vmatpush3.bf16.msra.mxu1 %v13945_v61  ;;  %v2220_v27 = vrot.slane %v13156_v26, 7  ;;  %v12932_v26 = vld [vmem:[#allocation2] sm:$0xff]  }
 0x1a9   : > { %v849_v1 = vpack.c.bf16 %v829_v56, %v828_v44  ;;  %11395 = vmatprep.subr.bf16.mxu1 %v12936_v36  ;;  %v2203_v56 = vsel %vm13990_vm8, %v2201_v11, %v2202_v39 }
 0x1aa   : > { %v848_v8 = vpack.c.bf16 %v827_v10, %v826_v47  ;;  %v11195_v63 = vpop.f32.mrb[24].mxu1  ;;  %v2207_v47 = vsel %vm13990_vm8, %v9965_v30, %v2206_v58  ;;  %v2210_v10 = vsel %vm13990_vm8, %v2208_v2, %v2209_v40  ;;  %v2222_v11 = vrot.slane %v2220_v27, 4  ;;  %v12946_v2 = vld [vmem:[#allocation7 + $0xe8] sm:$0xff]  }
 0x1ab   : > { %v784_v62 = vadd.f32 %v11195_v63, %v13919_v37  ;;  %v775_v61 = vpop.f32.mrb[25].mxu1  ;;  %v9981_v30 = vcombine.low %v2207_v47, %v2210_v10  ;;  %v2214_v40 = vsel %vm13990_vm8, %v9966_v42, %v2213_v24  ;;  %v13158_v24 = vld [vmem:[#allocation2 + $0x94] sm:$0xf] }
 0x1ac   : > { %v776_v43 = vadd.f32 %v13919_v37, %v775_v61  ;;  %v11196_v32 = vpop.f32.mrb[26].mxu1  ;;  %11717 = vmatprep.mubr.bf16.mxu0 %v848_v8  ;;  %11396 = vmatpush3.bf16.msra.mxu1 %v12936_v36  ;;  %v2200_v36 = vsel %vm13990_vm8, %v9964_v55, %v2199_v41  ;;  %v2216_v8 = vrot.slane %v2110_v4, 7  ;;  %v9967_v41 = vrot.slane %v2111_v33, 11  ;;  %v2113_v4 = vld [vmem:[#allocation2 + $0x84] sm:$0x8] }
 0x1ad   : > { %v787_v6 = vadd.f32 %v11196_v32, %v13919_v37  ;;  %v778_v17 = vpop.f32.mrb[27].mxu1  ;;  %11718 = vmatmul.mubr.bf16.gmra.mrb[20].mxu0 %v849_v1  ;;  %11397 = vmatprep.subr.bf16.mxu1 %v12940_v12  ;;  %v832_v9 = vmax.f32 %v784_v62, 0.0  ;;  %v12945_v1 = vld [vmem:[#allocation7 + $0xe0] sm:$0xff]   ;;  %v2223_v62 = vrot.slane %v2112_v51, 7  ;;  %v2234_v33 = vrot.slane %v13158_v24, 7 }
 0x1ae   : > { %v779_v31 = vadd.f32 %v13919_v37, %v778_v17  ;;  %v830_v23 = vmax.f32 %v776_v43, 0.0  ;;  %v2217_v17 = vsel %vm13990_vm8, %v2215_v60, %v2216_v8  ;;  %v9968_v47 = vrot.slane %v2113_v4, 11  ;;  %v12934_v60 = vld [vmem:[#allocation2 + $0xc] sm:$0xff]   ;;  %v12939_v24 = vld [vmem:[#allocation2 + $0x24] sm:$0xff]  }
 0x1af   : > { %v833_v38 = vmax.f32 %v787_v6, 0.0  ;;  %11366 = vmatmul.mubr.bf16.gmra.mrb[36].mxu1 %v9978_v34 }
 0x1b0   : > { %v831_v44 = vmax.f32 %v779_v31, 0.0  ;;  %11369 = vmatprep.mubr.bf16.mxu1 %v9979_v13  ;;  %11398 = vmatpush3.bf16.msra.mxu1 %v12940_v12  ;;  %v9980_v12 = vcombine.low %v2200_v36, %v2203_v56  ;;  %v2115_v36 = vld [vmem:[#allocation2 + $0x90] sm:$0x8]  ;;  %v2116_v56 = vld [vmem:[#allocation2 + $0x98] sm:$0x7] }
 0x1b1   : > { %v851_v0 = vpack.c.bf16 %v833_v38, %v832_v9  ;;  %11399 = vmatprep.subr.bf16.mxu1 %v12941_v22  ;;  %v2224_v9 = vsel %vm13990_vm8, %v2222_v11, %v2223_v62  ;;  %v2114_v38 = vld [vmem:[#allocation2 + $0x8c] sm:$0x7] }
 0x1b2   : > { %v850_v59 = vpack.c.bf16 %v831_v44, %v830_v23  ;;  %v11199_v16 = vpop.f32.mrb[28].mxu1  ;;  %v12950_v23 = vld [vmem:[#allocation7 + $0xf0] sm:$0xff]   ;;  %v2230_v51 = vrot.slane %v2114_v38, 7  ;;  %v13160_v62 = vld [vmem:[#allocation2 + $0xac] sm:$0xf] }
 0x1b3   : > { %v800_v55 = vadd.f32 %v11199_v16, %v13919_v37  ;;  %v791_v63 = vpop.f32.mrb[29].mxu1  ;;  %v12951_v16 = vld [vmem:[#allocation7 + $0xf8] sm:$0xff]  }
 0x1b4   : > { %v792_v39 = vadd.f32 %v13919_v37, %v791_v63  ;;  %v11200_v58 = vpop.f32.mrb[30].mxu1  ;;  %11721 = vmatprep.mubr.bf16.mxu0 %v850_v59  ;;  %11400 = vmatpush3.bf16.msra.mxu1 %v12941_v22  ;;  %v13157_v22 = vld [vmem:[#allocation2 + $0x88] sm:$0xf]  ;;  %v2237_v59 = vrot.slane %v2116_v56, 7  ;;  %v13159_v63 = vld [vmem:[#allocation2 + $0xa0] sm:$0xf] }
 0x1b5   : > { %v803_v61 = vadd.f32 %v11200_v58, %v13919_v37  ;;  %v794_v34 = vpop.f32.mrb[31].mxu1  ;;  %11722 = vmatmul.mubr.bf16.gmra.mrb[24].mxu0 %v851_v0  ;;  %11401 = vmatprep.subr.bf16.mxu1 %v12945_v1  ;;  %v836_v32 = vmax.f32 %v800_v55, 0.0  ;;  %v2227_v31 = vrot.slane %v13157_v22, 7  ;;  %v9982_v0 = vcombine.low %v2214_v40, %v2217_v17  ;;  %v12937_v55 = vld [vmem:[#allocation2 + $0x18] sm:$0xff]  }
 0x1b6   : > { %v795_v43 = vadd.f32 %v13919_v37, %v794_v34  ;;  %v834_v57 = vmax.f32 %v792_v39, 0.0  ;;  %v2221_v37 = vsel %vm13990_vm8, %v9967_v41, %v2220_v27  ;;  %v9969_v27 = vrot.slane %v2115_v36, 11  ;;  %v2117_v58 = vld [vmem:[#allocation2 + $0x9c] sm:$0x8]  ;;  %v14080_v34 = vld [vmem:[#allocation7 + $0x140] sm:$0xff]  }
 0x1b7   : > { %v837_v13 = vmax.f32 %v803_v61, 0.0  ;;  %11370 = vmatmul.mubr.bf16.gmra.mrb[40].mxu1 %v9980_v12  ;;  %v9983_v10 = vcombine.low %v2221_v37, %v2224_v9  ;;  %v2229_v42 = vrot.slane %v2227_v31, 4  ;;  %v2228_v8 = vsel %vm13990_vm8, %v9968_v47, %v2227_v31  ;;  %v13161_v9 = vld [vmem:[#allocation2 + $0xb8] sm:$0xf]  ;;  %v13162_v36 = vld [vmem:[#allocation2 + $0xc4] sm:$0xf] }
 0x1b8   : > { %v835_v6 = vmax.f32 %v795_v43, 0.0  ;;  %11373 = vmatprep.mubr.bf16.mxu1 %v9981_v30  ;;  %11402 = vmatpush3.bf16.msra.mxu1 %v12945_v1  ;;  %v2236_v1 = vrot.slane %v2234_v33, 4  ;;  %v2241_v12 = vrot.slane %v13159_v63, 7  ;;  %v2235_v11 = vsel %vm13990_vm8, %v9969_v27, %v2234_v33  ;;  %v2118_v30 = vld [vmem:[#allocation2 + $0xa4] sm:$0x7] }
 0x1b9   : > { %v853_v25 = vpack.c.bf16 %v837_v13, %v836_v32  ;;  %11403 = vmatprep.subr.bf16.mxu1 %v12946_v2  ;;  %v2231_v41 = vsel %vm13990_vm8, %v2229_v42, %v2230_v51  ;;  %v2248_v61 = vrot.slane %v13160_v62, 7  ;;  %v2120_v43 = vld [vmem:[#allocation2 + $0xb0] sm:$0x7]  ;;  %v12938_v13 = vld [vmem:[#allocation7 + $0x348] sm:$0xff]   ;;  %v2244_v17 = vrot.slane %v2118_v30, 7  ;;  %v12948_v51 = vld [vmem:[#allocation7 + $0x358] sm:$0xff]  }
 0x1ba   : > { %v852_v44 = vpack.c.bf16 %v835_v6, %v834_v57  ;;  %v2238_v39 = vsel %vm13990_vm8, %v2236_v1, %v2237_v59  ;;  %v9984_v32 = vcombine.low %v2228_v8, %v2231_v41  ;;  %v9970_v57 = vrot.slane %v2117_v58, 11  ;;  %v2123_v47 = vld [vmem:[#allocation2 + $0xc0] sm:$0x8] }
 0x1bb   : > { %v9985_v40 = vcombine.low %v2235_v11, %v2238_v39  ;;  %v2243_v6 = vrot.slane %v2241_v12, 4  ;;  %v2250_v22 = vrot.slane %v2248_v61, 4  ;;  %v2251_v31 = vrot.slane %v2120_v43, 7  ;;  %v13163_v11 = vld [vmem:[#allocation2 + $0xd0] sm:$0xf]  ;;  %v12944_v58 = vld [vmem:[#allocation2 + $0x3c] sm:$0xff]  }
 0x1bc   : > { %11725 = vmatprep.mubr.bf16.mxu0 %v852_v44  ;;  %11404 = vmatpush3.bf16.msra.mxu1 %v12946_v2  ;;  %v2119_v2 = vld [vmem:[#allocation2 + $0xa8] sm:$0x8]  ;;  %v2255_v38 = vrot.slane %v13161_v9, 7  ;;  %v2122_v44 = vld [vmem:[#allocation2 + $0xbc] sm:$0x7]  ;;  %v2262_v56 = vrot.slane %v13162_v36, 7 }
 0x1bd   : > { %11726 = vmatmul.mubr.bf16.gmra.mrb[28].mxu0 %v853_v25  ;;  %11405 = vmatprep.subr.bf16.mxu1 %v12950_v23  ;;  %v9971_v4 = vrot.slane %v2119_v2, 11  ;;  %v12943_v25 = vld [vmem:[#allocation7 + $0x350] sm:$0xff]   ;;  %v2245_v37 = vsel %vm13990_vm8, %v2243_v6, %v2244_v17  ;;  %v2269_v39 = vrot.slane %v13163_v11, 7  ;;  %v12956_v17 = vld [vmem:[#allocation7 + $0x368] sm:$0xff]  }
 0x1be   : > { %11745 = vmatprep.mubr.bf16.mxu0 %v12932_v26  ;;  %v2242_v26 = vsel %vm13990_vm8, %v9970_v57, %v2241_v12  ;;  %v2257_v59 = vrot.slane %v2255_v38, 4  ;;  %v2264_v8 = vrot.slane %v2262_v56, 4  ;;  %v2126_v2 = vld [vmem:[#allocation2 + $0xd4] sm:$0x7]  ;;  %v2597_v57 = vld [vmem:[#allocation2 + $0x38] sm:$0x1] }
 0x1bf   : > { %11374 = vmatmul.mubr.bf16.gmra.mrb[44].mxu1 %v9982_v0  ;;  %v2249_v33 = vsel %vm13990_vm8, %v9971_v4, %v2248_v61  ;;  %v12942_v0 = vld [vmem:[#allocation2 + $0x30] sm:$0xff]   ;;  %v9986_v42 = vcombine.low %v2242_v26, %v2245_v37  ;;  %v2125_v61 = vld [vmem:[#allocation2 + $0xcc] sm:$0x8]  ;;  %v2665_v9 = vrot.slane %v2597_v57, 5  ;;  %v2603_v57 = vld [vmem:[#allocation2 + $0x5c] sm:$0x1] }
 0x1c0   : > { %11377 = vmatprep.mubr.bf16.mxu1 %v9983_v10  ;;  %11406 = vmatpush3.bf16.msra.mxu1 %v12950_v23  ;;  %v2121_v23 = vld [vmem:[#allocation2 + $0xb4] sm:$0x8]  ;;  %v2124_v10 = vld [vmem:[#allocation2 + $0xc8] sm:$0x7] }
 0x1c1   : > { %11407 = vmatprep.subr.bf16.mxu1 %v12951_v16  ;;  %v9972_v1 = vrot.slane %v2121_v23, 11  ;;  %v2265_v41 = vrot.slane %v2124_v10, 7  ;;  %v14100_v43 = vld [vmem:[#allocation2 + $0x34] sm:$0xf]  ;;  %v14114_v10 = vld [vmem:[#allocation2 + $0x4c] sm:$0xf] }
 0x1c3   : > { %v2256_v63 = vsel %vm13990_vm8, %v9972_v1, %v2255_v38  ;;  %v2266_v62 = vsel %vm13990_vm8, %v2264_v8, %v2265_v41  ;;  %v12959_v38 = vld [vmem:[#allocation7 + $0x370] sm:$0xff]  }
 0x1c4   : > { %11408 = vmatpush3.bf16.msra.mxu1 %v12951_v16  ;;  %v2258_v16 = vrot.slane %v2122_v44, 7  ;;  %v12949_v44 = vld [vmem:[#allocation2 + $0x54] sm:$0xff]   ;;  %v2601_v1 = vld [vmem:[#allocation2 + $0x50] sm:$0x1] }
 0x1c5   : > { %11746 = vmatmul.mubr.bf16.vlgmr.msra.gmra.mrb[32].mxu0 %v12934_v60  ;;  %11441 = vmatprep.subr.bf16.mxu1 %v14080_v34  ;;  %v9973_v60 = vrot.slane %v2123_v47, 11  ;;  %v2599_v47 = vld [vmem:[#allocation2 + $0x44] sm:$0x1]  ;;  %v2679_v11 = vrot.slane %v2601_v1, 5  ;;  %v2606_v1 = vld [vmem:[#allocation2 + $0x6c] sm:$0xe] }
 0x1c6   : > { %11778 = vmatpush3.bf16.msra.mxu0 %v14015_v54  ;;  %11749 = vmatprep.mubr.bf16.mxu0 %v12937_v55  ;;  %v2252_v54 = vsel %vm13990_vm8, %v2250_v22, %v2251_v31  ;;  %v12953_v55 = vld [vmem:[#allocation7 + $0x360] sm:$0xff]   ;;  %v2259_v12 = vsel %vm13990_vm8, %v2257_v59, %v2258_v16  ;;  %v9974_v22 = vrot.slane %v2125_v61, 11  ;;  %v2271_v31 = vrot.slane %v2269_v39, 4  ;;  %v12962_v16 = vld [vmem:[#allocation7 + $0x378] sm:$0xff]  }
 0x1c7   : > { %11378 = vmatmul.mubr.bf16.gmra.mrb[48].mxu1 %v9984_v32  ;;  %11779 = vmatprep.subr.bf16.mxu0 %v12938_v13  ;;  %v9987_v27 = vcombine.low %v2249_v33, %v2252_v54  ;;  %v2263_v30 = vsel %vm13990_vm8, %v9973_v60, %v2262_v56  ;;  %v2662_v32 = vrot.slane %v14100_v43, 5  ;;  %v9988_v6 = vcombine.low %v2256_v63, %v2259_v12  ;;  %v14107_v54 = vld [vmem:[#allocation2 + $0x40] sm:$0xf] }
 0x1c8   : > { %11381 = vmatprep.mubr.bf16.mxu1 %v9985_v40  ;;  %v2596_v40 = vld [vmem:[#allocation2 + $0x30] sm:$0xe]  ;;  %v9989_v4 = vcombine.low %v2263_v30, %v2266_v62  ;;  %v2669_v23 = vrot.slane %v14107_v54, 5  ;;  %v14123_v62 = vld [vmem:[#allocation2 + $0x58] sm:$0xf] }
 0x1c9   : > { %v9999_v26 = vrot.slane %v2596_v40, 9  ;;  %v2664_v37 = vrot.slane %v2662_v32, 4  ;;  %v2683_v61 = vrot.slane %v14123_v62, 5  ;;  %v2602_v40 = vld [vmem:[#allocation2 + $0x54] sm:$0xe] }
 0x1ca   : > { %11780 = vmatpush3.bf16.msra.mxu0 %v12938_v13  ;;  %v12947_v13 = vld [vmem:[#allocation2 + $0x48] sm:$0xff]   ;;  %v2671_v41 = vrot.slane %v2669_v23, 4 }
 0x1cb   : > { %11781 = vmatprep.subr.bf16.mxu0 %v12943_v25  ;;  %v2663_v36 = vsel %vm13741_vm5, %v9999_v26, %v2662_v32  ;;  %v2666_v56 = vsel %vm13741_vm5, %v2664_v37, %v2665_v9  ;;  %v10002_v37 = vrot.slane %v2602_v40, 9  ;;  %v2685_v9 = vrot.slane %v2683_v61, 4  ;;  %v12960_v40 = vld [vmem:[#allocation2 + $0x9c] sm:$0xff]  }
 0x1cc   : > { %v10015_v60 = vcombine.low %v2663_v36, %v2666_v56  ;;  %v12957_v36 = vld [vmem:[#allocation2 + $0x84] sm:$0xff]  }
 0x1cd   : > { %11750 = vmatmul.mubr.bf16.gmra.mrb[36].mxu0 %v12939_v24  ;;  %v2270_v24 = vsel %vm13990_vm8, %v9974_v22, %v2269_v39  ;;  %v14117_v39 = vld [vmem:[#allocation7 + $0x280] sm:$0xff]   ;;  %v2684_v56 = vsel %vm13741_vm5, %v10002_v37, %v2683_v61  ;;  %v2611_v37 = vld [vmem:[#allocation2 + $0x8c] sm:$0x1] }
 0x1ce   : > { %11753 = vmatprep.mubr.bf16.mxu0 %v12942_v0  ;;  %11782 = vmatpush3.bf16.msra.mxu0 %v12943_v25  ;;  %v2272_v25 = vrot.slane %v2126_v2, 7  ;;  %v2598_v0 = vld [vmem:[#allocation2 + $0x3c] sm:$0xe]  ;;  %v12954_v2 = vld [vmem:[#allocation2 + $0x6c] sm:$0xff]   ;;  %v2604_v22 = vld [vmem:[#allocation2 + $0x60] sm:$0xe] }
 0x1cf   : > { %11382 = vmatmul.mubr.bf16.gmra.mrb[52].mxu1 %v9986_v42  ;;  %11783 = vmatprep.subr.bf16.mxu0 %v12948_v51  ;;  %v2676_v42 = vrot.slane %v14114_v10, 5  ;;  %v10000_v8 = vrot.slane %v2598_v0, 9 }
 0x1d0   : > { %11385 = vmatprep.mubr.bf16.mxu1 %v9987_v27  ;;  %v2273_v33 = vsel %vm13990_vm8, %v2271_v31, %v2272_v25  ;;  %v2600_v27 = vld [vmem:[#allocation2 + $0x48] sm:$0xe]  ;;  %v2605_v31 = vld [vmem:[#allocation2 + $0x68] sm:$0x1] }
 0x1d1   : > { %v9990_v59 = vcombine.low %v2270_v24, %v2273_v33  ;;  %v10001_v63 = vrot.slane %v2600_v27, 9  ;;  %v2678_v12 = vrot.slane %v2676_v42, 4  ;;  %v10003_v24 = vrot.slane %v2604_v22, 9 }
 0x1d2   : > { %11784 = vmatpush3.bf16.msra.mxu0 %v12948_v51  ;;  %v12952_v51 = vld [vmem:[#allocation2 + $0x60] sm:$0xff]  }
 0x1d3   : > { %11785 = vmatprep.subr.bf16.mxu0 %v12953_v55  ;;  %v2677_v32 = vsel %vm13741_vm5, %v10001_v63, %v2676_v42  ;;  %v2609_v63 = vld [vmem:[#allocation2 + $0x80] sm:$0x1] }
 0x1d5   : > { %11754 = vmatmul.mubr.bf16.gmra.mrb[40].mxu0 %v12944_v58  ;;  %v2670_v58 = vsel %vm13741_vm5, %v10000_v8, %v2669_v23  ;;  %v2693_v23 = vrot.slane %v2605_v31, 5  ;;  %v12968_v8 = vld [vmem:[#allocation7 + $0x150] sm:$0xff]  }
 0x1d6   : > { %11757 = vmatprep.mubr.bf16.mxu0 %v12947_v13  ;;  %11786 = vmatpush3.bf16.msra.mxu0 %v12953_v55  ;;  %v2672_v55 = vrot.slane %v2599_v47, 5  ;;  %v2680_v13 = vsel %vm13741_vm5, %v2678_v12, %v2679_v11  ;;  %v14138_v47 = vld [vmem:[#allocation2 + $0x70] sm:$0xf] }
 0x1d7   : > { %11386 = vmatmul.mubr.bf16.gmra.mrb[56].mxu1 %v9988_v6  ;;  %11787 = vmatprep.subr.bf16.mxu0 %v12956_v17  ;;  %v14130_v6 = vld [vmem:[#allocation2 + $0x64] sm:$0xf]  ;;  %v10017_v26 = vcombine.low %v2677_v32, %v2680_v13  ;;  %v2697_v42 = vrot.slane %v14138_v47, 5  ;;  %v2707_v32 = vrot.slane %v2609_v63, 5  ;;  %v12969_v13 = vld [vmem:[#allocation7 + $0x158] sm:$0xff]  }
 0x1d8   : > { %11389 = vmatprep.mubr.bf16.mxu1 %v9989_v4  ;;  %v2673_v30 = vsel %vm13741_vm5, %v2671_v41, %v2672_v55  ;;  %v12955_v4 = vld [vmem:[#allocation2 + $0x78] sm:$0xff]   ;;  %v12958_v41 = vld [vmem:[#allocation2 + $0x90] sm:$0xff]  }
 0x1d9   : > { %v10016_v25 = vcombine.low %v2670_v58, %v2673_v30  ;;  %v2608_v55 = vld [vmem:[#allocation2 + $0x78] sm:$0xe]  ;;  %v2699_v58 = vrot.slane %v2697_v42, 4 }
 0x1da   : > { %11788 = vmatpush3.bf16.msra.mxu0 %v12956_v17  ;;  %v2690_v17 = vrot.slane %v14130_v6, 5  ;;  %v10005_v61 = vrot.slane %v2608_v55, 9 }
 0x1db   : > { %11789 = vmatprep.subr.bf16.mxu0 %v12959_v38 }
 0x1dc   : > { %v2692_v33 = vrot.slane %v2690_v17, 4 }
 0x1dd   : > { %11758 = vmatmul.mubr.bf16.gmra.mrb[44].mxu0 %v12949_v44  ;;  %v12966_v44 = vld [vmem:[#allocation7 + $0x148] sm:$0xff]  }
 0x1de   : > { %11761 = vmatprep.mubr.bf16.mxu0 %v12952_v51  ;;  %11790 = vmatpush3.bf16.msra.mxu0 %v12959_v38  ;;  %v2686_v38 = vrot.slane %v2603_v57, 5  ;;  %v2691_v51 = vsel %vm13741_vm5, %v10003_v24, %v2690_v17  ;;  %v2694_v27 = vsel %vm13741_vm5, %v2692_v33, %v2693_v23  ;;  %v12971_v24 = vld [vmem:[#allocation7 + $0x160] sm:$0xff]   ;;  %v12961_v33 = vld [vmem:[#allocation2 + $0xa8] sm:$0xff]   ;;  %v2612_v23 = vld [vmem:[#allocation2 + $0x90] sm:$0xe] }
 0x1df   : > { %11390 = vmatmul.mubr.bf16.gmra.mrb[60].mxu1 %v9990_v59  ;;  %11791 = vmatprep.subr.bf16.mxu0 %v12962_v16  ;;  %v2607_v59 = vld [vmem:[#allocation2 + $0x74] sm:$0x1]  ;;  %v10019_v11 = vcombine.low %v2691_v51, %v2694_v27  ;;  %v2714_v51 = vrot.slane %v2611_v37, 5  ;;  %v10007_v27 = vrot.slane %v2612_v23, 9 }
 0x1e0   : > { %11409 = vmatprep.mubr.bf16.mxu1 %v10015_v60  ;;  %v2687_v0 = vsel %vm13741_vm5, %v2685_v9, %v2686_v38  ;;  %v2700_v30 = vrot.slane %v2607_v59, 5  ;;  %v14160_v9 = vld [vmem:[#allocation2 + $0x94] sm:$0xf] }
 0x1e1   : > { %v10018_v12 = vcombine.low %v2684_v56, %v2687_v0  ;;  %v2718_v38 = vrot.slane %v14160_v9, 5 }
 0x1e2   : > { %11792 = vmatpush3.bf16.msra.mxu0 %v12962_v16  ;;  %v14146_v16 = vld [vmem:[#allocation2 + $0x7c] sm:$0xf]  ;;  %v2701_v17 = vsel %vm13741_vm5, %v2699_v58, %v2700_v30  ;;  %v12963_v30 = vld [vmem:[#allocation2 + $0xb4] sm:$0xff]  }
 0x1e3   : > { %11825 = vmatprep.subr.bf16.mxu0 %v14117_v39  ;;  %v2704_v60 = vrot.slane %v14146_v16, 5 }
 0x1e5   : > { %11762 = vmatmul.mubr.bf16.gmra.mrb[48].mxu0 %v12954_v2  ;;  %v2706_v2 = vrot.slane %v2704_v60, 4  ;;  %v2705_v31 = vsel %vm13741_vm5, %v10005_v61, %v2704_v60  ;;  %v12972_v60 = vld [vmem:[#allocation7 + $0x168] sm:$0xff]   ;;  %v2719_v61 = vsel %vm13741_vm5, %v10007_v27, %v2718_v38 }
 0x1e6   : > { %11765 = vmatprep.mubr.bf16.mxu0 %v12955_v4  ;;  %v14153_v4 = vld [vmem:[#allocation2 + $0x88] sm:$0xf] }
 0x1e7   : > { %11410 = vmatmul.mubr.bf16.vlgmr.msra.gmra.mrb[32].mxu1 %v10016_v25  ;;  %v2711_v22 = vrot.slane %v14153_v4, 5  ;;  %v2708_v25 = vsel %vm13741_vm5, %v2706_v2, %v2707_v32  ;;  %v2616_v32 = vld [vmem:[#allocation2 + $0xa8] sm:$0xe] }
 0x1e8   : > { %11413 = vmatprep.mubr.bf16.mxu1 %v10017_v26  ;;  %11442 = vmatpush3.bf16.msra.mxu1 %v14080_v34  ;;  %v10004_v34 = vrot.slane %v2606_v1, 9  ;;  %v2610_v26 = vld [vmem:[#allocation2 + $0x84] sm:$0xe]  ;;  %v10021_v56 = vcombine.low %v2705_v31, %v2708_v25  ;;  %v2720_v1 = vrot.slane %v2718_v38, 4  ;;  %v14178_v38 = vld [vmem:[#allocation2 + $0xb8] sm:$0xf] }
 0x1e9   : > { %11443 = vmatprep.subr.bf16.mxu1 %v12966_v44  ;;  %v10006_v0 = vrot.slane %v2610_v26, 9  ;;  %v10009_v26 = vrot.slane %v2616_v32, 9  ;;  %v2739_v23 = vrot.slane %v14178_v38, 5  ;;  %v14198_v32 = vld [vmem:[#allocation2 + $0xd0] sm:$0xf] }
 0x1ea   : > { %v2698_v57 = vsel %vm13741_vm5, %v10004_v34, %v2697_v42  ;;  %v2713_v42 = vrot.slane %v2711_v22, 4  ;;  %v14170_v34 = vld [vmem:[#allocation2 + $0xac] sm:$0xf] }
 0x1eb   : > { %v2712_v55 = vsel %vm13741_vm5, %v10006_v0, %v2711_v22  ;;  %v2732_v58 = vrot.slane %v14170_v34, 5  ;;  %v2619_v0 = vld [vmem:[#allocation2 + $0xbc] sm:$0x1] }
 0x1ec   : > { %11444 = vmatpush3.bf16.msra.mxu1 %v12966_v44  ;;  %v2613_v44 = vld [vmem:[#allocation2 + $0x98] sm:$0x1]  ;;  %v2715_v63 = vsel %vm13741_vm5, %v2713_v42, %v2714_v51  ;;  %v2620_v42 = vld [vmem:[#allocation2 + $0xc0] sm:$0xe]  ;;  %v12967_v51 = vld [vmem:[#allocation7 + $0x288] sm:$0xff]  }
 0x1ed   : > { %11766 = vmatmul.mubr.bf16.gmra.mrb[52].mxu0 %v12957_v36  ;;  %11445 = vmatprep.subr.bf16.mxu1 %v12968_v8  ;;  %v10020_v36 = vcombine.low %v2698_v57, %v2701_v17  ;;  %v2721_v59 = vrot.slane %v2613_v44, 5  ;;  %v10022_v57 = vcombine.low %v2712_v55, %v2715_v63  ;;  %v2734_v37 = vrot.slane %v2732_v58, 4  ;;  %v2618_v44 = vld [vmem:[#allocation2 + $0xb4] sm:$0xe]  ;;  %v2621_v63 = vld [vmem:[#allocation2 + $0xc8] sm:$0x1] }
 0x1ee   : > { %11769 = vmatprep.mubr.bf16.mxu0 %v12958_v41  ;;  %v2741_v55 = vrot.slane %v2739_v23, 4 }
 0x1ef   : > { %11414 = vmatmul.mubr.bf16.gmra.mrb[36].mxu1 %v10018_v12  ;;  %v2614_v12 = vld [vmem:[#allocation2 + $0x9c] sm:$0xe]  ;;  %v2722_v2 = vsel %vm13741_vm5, %v2720_v1, %v2721_v59  ;;  %v14189_v1 = vld [vmem:[#allocation2 + $0xc4] sm:$0xf] }
 0x1f0   : > { %11417 = vmatprep.mubr.bf16.mxu1 %v10019_v11  ;;  %11446 = vmatpush3.bf16.msra.mxu1 %v12968_v8  ;;  %v14163_v8 = vld [vmem:[#allocation2 + $0xa0] sm:$0xf]  ;;  %v2615_v11 = vld [vmem:[#allocation2 + $0xa4] sm:$0x1]  ;;  %v10008_v17 = vrot.slane %v2614_v12, 9  ;;  %v10023_v25 = vcombine.low %v2719_v61, %v2722_v2  ;;  %v2746_v59 = vrot.slane %v14189_v1, 5 }
 0x1f1   : > { %11447 = vmatprep.subr.bf16.mxu1 %v12969_v13  ;;  %v2725_v41 = vrot.slane %v14163_v8, 5  ;;  %v2728_v31 = vrot.slane %v2615_v11, 5  ;;  %v2742_v11 = vrot.slane %v2619_v0, 5  ;;  %v2749_v2 = vrot.slane %v2621_v63, 5 }
 0x1f3   : > { %v2727_v22 = vrot.slane %v2725_v41, 4 }
 0x1f4   : > { %11448 = vmatpush3.bf16.msra.mxu1 %v12969_v13  ;;  %v12974_v13 = vld [vmem:[#allocation7 + $0x170] sm:$0xff]  }
 0x1f5   : > { %11770 = vmatmul.mubr.bf16.gmra.mrb[56].mxu0 %v12960_v40  ;;  %11449 = vmatprep.subr.bf16.mxu1 %v12971_v24  ;;  %v2617_v40 = vld [vmem:[#allocation2 + $0xb0] sm:$0x1] }
 0x1f6   : > { %11773 = vmatprep.mubr.bf16.mxu0 %v12961_v33  ;;  %v12975_v33 = vld [vmem:[#allocation7 + $0x178] sm:$0xff]  }
 0x1f7   : > { %11418 = vmatmul.mubr.bf16.gmra.mrb[40].mxu1 %v10020_v36  ;;  %v2726_v36 = vsel %vm13741_vm5, %v10008_v17, %v2725_v41  ;;  %v10010_v41 = vrot.slane %v2618_v44, 9  ;;  %v2623_v17 = vld [vmem:[#allocation2 + $0xd4] sm:$0x1]  ;;  %v2625_v44 = vld [vmem:[#allocation2 + $0xe0] sm:$0x1] }
 0x1f8   : > { %11421 = vmatprep.mubr.bf16.mxu1 %v10021_v56  ;;  %11450 = vmatpush3.bf16.msra.mxu1 %v12971_v24  ;;  %v2735_v24 = vrot.slane %v2617_v40, 5  ;;  %v2729_v56 = vsel %vm13741_vm5, %v2727_v22, %v2728_v31  ;;  %v12970_v40 = vld [vmem:[#allocation7 + $0x290] sm:$0xff]   ;;  %v2743_v22 = vsel %vm13741_vm5, %v2741_v55, %v2742_v11  ;;  %v2624_v31 = vld [vmem:[#allocation2 + $0xd8] sm:$0xe]  ;;  %v12976_v55 = vld [vmem:[#allocation7 + $0x2a0] sm:$0xff]  }
 0x1f9   : > { %11451 = vmatprep.subr.bf16.mxu1 %v12972_v60  ;;  %v10024_v12 = vcombine.low %v2726_v36, %v2729_v56  ;;  %v12973_v36 = vld [vmem:[#allocation7 + $0x298] sm:$0xff]   ;;  %v10013_v56 = vrot.slane %v2624_v31, 9 }
 0x1fa   : > { %v2736_v27 = vsel %vm13741_vm5, %v2734_v37, %v2735_v24 }
 0x1fc   : > { %11452 = vmatpush3.bf16.msra.mxu1 %v12972_v60  ;;  %v14192_v60 = vld [vmem:[#allocation7 + $0x180] sm:$0xff]  }
 0x1fd   : > { %11774 = vmatmul.mubr.bf16.gmra.mrb[60].mxu0 %v12963_v30  ;;  %11453 = vmatprep.subr.bf16.mxu1 %v12974_v13  ;;  %v10011_v30 = vrot.slane %v2620_v42, 9 }
 0x1fe   : > { %11793 = vmatprep.mubr.bf16.mxu0 %v13628_v15  ;;  %v2733_v15 = vsel %vm13741_vm5, %v10009_v26, %v2732_v58  ;;  %v2748_v58 = vrot.slane %v2746_v59, 4 }
 0x1ff   : > { %11422 = vmatmul.mubr.bf16.gmra.mrb[44].mxu1 %v10022_v57  ;;  %v10025_v61 = vcombine.low %v2733_v15, %v2736_v27  ;;  %v2622_v57 = vld [vmem:[#allocation2 + $0xcc] sm:$0xe]  ;;  %v2763_v15 = vrot.slane %v2625_v44, 5  ;;  %v14214_v27 = vld [vmem:[#allocation2 + $0xe8] sm:$0xf] }
 0x200   : > { %11425 = vmatprep.mubr.bf16.mxu1 %v10023_v25  ;;  %11454 = vmatpush3.bf16.msra.mxu1 %v12974_v13  ;;  %v2753_v13 = vrot.slane %v14198_v32, 5  ;;  %v14209_v25 = vld [vmem:[#allocation2 + $0xdc] sm:$0xf]  ;;  %v10012_v37 = vrot.slane %v2622_v57, 9  ;;  %v3098_v44 = vld [vmem:[#allocation2 + $0x48] sm:$0x8] }
 0x201   : > { %11455 = vmatprep.subr.bf16.mxu1 %v12975_v33  ;;  %v2760_v26 = vrot.slane %v14209_v25, 5 }
 0x202   : > { %v2755_v24 = vrot.slane %v2753_v13, 4  ;;  %v2754_v63 = vsel %vm13741_vm5, %v10012_v37, %v2753_v13 }
 0x203   : > { %v2762_v42 = vrot.slane %v2760_v26, 4 }
 0x204   : > { %11456 = vmatpush3.bf16.msra.mxu1 %v12975_v33  ;;  %v2756_v33 = vrot.slane %v2623_v17, 5  ;;  %v12977_v17 = vld [vmem:[#allocation7 + $0x2a8] sm:$0xff]  }
 0x205   : > { %11794 = vmatmul.mubr.bf16.vlgmr.msra.gmra.mrb[32].mxu0 %v13639_v46  ;;  %11489 = vmatprep.subr.bf16.mxu1 %v14192_v60  ;;  %v2740_v46 = vsel %vm13741_vm5, %v10010_v41, %v2739_v23  ;;  %v2627_v41 = vld [vmem:[#allocation2 + $0xec] sm:$0x1]  ;;  %v2764_v11 = vsel %vm13741_vm5, %v2762_v42, %v2763_v15 }
 0x206   : > { %11826 = vmatpush3.bf16.msra.mxu0 %v14117_v39  ;;  %11797 = vmatprep.mubr.bf16.mxu0 %v13641_v50  ;;  %v2747_v50 = vsel %vm13741_vm5, %v10011_v30, %v2746_v59  ;;  %v2750_v39 = vsel %vm13741_vm5, %v2748_v58, %v2749_v2  ;;  %v10026_v23 = vcombine.low %v2740_v46, %v2743_v22  ;;  %v2626_v59 = vld [vmem:[#allocation2 + $0xe4] sm:$0xe]  ;;  %v3160_v30 = vrot.slane %v14100_v43, 7  ;;  %v12978_v43 = vld [vmem:[#allocation7 + $0x2b0] sm:$0xff]  }
 0x207   : > { %11426 = vmatmul.mubr.bf16.gmra.mrb[48].mxu1 %v10024_v12  ;;  %11827 = vmatprep.subr.bf16.mxu0 %v12967_v51  ;;  %v10027_v0 = vcombine.low %v2747_v50, %v2750_v39  ;;  %v3094_v12 = vld [vmem:[#allocation2 + $0x30] sm:$0x8]  ;;  %v2770_v2 = vrot.slane %v2627_v41, 5 }
 0x208   : > { %11429 = vmatprep.mubr.bf16.mxu1 %v10025_v61  ;;  %v10014_v61 = vrot.slane %v2626_v59, 9  ;;  %v10039_v13 = vrot.slane %v3094_v12, 11  ;;  %v3162_v22 = vrot.slane %v3160_v30, 4  ;;  %v3100_v12 = vld [vmem:[#allocation2 + $0x54] sm:$0x8] }
 0x20a   : > { %11828 = vmatpush3.bf16.msra.mxu0 %v12967_v51  ;;  %v2767_v51 = vrot.slane %v14214_v27, 5 }
 0x20b   : > { %11829 = vmatprep.subr.bf16.mxu0 %v12970_v40 }
 0x20c   : > { %v2769_v58 = vrot.slane %v2767_v51, 4  ;;  %v2768_v50 = vsel %vm13741_vm5, %v10014_v61, %v2767_v51  ;;  %v10041_v51 = vrot.slane %v3098_v44, 11  ;;  %v3103_v61 = vld [vmem:[#allocation2 + $0x68] sm:$0x7] }
 0x20d   : > { %11798 = vmatmul.mubr.bf16.gmra.mrb[36].mxu0 %v13653_v5  ;;  %v2757_v5 = vsel %vm13741_vm5, %v2755_v24, %v2756_v33  ;;  %v3097_v24 = vld [vmem:[#allocation2 + $0x44] sm:$0x7]  ;;  %v3174_v33 = vrot.slane %v14114_v10, 7 }
 0x20e   : > { %11801 = vmatprep.mubr.bf16.mxu0 %v13655_v7  ;;  %11830 = vmatpush3.bf16.msra.mxu0 %v12970_v40  ;;  %v2761_v7 = vsel %vm13741_vm5, %v10013_v56, %v2760_v26  ;;  %v3095_v40 = vld [vmem:[#allocation2 + $0x38] sm:$0x7]  ;;  %v10028_v57 = vcombine.low %v2754_v63, %v2757_v5  ;;  %v2771_v39 = vsel %vm13741_vm5, %v2769_v58, %v2770_v2  ;;  %v3167_v26 = vrot.slane %v14107_v54, 7  ;;  %v14240_v10 = vld [vmem:[#allocation7 + $0x2c0] sm:$0xff]  }
 0x20f   : > { %11430 = vmatmul.mubr.bf16.gmra.mrb[52].mxu1 %v10026_v23  ;;  %11831 = vmatprep.subr.bf16.mxu0 %v12973_v36  ;;  %v10029_v46 = vcombine.low %v2761_v7, %v2764_v11  ;;  %v3163_v31 = vrot.slane %v3095_v40, 7  ;;  %v3099_v23 = vld [vmem:[#allocation2 + $0x50] sm:$0x7]  ;;  %v12979_v56 = vld [vmem:[#allocation7 + $0x2b8] sm:$0xff]   ;;  %v3170_v54 = vrot.slane %v3097_v24, 7  ;;  %v3176_v59 = vrot.slane %v3174_v33, 4 }
 0x210   : > { %11433 = vmatprep.mubr.bf16.mxu1 %v10027_v0  ;;  %v3169_v15 = vrot.slane %v3167_v26, 4  ;;  %v3177_v41 = vrot.slane %v3099_v23, 7  ;;  %v3181_v5 = vrot.slane %v14123_v62, 7  ;;  %v3101_v7 = vld [vmem:[#allocation2 + $0x5c] sm:$0x7]  ;;  %v3188_v11 = vrot.slane %v14130_v6, 7 }
 0x211   : > { %v3164_v37 = vsel %vm13990_vm8, %v3162_v22, %v3163_v31  ;;  %v10042_v40 = vrot.slane %v3100_v12, 11  ;;  %v3184_v62 = vrot.slane %v3101_v7, 7  ;;  %v12982_v22 = vld [vmem:[#allocation7 + $0x188] sm:$0xff]   ;;  %v14266_v24 = vld [vmem:[#allocation2 + $0x4] sm:$0xf]  ;;  %v3216_v7 = vrot.slane %v14160_v9, 7 }
 0x212   : > { %11832 = vmatpush3.bf16.msra.mxu0 %v12973_v36  ;;  %v10030_v36 = vcombine.low %v2768_v50, %v2771_v39  ;;  %v3171_v63 = vsel %vm13990_vm8, %v3169_v15, %v3170_v54  ;;  %v3195_v50 = vrot.slane %v14138_v47, 7  ;;  %v6317_v15 = vrot.slane %v14266_v24, 6  ;;  %v6221_v54 = vld [vmem:[#allocation2 + $0x8] sm:$0x3]  ;;  %v3110_v12 = vld [vmem:[#allocation2 + $0x90] sm:$0x8] }
 0x213   : > { %11833 = vmatprep.subr.bf16.mxu0 %v12976_v55  ;;  %v3182_v6 = vsel %vm13990_vm8, %v10042_v40, %v3181_v5  ;;  %v6222_v40 = vld [vmem:[#allocation2 + $0xc] sm:$0xc] }
 0x214   : > { %v3197_v23 = vrot.slane %v3195_v50, 4 }
 0x215   : > { %11802 = vmatmul.mubr.bf16.gmra.mrb[40].mxu0 %v13667_v28  ;;  %v3161_v28 = vsel %vm13990_vm8, %v10039_v13, %v3160_v30  ;;  %v3102_v30 = vld [vmem:[#allocation2 + $0x60] sm:$0x8] }
 0x216   : > { %11805 = vmatprep.mubr.bf16.mxu0 %v13669_v29  ;;  %11834 = vmatpush3.bf16.msra.mxu0 %v12976_v55  ;;  %v3096_v29 = vld [vmem:[#allocation2 + $0x3c] sm:$0x8]  ;;  %v10055_v0 = vcombine.low %v3161_v28, %v3164_v37  ;;  %v10043_v13 = vrot.slane %v3102_v30, 11  ;;  %v3202_v28 = vrot.slane %v14146_v16, 7  ;;  %v12984_v37 = vld [vmem:[#allocation7 + $0x190] sm:$0xff]  }
 0x217   : > { %11434 = vmatmul.mubr.bf16.gmra.mrb[56].mxu1 %v10028_v57  ;;  %11835 = vmatprep.subr.bf16.mxu0 %v12977_v17  ;;  %v10040_v42 = vrot.slane %v3096_v29, 11  ;;  %v3183_v57 = vrot.slane %v3181_v5, 4  ;;  %v3107_v29 = vld [vmem:[#allocation2 + $0x80] sm:$0x7]  ;;  %v12985_v16 = vld [vmem:[#allocation7 + $0x198] sm:$0xff]  }
 0x218   : > { %11437 = vmatprep.mubr.bf16.mxu1 %v10029_v46  ;;  %v3191_v46 = vrot.slane %v3103_v61, 7  ;;  %v3111_v61 = vld [vmem:[#allocation2 + $0x98] sm:$0x7] }
 0x219   : > { %v3168_v55 = vsel %vm13990_vm8, %v10040_v42, %v3167_v26  ;;  %v3185_v31 = vsel %vm13990_vm8, %v3183_v57, %v3184_v62  ;;  %v3106_v26 = vld [vmem:[#allocation2 + $0x78] sm:$0x8]  ;;  %v6219_v42 = vld [vmem:[#allocation2] sm:$0xc]  ;;  %v14284_v62 = vld [vmem:[#allocation2 + $0x1c] sm:$0xf] }
 0x21a   : > { %11836 = vmatpush3.bf16.msra.mxu0 %v12977_v17  ;;  %v10056_v58 = vcombine.low %v3168_v55, %v3171_v63  ;;  %v3190_v17 = vrot.slane %v3188_v11, 4  ;;  %v3109_v63 = vld [vmem:[#allocation2 + $0x8c] sm:$0x7]  ;;  %v10248_v5 = vrot.slane %v6219_v42, 10 }
 0x21b   : > { %11837 = vmatprep.subr.bf16.mxu0 %v12978_v43 }
 0x21c   : > { %v3192_v39 = vsel %vm13990_vm8, %v3190_v17, %v3191_v46  ;;  %v3212_v17 = vrot.slane %v3109_v63, 7  ;;  %v14288_v46 = vsel %vm13620_vm2, %v10248_v5, %v6317_v15  ;;  %v6230_v5 = vld [vmem:[#allocation2 + $0x2c] sm:$0x3] }
 0x21d   : > { %11806 = vmatmul.mubr.bf16.gmra.mrb[44].mxu0 %v13681_v52  ;;  %v3175_v52 = vsel %vm13990_vm8, %v10041_v51, %v3174_v33  ;;  %v10058_v33 = vcombine.low %v3182_v6, %v3185_v31  ;;  %v3108_v51 = vld [vmem:[#allocation2 + $0x84] sm:$0x8]  ;;  %v10047_v6 = vrot.slane %v3110_v12, 11  ;;  %v3218_v31 = vrot.slane %v3216_v7, 4 }
 0x21e   : > { %11809 = vmatprep.mubr.bf16.mxu0 %v13683_v53  ;;  %11838 = vmatpush3.bf16.msra.mxu0 %v12978_v43  ;;  %v3178_v53 = vsel %vm13990_vm8, %v3176_v59, %v3177_v41  ;;  %v3104_v43 = vld [vmem:[#allocation2 + $0x6c] sm:$0x8]  ;;  %v3209_v59 = vrot.slane %v14153_v4, 7  ;;  %v6320_v4 = vrot.slane %v6221_v54, 6  ;;  %v10046_v30 = vrot.slane %v3108_v51, 11  ;;  %v12990_v54 = vld [vmem:[#allocation7 + $0x1b0] sm:$0xff]  }
 0x21f   : > { %11438 = vmatmul.mubr.bf16.gmra.mrb[60].mxu1 %v10030_v36  ;;  %11839 = vmatprep.subr.bf16.mxu0 %v12979_v56  ;;  %v10057_v2 = vcombine.low %v3175_v52, %v3178_v53  ;;  %v10044_v44 = vrot.slane %v3104_v43, 11  ;;  %v10045_v36 = vrot.slane %v3106_v26, 11  ;;  %v14278_v52 = vld [vmem:[#allocation2 + $0x10] sm:$0xf]  ;;  %v6319_v53 = vrot.slane %v6317_v15, 4 }
 0x220   : > { %11457 = vmatprep.mubr.bf16.mxu1 %v10055_v0  ;;  %v3205_v0 = vrot.slane %v3107_v29, 7  ;;  %v6324_v57 = vrot.slane %v14278_v52, 6  ;;  %v3219_v43 = vrot.slane %v3111_v61, 7  ;;  %v3113_v26 = vld [vmem:[#allocation2 + $0xa4] sm:$0x7]  ;;  %v3237_v61 = vrot.slane %v14178_v38, 7 }
 0x221   : > { %v3196_v41 = vsel %vm13990_vm8, %v10044_v44, %v3195_v50  ;;  %v3203_v55 = vsel %vm13990_vm8, %v10045_v36, %v3202_v28  ;;  %v6321_v9 = vsel %vm13620_vm2, %v6319_v53, %v6320_v4  ;;  %v3112_v50 = vld [vmem:[#allocation2 + $0x9c] sm:$0x8]  ;;  %v6227_v44 = vld [vmem:[#allocation2 + $0x20] sm:$0x3]  ;;  %v3114_v36 = vld [vmem:[#allocation2 + $0xa8] sm:$0x8] }
 0x222   : > { %11840 = vmatpush3.bf16.msra.mxu0 %v12979_v56  ;;  %v3204_v56 = vrot.slane %v3202_v28, 4  ;;  %v6331_v28 = vrot.slane %v14284_v62, 6  ;;  %v6326_v29 = vrot.slane %v6324_v57, 4  ;;  %v3220_v42 = vsel %vm13990_vm8, %v3218_v31, %v3219_v43  ;;  %v14326_v31 = vld [vmem:[#allocation2 + $0x40] sm:$0xf] }
 0x223   : > { %11873 = vmatprep.subr.bf16.mxu0 %v14240_v10 }
 0x225   : > { %11810 = vmatmul.mubr.bf16.gmra.mrb[48].mxu0 %v13697_v14  ;;  %v3189_v14 = vsel %vm13990_vm8, %v10043_v13, %v3188_v11  ;;  %v12987_v11 = vld [vmem:[#allocation7 + $0x1a0] sm:$0xff]  }
 0x226   : > { %11813 = vmatprep.mubr.bf16.mxu0 %v13699_v18  ;;  %v3105_v18 = vld [vmem:[#allocation2 + $0x74] sm:$0x7]  ;;  %v10059_v47 = vcombine.low %v3189_v14, %v3192_v39  ;;  %v3223_v14 = vrot.slane %v14163_v8, 7  ;;  %v12988_v39 = vld [vmem:[#allocation7 + $0x1a8] sm:$0xff]  }
 0x227   : > { %11458 = vmatmul.mubr.bf16.vlgmr.msra.gmra.mrb[32].mxu1 %v10056_v58 }
 0x228   : > { %11461 = vmatprep.mubr.bf16.mxu1 %v10057_v2  ;;  %11490 = vmatpush3.bf16.msra.mxu1 %v14192_v60  ;;  %v3198_v60 = vrot.slane %v3105_v18, 7  ;;  %v3211_v2 = vrot.slane %v3209_v59, 4  ;;  %v10249_v18 = vrot.slane %v6222_v40, 10  ;;  %v3225_v15 = vrot.slane %v3223_v14, 4 }
 0x229   : > { %11491 = vmatprep.subr.bf16.mxu1 %v12982_v22 }
 0x22a   : > { %v3213_v8 = vsel %vm13990_vm8, %v3211_v2, %v3212_v17  ;;  %v6325_v12 = vsel %vm13620_vm2, %v10249_v18, %v6324_v57  ;;  %v6231_v17 = vld [vmem:[#allocation2 + $0x30] sm:$0xc]  ;;  %v3239_v18 = vrot.slane %v3237_v61, 4 }
 0x22c   : > { %11492 = vmatpush3.bf16.msra.mxu1 %v12982_v22  ;;  %v6224_v22 = vld [vmem:[#allocation2 + $0x14] sm:$0x3] }
 0x22d   : > { %11814 = vmatmul.mubr.bf16.gmra.mrb[52].mxu0 %v13714_v45  ;;  %11493 = vmatprep.subr.bf16.mxu1 %v12984_v37  ;;  %v3199_v45 = vsel %vm13990_vm8, %v3197_v23, %v3198_v60  ;;  %v6327_v23 = vrot.slane %v6224_v22, 6  ;;  %v10048_v60 = vrot.slane %v3112_v50, 11  ;;  %v12991_v22 = vld [vmem:[#allocation7 + $0x1b8] sm:$0xff]  }
 0x22e   : > { %11817 = vmatprep.mubr.bf16.mxu0 %v13716_v48  ;;  %v3206_v48 = vsel %vm13990_vm8, %v3204_v56, %v3205_v0  ;;  %v10060_v58 = vcombine.low %v3196_v41, %v3199_v45  ;;  %v3115_v56 = vld [vmem:[#allocation2 + $0xb0] sm:$0x7]  ;;  %v3217_v0 = vsel %vm13990_vm8, %v10047_v6, %v3216_v7  ;;  %v6334_v41 = vrot.slane %v6227_v44, 6  ;;  %v6228_v45 = vld [vmem:[#allocation2 + $0x24] sm:$0xc] }
 0x22f   : > { %11462 = vmatmul.mubr.bf16.gmra.mrb[36].mxu1 %v10058_v33  ;;  %v10061_v13 = vcombine.low %v3203_v55, %v3206_v48  ;;  %v6225_v33 = vld [vmem:[#allocation2 + $0x18] sm:$0xc]  ;;  %v10049_v48 = vrot.slane %v3114_v36, 11  ;;  %v3233_v4 = vrot.slane %v3115_v56, 7  ;;  %v10063_v7 = vcombine.low %v3217_v0, %v3220_v42  ;;  %v12983_v56 = vld [vmem:[#allocation7 + $0x2c8] sm:$0xff]  }
 0x230   : > { %11465 = vmatprep.mubr.bf16.mxu1 %v10059_v47  ;;  %11494 = vmatpush3.bf16.msra.mxu1 %v12984_v37  ;;  %v14296_v37 = vld [vmem:[#allocation2 + $0x28] sm:$0xf]  ;;  %v3230_v47 = vrot.slane %v14170_v34, 7  ;;  %v14308_v34 = vld [vmem:[#allocation2 + $0x34] sm:$0xf]  ;;  %v10250_v51 = vrot.slane %v6225_v33, 10  ;;  %v6328_v2 = vsel %vm13620_vm2, %v6326_v29, %v6327_v23  ;;  %v3224_v40 = vsel %vm13990_vm8, %v10048_v60, %v3223_v14 }
 0x231   : > { %11495 = vmatprep.subr.bf16.mxu1 %v12985_v16  ;;  %v6338_v55 = vrot.slane %v14296_v37, 6  ;;  %v10251_v57 = vrot.slane %v6228_v45, 10  ;;  %v10265_v29 = vcombine.low %v6325_v12, %v6328_v2  ;;  %v6352_v33 = vrot.slane %v14326_v31, 6  ;;  %v3118_v23 = vld [vmem:[#allocation2 + $0xc0] sm:$0x8] }
 0x232   : > { %v3232_v53 = vrot.slane %v3230_v47, 4  ;;  %v6332_v38 = vsel %vm13620_vm2, %v10250_v51, %v6331_v28  ;;  %v3231_v43 = vsel %vm13990_vm8, %v10049_v48, %v3230_v47  ;;  %v3244_v44 = vrot.slane %v14189_v1, 7  ;;  %v3119_v60 = vld [vmem:[#allocation2 + $0xc8] sm:$0x7]  ;;  %v12986_v48 = vld [vmem:[#allocation7 + $0x2d0] sm:$0xff]  }
 0x233   : > { %v6340_v6 = vrot.slane %v6338_v55, 4  ;;  %v6339_v0 = vsel %vm13620_vm2, %v10251_v57, %v6338_v55  ;;  %v10051_v55 = vrot.slane %v3118_v23, 11  ;;  %v3251_v12 = vrot.slane %v14198_v32, 7 }
 0x234   : > { %11496 = vmatpush3.bf16.msra.mxu1 %v12985_v16  ;;  %v3226_v16 = vrot.slane %v3113_v26, 7  ;;  %v3234_v50 = vsel %vm13990_vm8, %v3232_v53, %v3233_v4  ;;  %v10252_v26 = vrot.slane %v6231_v17, 10  ;;  %v6354_v53 = vrot.slane %v6352_v33, 4  ;;  %v3120_v4 = vld [vmem:[#allocation2 + $0xcc] sm:$0x8] }
 0x235   : > { %11818 = vmatmul.mubr.bf16.gmra.mrb[56].mxu0 %v13735_v19  ;;  %11497 = vmatprep.subr.bf16.mxu1 %v12987_v11  ;;  %v3210_v19 = vsel %vm13990_vm8, %v10046_v30, %v3209_v59  ;;  %v6333_v59 = vrot.slane %v6331_v28, 4  ;;  %v3117_v30 = vld [vmem:[#allocation2 + $0xbc] sm:$0x7]  ;;  %v3245_v32 = vsel %vm13990_vm8, %v10051_v55, %v3244_v44  ;;  %v3265_v23 = vrot.slane %v14214_v27, 7 }
 0x236   : > { %11821 = vmatprep.mubr.bf16.mxu0 %v13737_v20  ;;  %v10264_v20 = vcombine.low %v14288_v46, %v6321_v9  ;;  %v10062_v63 = vcombine.low %v3210_v19, %v3213_v8  ;;  %v6233_v46 = vld [vmem:[#allocation2 + $0x38] sm:$0x3]  ;;  %v6341_v9 = vrot.slane %v6230_v5, 6  ;;  %v14334_v8 = vld [vmem:[#allocation7 + $0x1c0] sm:$0xff]   ;;  %v3247_v5 = vrot.slane %v3119_v60, 7 }
 0x237   : > { %11466 = vmatmul.mubr.bf16.gmra.mrb[40].mxu1 %v10060_v58  ;;  %v6345_v58 = vrot.slane %v14308_v34, 6  ;;  %v6348_v19 = vrot.slane %v6233_v46, 6  ;;  %v3122_v46 = vld [vmem:[#allocation2 + $0xd8] sm:$0x8] }
 0x238   : > { %11469 = vmatprep.mubr.bf16.mxu1 %v10061_v13  ;;  %11498 = vmatpush3.bf16.msra.mxu1 %v12987_v11  ;;  %v3116_v11 = vld [vmem:[#allocation2 + $0xb4] sm:$0x8]  ;;  %v3227_v13 = vsel %vm13990_vm8, %v3225_v15, %v3226_v16  ;;  %v6342_v42 = vsel %vm13620_vm2, %v6340_v6, %v6341_v9  ;;  %v10065_v15 = vcombine.low %v3231_v43, %v3234_v50  ;;  %v3123_v43 = vld [vmem:[#allocation2 + $0xe0] sm:$0x7] }
 0x239   : > { %11499 = vmatprep.subr.bf16.mxu1 %v12988_v39  ;;  %v10050_v14 = vrot.slane %v3116_v11, 11  ;;  %v6347_v28 = vrot.slane %v6345_v58, 4  ;;  %v10064_v36 = vcombine.low %v3224_v40, %v3227_v13  ;;  %v3121_v11 = vld [vmem:[#allocation2 + $0xd4] sm:$0x7]  ;;  %v6237_v40 = vld [vmem:[#allocation2 + $0x48] sm:$0xc] }
 0x23a   : > { %v6239_v13 = vld [vmem:[#allocation2 + $0x50] sm:$0x3]  ;;  %v3254_v6 = vrot.slane %v3121_v11, 7 }
 0x23b   : > { %v14342_v16 = vsel %vm13990_vm8, %v10050_v14, %v3237_v61  ;;  %v6349_v51 = vsel %vm13620_vm2, %v6347_v28, %v6348_v19  ;;  %v14358_v61 = vld [vmem:[#allocation2 + $0x58] sm:$0xf]  ;;  %v10254_v14 = vrot.slane %v6237_v40, 10  ;;  %v6240_v28 = vld [vmem:[#allocation2 + $0x54] sm:$0xc] }
 0x23c   : > { %11500 = vmatpush3.bf16.msra.mxu1 %v12988_v39  ;;  %v3240_v39 = vrot.slane %v3117_v30, 7  ;;  %v6366_v9 = vrot.slane %v14358_v61, 6 }
 0x23d   : > { %11822 = vmatmul.mubr.bf16.gmra.mrb[60].mxu0 %v13759_v35  ;;  %11501 = vmatprep.subr.bf16.mxu1 %v12990_v54  ;;  %v6335_v35 = vsel %vm13620_vm2, %v6333_v59, %v6334_v41  ;;  %v6236_v59 = vld [vmem:[#allocation2 + $0x44] sm:$0x3]  ;;  %v14352_v41 = vld [vmem:[#allocation2 + $0x4c] sm:$0xf] }
 0x23e   : > { %11841 = vmatprep.mubr.bf16.mxu0 %v10264_v20  ;;  %v10266_v47 = vcombine.low %v6332_v38, %v6335_v35  ;;  %v6234_v20 = vld [vmem:[#allocation2 + $0x3c] sm:$0xc]  ;;  %v14346_v1 = vsel %vm13990_vm8, %v3239_v18, %v3240_v39  ;;  %v6359_v30 = vrot.slane %v14352_v41, 6  ;;  %v10052_v38 = vrot.slane %v3120_v4, 11 }
 0x23f   : > { %11470 = vmatmul.mubr.bf16.gmra.mrb[44].mxu1 %v10062_v63  ;;  %v10253_v45 = vrot.slane %v6234_v20, 10  ;;  %v3246_v63 = vrot.slane %v3244_v44, 4  ;;  %v10066_v2 = vcombine.low %v14342_v16, %v14346_v1  ;;  %v3253_v35 = vrot.slane %v3251_v12, 4  ;;  %v3124_v20 = vld [vmem:[#allocation2 + $0xe4] sm:$0x8] }
 0x240   : > { %11473 = vmatprep.mubr.bf16.mxu1 %v10063_v7  ;;  %11502 = vmatpush3.bf16.msra.mxu1 %v12990_v54  ;;  %v6346_v54 = vsel %vm13620_vm2, %v10252_v26, %v6345_v58  ;;  %v6355_v7 = vrot.slane %v6236_v59, 6  ;;  %v10267_v58 = vcombine.low %v6339_v0, %v6342_v42  ;;  %v6361_v39 = vrot.slane %v6359_v30, 4  ;;  %v12989_v26 = vld [vmem:[#allocation7 + $0x2d8] sm:$0xff]   ;;  %v3125_v0 = vld [vmem:[#allocation2 + $0xec] sm:$0x7] }
 0x241   : > { %11503 = vmatprep.subr.bf16.mxu1 %v12991_v22  ;;  %v14364_v57 = vsel %vm13620_vm2, %v10253_v45, %v6352_v33  ;;  %v3248_v17 = vsel %vm13990_vm8, %v3246_v63, %v3247_v5  ;;  %v6362_v18 = vrot.slane %v6239_v13, 6  ;;  %v10053_v33 = vrot.slane %v3122_v46, 11  ;;  %v14380_v42 = vld [vmem:[#allocation2 + $0x4c] sm:$0xf]  ;;  %v6243_v1 = vld [vmem:[#allocation2 + $0x60] sm:$0xc] }
 0x242   : > { %v6356_v50 = vsel %vm13620_vm2, %v6354_v53, %v6355_v7  ;;  %v10067_v19 = vcombine.low %v3245_v32, %v3248_v17  ;;  %v6360_v16 = vsel %vm13620_vm2, %v10254_v14, %v6359_v30  ;;  %v14389_v59 = vld [vmem:[#allocation2 + $0x70] sm:$0xf]  ;;  %v10255_v45 = vrot.slane %v6240_v28, 10  ;;  %v6246_v32 = vld [vmem:[#allocation2 + $0x6c] sm:$0xc] }
 0x243   : > { %v10269_v60 = vcombine.low %v14364_v57, %v6356_v50  ;;  %v6363_v27 = vsel %vm13620_vm2, %v6361_v39, %v6362_v18  ;;  %v10054_v5 = vrot.slane %v3124_v20, 11  ;;  %v3267_v4 = vrot.slane %v3265_v23, 4  ;;  %v12993_v17 = vld [vmem:[#allocation7 + $0x2e8] sm:$0xff]   ;;  %v3596_v18 = vld [vmem:[#allocation2 + $0x54] sm:$0xe] }
 0x244   : > { %11504 = vmatpush3.bf16.msra.mxu1 %v12991_v22  ;;  %v3258_v22 = vrot.slane %v14209_v25, 7  ;;  %v14374_v25 = vld [vmem:[#allocation2 + $0x64] sm:$0xf]  ;;  %v3691_v7 = vrot.slane %v14380_v42, 5  ;;  %v10270_v11 = vcombine.low %v6360_v16, %v6363_v27  ;;  %v10256_v30 = vrot.slane %v6243_v1, 10 }
 0x245   : > { %11842 = vmatmul.mubr.bf16.vlgmr.msra.gmra.mrb[32].mxu0 %v10265_v29  ;;  %11537 = vmatprep.subr.bf16.mxu1 %v14334_v8  ;;  %v6242_v29 = vld [vmem:[#allocation2 + $0x5c] sm:$0x3]  ;;  %v6367_v46 = vsel %vm13620_vm2, %v10255_v45, %v6366_v9  ;;  %v6251_v16 = vld [vmem:[#allocation2 + $0x80] sm:$0x3] }
 0x246   : > { %11874 = vmatpush3.bf16.msra.mxu0 %v14240_v10  ;;  %11845 = vmatprep.mubr.bf16.mxu0 %v10266_v47  ;;  %v10268_v10 = vcombine.low %v6346_v54, %v6349_v51  ;;  %v3260_v44 = vrot.slane %v3258_v22, 4  ;;  %v3261_v47 = vrot.slane %v3123_v43, 7  ;;  %v6373_v54 = vrot.slane %v14374_v25, 6  ;;  %v12992_v51 = vld [vmem:[#allocation7 + $0x2e0] sm:$0xff]  }
 0x247   : > { %11474 = vmatmul.mubr.bf16.gmra.mrb[48].mxu1 %v10064_v36  ;;  %11875 = vmatprep.subr.bf16.mxu0 %v12983_v56  ;;  %v3252_v36 = vsel %vm13990_vm8, %v10052_v38, %v3251_v12  ;;  %v6369_v55 = vrot.slane %v6242_v29, 6  ;;  %v3259_v63 = vsel %vm13990_vm8, %v10053_v33, %v3258_v22  ;;  %v3268_v12 = vrot.slane %v3125_v0, 7  ;;  %v6248_v38 = vld [vmem:[#allocation2 + $0x74] sm:$0x3]  ;;  %v3598_v29 = vld [vmem:[#allocation2 + $0x5c] sm:$0x1] }
 0x248   : > { %11477 = vmatprep.mubr.bf16.mxu1 %v10065_v15  ;;  %v3255_v15 = vsel %vm13990_vm8, %v3253_v35, %v3254_v6  ;;  %v3262_v53 = vsel %vm13990_vm8, %v3260_v44, %v3261_v47  ;;  %v6375_v13 = vrot.slane %v6373_v54, 4  ;;  %v14399_v35 = vld [vmem:[#allocation2 + $0x58] sm:$0xf]  ;;  %v14401_v6 = vld [vmem:[#allocation2 + $0x7c] sm:$0xf]  ;;  %v3693_v14 = vrot.slane %v3691_v7, 4 }
 0x249   : > { %v10068_v40 = vcombine.low %v3252_v36, %v3255_v15  ;;  %v10069_v22 = vcombine.low %v3259_v63, %v3262_v53  ;;  %v6374_v28 = vsel %vm13620_vm2, %v10256_v30, %v6373_v54  ;;  %v14411_v33 = vld [vmem:[#allocation2 + $0x64] sm:$0xf]  ;;  %v10257_v47 = vrot.slane %v6246_v32, 10  ;;  %v6249_v15 = vld [vmem:[#allocation2 + $0x78] sm:$0xc] }
 0x24a   : > { %11876 = vmatpush3.bf16.msra.mxu0 %v12983_v56  ;;  %v6368_v56 = vrot.slane %v6366_v9, 4  ;;  %v3269_v9 = vsel %vm13990_vm8, %v3267_v4, %v3268_v12  ;;  %v3698_v20 = vrot.slane %v14399_v35, 5  ;;  %v10080_v0 = vrot.slane %v3596_v18, 9  ;;  %v14422_v63 = vld [vmem:[#allocation2 + $0x88] sm:$0xf]  ;;  %v12995_v30 = vld [vmem:[#allocation7 + $0x2f8] sm:$0xff]  }
 0x24b   : > { %11877 = vmatprep.subr.bf16.mxu0 %v12986_v48  ;;  %v3701_v54 = vrot.slane %v3598_v29, 5  ;;  %v10258_v4 = vrot.slane %v6249_v15, 10  ;;  %v3602_v18 = vld [vmem:[#allocation2 + $0x6c] sm:$0xe]  ;;  %v6255_v29 = vld [vmem:[#allocation2 + $0x90] sm:$0xc] }
 0x24c   : > { %v6370_v43 = vsel %vm13620_vm2, %v6368_v56, %v6369_v55  ;;  %v6383_v56 = vrot.slane %v6248_v38, 6  ;;  %v3700_v53 = vrot.slane %v3698_v20, 4  ;;  %v6394_v38 = vrot.slane %v14422_v63, 6 }
 0x24d   : > { %11846 = vmatmul.mubr.bf16.gmra.mrb[36].mxu0 %v10267_v58  ;;  %v6380_v58 = vrot.slane %v14389_v59, 6  ;;  %v10271_v36 = vcombine.low %v6367_v46, %v6370_v43  ;;  %v3699_v46 = vsel %vm13741_vm5, %v10080_v0, %v3698_v20 }
 0x24e   : > { %11849 = vmatprep.mubr.bf16.mxu0 %v10268_v10  ;;  %11878 = vmatpush3.bf16.msra.mxu0 %v12986_v48  ;;  %v6245_v48 = vld [vmem:[#allocation2 + $0x68] sm:$0x3]  ;;  %v3595_v10 = vld [vmem:[#allocation2 + $0x50] sm:$0x1]  ;;  %v3702_v43 = vsel %vm13741_vm5, %v3700_v53, %v3701_v54  ;;  %v6396_v15 = vrot.slane %v6394_v38, 4  ;;  %v10082_v54 = vrot.slane %v3602_v18, 9 }
 0x24f   : > { %11478 = vmatmul.mubr.bf16.gmra.mrb[52].mxu1 %v10066_v2  ;;  %11879 = vmatprep.subr.bf16.mxu0 %v12989_v26  ;;  %v3593_v2 = vld [vmem:[#allocation2 + $0x48] sm:$0xe]  ;;  %v6376_v57 = vrot.slane %v6245_v48, 6  ;;  %v3694_v39 = vrot.slane %v3595_v10, 5  ;;  %v3601_v48 = vld [vmem:[#allocation2 + $0x68] sm:$0x1] }
 0x250   : > { %11481 = vmatprep.mubr.bf16.mxu1 %v10067_v19  ;;  %v10079_v50 = vrot.slane %v3593_v2, 9  ;;  %v6382_v19 = vrot.slane %v6380_v58, 4  ;;  %v14426_v10 = vld [vmem:[#allocation2 + $0x94] sm:$0xf]  ;;  %v3708_v32 = vrot.slane %v3601_v48, 5 }
 0x251   : > { %v6377_v44 = vsel %vm13620_vm2, %v6375_v13, %v6376_v57  ;;  %v3695_v1 = vsel %vm13741_vm5, %v3693_v14, %v3694_v39  ;;  %v6254_v39 = vld [vmem:[#allocation2 + $0x8c] sm:$0x3]  ;;  %v14452_v48 = vld [vmem:[#allocation2 + $0xa0] sm:$0xf] }
 0x252   : > { %11880 = vmatpush3.bf16.msra.mxu0 %v12989_v26  ;;  %v3266_v26 = vsel %vm13990_vm8, %v10054_v5, %v3265_v23  ;;  %v6387_v23 = vrot.slane %v14401_v6, 6  ;;  %v3692_v27 = vsel %vm13741_vm5, %v10079_v50, %v3691_v7  ;;  %v10272_v55 = vcombine.low %v6374_v28, %v6377_v44  ;;  %v3599_v5 = vld [vmem:[#allocation2 + $0x60] sm:$0xe]  ;;  %v6257_v44 = vld [vmem:[#allocation2 + $0x98] sm:$0x3] }
 0x253   : > { %11881 = vmatprep.subr.bf16.mxu0 %v12992_v51  ;;  %v10070_v45 = vcombine.low %v3266_v26, %v3269_v9  ;;  %v6381_v7 = vsel %vm13620_vm2, %v10257_v47, %v6380_v58  ;;  %v10095_v2 = vcombine.low %v3692_v27, %v3695_v1  ;;  %v10081_v13 = vrot.slane %v3599_v5, 9  ;;  %v14435_v58 = vld [vmem:[#allocation2 + $0x7c] sm:$0xf]  ;;  %v14444_v9 = vld [vmem:[#allocation7 + $0x300] sm:$0xff]   ;;  %v3605_v27 = vld [vmem:[#allocation2 + $0x78] sm:$0xe] }
 0x254   : > { %v6389_v12 = vrot.slane %v6387_v23, 4  ;;  %v6388_v50 = vsel %vm13620_vm2, %v10258_v4, %v6387_v23  ;;  %v6401_v26 = vrot.slane %v14426_v10, 6  ;;  %v3607_v1 = vld [vmem:[#allocation2 + $0x80] sm:$0x1]  ;;  %v6404_v5 = vrot.slane %v6257_v44, 6 }
 0x255   : > { %11850 = vmatmul.mubr.bf16.gmra.mrb[40].mxu0 %v10269_v60  ;;  %v12994_v60 = vld [vmem:[#allocation7 + $0x2f0] sm:$0xff]   ;;  %v6261_v44 = vld [vmem:[#allocation2 + $0xa8] sm:$0xc] }
 0x256   : > { %11853 = vmatprep.mubr.bf16.mxu0 %v10270_v11  ;;  %11882 = vmatpush3.bf16.msra.mxu0 %v12992_v51  ;;  %v3705_v51 = vrot.slane %v14411_v33, 5  ;;  %v6390_v11 = vrot.slane %v6251_v16, 6  ;;  %v6397_v16 = vrot.slane %v6254_v39, 6 }
 0x257   : > { %11482 = vmatmul.mubr.bf16.gmra.mrb[56].mxu1 %v10068_v40  ;;  %11883 = vmatprep.subr.bf16.mxu0 %v12993_v17  ;;  %v6384_v40 = vsel %vm13620_vm2, %v6382_v19, %v6383_v56  ;;  %v10096_v56 = vcombine.low %v3699_v46, %v3702_v43  ;;  %v6408_v46 = vrot.slane %v14452_v48, 6 }
 0x258   : > { %11485 = vmatprep.mubr.bf16.mxu1 %v10069_v22  ;;  %v3707_v57 = vrot.slane %v3705_v51, 4  ;;  %v6252_v22 = vld [vmem:[#allocation2 + $0x84] sm:$0xc]  ;;  %v6391_v14 = vsel %vm13620_vm2, %v6389_v12, %v6390_v11  ;;  %v10273_v28 = vcombine.low %v6381_v7, %v6384_v40  ;;  %v3706_v20 = vsel %vm13741_vm5, %v10081_v13, %v3705_v51  ;;  %v6258_v12 = vld [vmem:[#allocation2 + $0x9c] sm:$0xc] }
 0x259   : > { %v10259_v47 = vrot.slane %v6252_v22, 10  ;;  %v10274_v0 = vcombine.low %v6388_v50, %v6391_v14  ;;  %v14455_v11 = vld [vmem:[#allocation2 + $0xac] sm:$0xf]  ;;  %v10083_v7 = vrot.slane %v3605_v27, 9  ;;  %v3722_v40 = vrot.slane %v3607_v1, 5 }
 0x25a   : > { %11884 = vmatpush3.bf16.msra.mxu0 %v12993_v17  ;;  %v14430_v17 = vld [vmem:[#allocation2 + $0x70] sm:$0xf]  ;;  %v3709_v23 = vsel %vm13741_vm5, %v3707_v57, %v3708_v32  ;;  %v14457_v13 = vld [vmem:[#allocation2 + $0x88] sm:$0xf]  ;;  %v6398_v32 = vsel %vm13620_vm2, %v6396_v15, %v6397_v16  ;;  %v14464_v22 = vld [vmem:[#allocation2 + $0x94] sm:$0xf] }
 0x25b   : > { %11885 = vmatprep.subr.bf16.mxu0 %v12994_v60  ;;  %v3712_v19 = vrot.slane %v14430_v17, 5  ;;  %v10097_v51 = vcombine.low %v3706_v20, %v3709_v23  ;;  %v6395_v57 = vsel %vm13620_vm2, %v10259_v47, %v6394_v38  ;;  %v6260_v14 = vld [vmem:[#allocation2 + $0xa4] sm:$0x3]  ;;  %v6415_v39 = vrot.slane %v14455_v11, 6  ;;  %v6263_v47 = vld [vmem:[#allocation2 + $0xb0] sm:$0x3] }
 0x25c   : > { %v6410_v16 = vrot.slane %v6408_v46, 4  ;;  %v6411_v27 = vrot.slane %v6260_v14, 6  ;;  %v3611_v1 = vld [vmem:[#allocation2 + $0x90] sm:$0xe] }
 0x25d   : > { %11854 = vmatmul.mubr.bf16.gmra.mrb[44].mxu0 %v10271_v36  ;;  %v3719_v36 = vrot.slane %v14435_v58, 5  ;;  %v3714_v53 = vrot.slane %v3712_v19, 4  ;;  %v3713_v38 = vsel %vm13741_vm5, %v10082_v54, %v3712_v19  ;;  %v3733_v19 = vrot.slane %v14464_v22, 5  ;;  %v3613_v54 = vld [vmem:[#allocation2 + $0x98] sm:$0x1] }
 0x25e   : > { %11857 = vmatprep.mubr.bf16.mxu0 %v10272_v55  ;;  %11886 = vmatpush3.bf16.msra.mxu0 %v12994_v60  ;;  %v3604_v60 = vld [vmem:[#allocation2 + $0x74] sm:$0x1]  ;;  %v6403_v55 = vrot.slane %v6401_v26, 4  ;;  %v6412_v14 = vsel %vm13620_vm2, %v6410_v16, %v6411_v27 }
 0x25f   : > { %11486 = vmatmul.mubr.bf16.gmra.mrb[60].mxu1 %v10070_v45  ;;  %11887 = vmatprep.subr.bf16.mxu0 %v12995_v30  ;;  %v10260_v45 = vrot.slane %v6255_v29, 10  ;;  %v3715_v4 = vrot.slane %v3604_v60, 5  ;;  %v3726_v29 = vrot.slane %v14457_v13, 5  ;;  %v3720_v20 = vsel %vm13741_vm5, %v10083_v7, %v3719_v36  ;;  %v3608_v60 = vld [vmem:[#allocation2 + $0x84] sm:$0xe] }
 0x260   : > { %11505 = vmatprep.mubr.bf16.mxu1 %v10095_v2  ;;  %v3721_v2 = vrot.slane %v3719_v36, 4  ;;  %v6405_v50 = vsel %vm13620_vm2, %v6403_v55, %v6404_v5  ;;  %v6417_v55 = vrot.slane %v6415_v39, 4  ;;  %v6418_v5 = vrot.slane %v6263_v47, 6  ;;  %v6264_v7 = vld [vmem:[#allocation2 + $0xb4] sm:$0xc] }
 0x261   : > { %v6402_v43 = vsel %vm13620_vm2, %v10260_v45, %v6401_v26  ;;  %v3716_v18 = vsel %vm13741_vm5, %v3714_v53, %v3715_v4  ;;  %v10275_v26 = vcombine.low %v6395_v57, %v6398_v32  ;;  %v10084_v53 = vrot.slane %v3608_v60, 9  ;;  %v14484_v32 = vld [vmem:[#allocation2 + $0xa0] sm:$0xf]  ;;  %v6266_v47 = vld [vmem:[#allocation2 + $0xbc] sm:$0x3] }
 0x262   : > { %11888 = vmatpush3.bf16.msra.mxu0 %v12995_v30  ;;  %v13000_v30 = vld [vmem:[#allocation7 + $0x1c8] sm:$0xff]   ;;  %v3723_v23 = vsel %vm13741_vm5, %v3721_v2, %v3722_v40  ;;  %v10276_v15 = vcombine.low %v6402_v43, %v6405_v50  ;;  %v10098_v45 = vcombine.low %v3713_v38, %v3716_v18  ;;  %v3728_v4 = vrot.slane %v3726_v29, 4  ;;  %v13005_v43 = vld [vmem:[#allocation7 + $0x1d8] sm:$0xff]  }
 0x263   : > { %11921 = vmatprep.subr.bf16.mxu0 %v14444_v9  ;;  %v10099_v36 = vcombine.low %v3720_v20, %v3723_v23  ;;  %v10085_v2 = vrot.slane %v3611_v1, 9  ;;  %v3735_v40 = vrot.slane %v3733_v19, 4  ;;  %v3736_v57 = vrot.slane %v3613_v54, 5  ;;  %v14491_v18 = vld [vmem:[#allocation2 + $0xac] sm:$0xf] }
 0x264   : > { %v3740_v20 = vrot.slane %v14484_v32, 5  ;;  %v3747_v16 = vrot.slane %v14491_v18, 5  ;;  %v6425_v54 = vrot.slane %v6266_v47, 6 }
 0x265   : > { %11858 = vmatmul.mubr.bf16.gmra.mrb[48].mxu0 %v10273_v28  ;;  %v10261_v28 = vrot.slane %v6258_v12, 10  ;;  %v3734_v60 = vsel %vm13741_vm5, %v10085_v2, %v3733_v19  ;;  %v13010_v2 = vld [vmem:[#allocation7 + $0x1e8] sm:$0xff]  }
 0x266   : > { %11861 = vmatprep.mubr.bf16.mxu0 %v10274_v0  ;;  %v13004_v0 = vld [vmem:[#allocation7 + $0x1d0] sm:$0xff]  }
 0x267   : > { %11506 = vmatmul.mubr.bf16.vlgmr.msra.gmra.mrb[32].mxu1 %v10096_v56  ;;  %v3610_v56 = vld [vmem:[#allocation2 + $0x8c] sm:$0x1]  ;;  %v6409_v50 = vsel %vm13620_vm2, %v10261_v28, %v6408_v46  ;;  %v10263_v28 = vrot.slane %v6264_v7, 10  ;;  %v14507_v7 = vld [vmem:[#allocation2 + $0xb8] sm:$0xf] }
 0x268   : > { %11509 = vmatprep.mubr.bf16.mxu1 %v10097_v51  ;;  %11538 = vmatpush3.bf16.msra.mxu1 %v14334_v8  ;;  %v10262_v8 = vrot.slane %v6261_v44, 10  ;;  %v14482_v51 = vld [vmem:[#allocation2 + $0xb8] sm:$0xf]  ;;  %v3729_v12 = vrot.slane %v3610_v56, 5  ;;  %v6419_v44 = vsel %vm13620_vm2, %v6417_v55, %v6418_v5  ;;  %v10277_v23 = vcombine.low %v6409_v50, %v6412_v14  ;;  %v3614_v56 = vld [vmem:[#allocation2 + $0x9c] sm:$0xe] }
 0x269   : > { %11539 = vmatprep.subr.bf16.mxu1 %v13000_v30  ;;  %v6422_v38 = vrot.slane %v14482_v51, 6  ;;  %v10086_v5 = vrot.slane %v3614_v56, 9  ;;  %v14513_v50 = vld [vmem:[#allocation2 + $0xc4] sm:$0xf]  ;;  %v6749_v14 = vld [vmem:[#allocation2 + $0x8] sm:$0xf] }
 0x26a   : > { %v3730_v46 = vsel %vm13741_vm5, %v3728_v4, %v3729_v12  ;;  %v3749_v4 = vrot.slane %v3747_v16, 4  ;;  %v3625_v56 = vld [vmem:[#allocation2 + $0xc8] sm:$0x1] }
 0x26b   : > { %v6424_v1 = vrot.slane %v6422_v38, 4 }
 0x26c   : > { %11540 = vmatpush3.bf16.msra.mxu1 %v13000_v30  ;;  %v6416_v30 = vsel %vm13620_vm2, %v10262_v8, %v6415_v39  ;;  %v3737_v39 = vsel %vm13741_vm5, %v3735_v40, %v3736_v57  ;;  %v3619_v8 = vld [vmem:[#allocation2 + $0xb0] sm:$0x1]  ;;  %v6423_v40 = vsel %vm13620_vm2, %v10263_v28, %v6422_v38  ;;  %v3622_v28 = vld [vmem:[#allocation2 + $0xbc] sm:$0x1] }
 0x26d   : > { %11862 = vmatmul.mubr.bf16.gmra.mrb[52].mxu0 %v10275_v26  ;;  %11541 = vmatprep.subr.bf16.mxu1 %v13004_v0  ;;  %v3727_v26 = vsel %vm13741_vm5, %v10084_v53, %v3726_v29  ;;  %v13009_v29 = vld [vmem:[#allocation7 + $0x1e0] sm:$0xff]   ;;  %v10278_v27 = vcombine.low %v6416_v30, %v6419_v44  ;;  %v3750_v12 = vrot.slane %v3619_v8, 5  ;;  %v6426_v57 = vsel %vm13620_vm2, %v6424_v1, %v6425_v54 }
 0x26e   : > { %11865 = vmatprep.mubr.bf16.mxu0 %v10276_v15  ;;  %v3616_v15 = vld [vmem:[#allocation2 + $0xa4] sm:$0x1]  ;;  %v10100_v55 = vcombine.low %v3727_v26, %v3730_v46  ;;  %v3754_v44 = vrot.slane %v14507_v7, 5  ;;  %v10279_v47 = vcombine.low %v6423_v40, %v6426_v57  ;;  %v3620_v46 = vld [vmem:[#allocation2 + $0xb4] sm:$0xe]  ;;  %v3757_v54 = vrot.slane %v3622_v28, 5 }
 0x26f   : > { %11510 = vmatmul.mubr.bf16.gmra.mrb[36].mxu1 %v10098_v45  ;;  %v3617_v45 = vld [vmem:[#allocation2 + $0xa8] sm:$0xe]  ;;  %v3743_v53 = vrot.slane %v3616_v15, 5  ;;  %v3751_v26 = vsel %vm13741_vm5, %v3749_v4, %v3750_v12  ;;  %v3764_v8 = vrot.slane %v3625_v56, 5  ;;  %v3626_v57 = vld [vmem:[#allocation2 + $0xcc] sm:$0xe] }
 0x270   : > { %11513 = vmatprep.mubr.bf16.mxu1 %v10099_v36  ;;  %11542 = vmatpush3.bf16.msra.mxu1 %v13004_v0  ;;  %v10101_v0 = vcombine.low %v3734_v60, %v3737_v39  ;;  %v3742_v36 = vrot.slane %v3740_v20, 4  ;;  %v10087_v19 = vrot.slane %v3617_v45, 9  ;;  %v13014_v60 = vld [vmem:[#allocation7 + $0x1f0] sm:$0xff]   ;;  %v3623_v39 = vld [vmem:[#allocation2 + $0xc0] sm:$0xe]  ;;  %v3756_v1 = vrot.slane %v3754_v44, 4 }
 0x271   : > { %11543 = vmatprep.subr.bf16.mxu1 %v13005_v43  ;;  %v10090_v28 = vrot.slane %v3626_v57, 9 }
 0x272   : > { %v3744_v30 = vsel %vm13741_vm5, %v3742_v36, %v3743_v53  ;;  %v3748_v38 = vsel %vm13741_vm5, %v10087_v19, %v3747_v16  ;;  %v10089_v16 = vrot.slane %v3623_v39, 9  ;;  %v14528_v36 = vld [vmem:[#allocation2 + $0xdc] sm:$0xf]  ;;  %v3758_v19 = vsel %vm13741_vm5, %v3756_v1, %v3757_v54  ;;  %v13007_v1 = vld [vmem:[#allocation7 + $0x310] sm:$0xff]  }
 0x274   : > { %11544 = vmatpush3.bf16.msra.mxu1 %v13005_v43  ;;  %v3741_v43 = vsel %vm13741_vm5, %v10086_v5, %v3740_v20  ;;  %v10288_v20 = vcombine.low %v14266_v24, %v6749_v14  ;;  %v6750_v5 = vld [vmem:[#allocation2 + $0x14] sm:$0xf]  ;;  %v6751_v24 = vld [vmem:[#allocation2 + $0x20] sm:$0xf] }
 0x275   : > { %11866 = vmatmul.mubr.bf16.gmra.mrb[56].mxu0 %v10277_v23  ;;  %11545 = vmatprep.subr.bf16.mxu1 %v13009_v29  ;;  %v3761_v23 = vrot.slane %v14513_v50, 5  ;;  %v10102_v15 = vcombine.low %v3741_v43, %v3744_v30  ;;  %v10289_v12 = vcombine.low %v14278_v52, %v6750_v5  ;;  %v3628_v14 = vld [vmem:[#allocation2 + $0xd4] sm:$0x1]  ;;  %v3775_v43 = vrot.slane %v14528_v36, 5  ;;  %v14541_v30 = vld [vmem:[#allocation7 + $0x200] sm:$0xff]  }
 0x276   : > { %11869 = vmatprep.mubr.bf16.mxu0 %v10278_v27  ;;  %v10103_v27 = vcombine.low %v3748_v38, %v3751_v26  ;;  %v3631_v38 = vld [vmem:[#allocation2 + $0xe0] sm:$0x1]  ;;  %v3632_v5 = vld [vmem:[#allocation2 + $0xe4] sm:$0xe] }
 0x277   : > { %11514 = vmatmul.mubr.bf16.gmra.mrb[40].mxu1 %v10100_v55  ;;  %v3763_v45 = vrot.slane %v3761_v23, 4  ;;  %v14526_v55 = vld [vmem:[#allocation2 + $0xd0] sm:$0xf]  ;;  %v3777_v39 = vrot.slane %v3775_v43, 4  ;;  %v3778_v56 = vrot.slane %v3631_v38, 5 }
 0x278   : > { %11517 = vmatprep.mubr.bf16.mxu1 %v10101_v0  ;;  %11546 = vmatpush3.bf16.msra.mxu1 %v13009_v29  ;;  %v10088_v29 = vrot.slane %v3620_v46, 9  ;;  %v13015_v0 = vld [vmem:[#allocation7 + $0x1f8] sm:$0xff]   ;;  %v3768_v4 = vrot.slane %v14526_v55, 5  ;;  %v13002_v46 = vld [vmem:[#allocation7 + $0x308] sm:$0xff]  }
 0x279   : > { %11547 = vmatprep.subr.bf16.mxu1 %v13010_v2  ;;  %v3765_v40 = vsel %vm13741_vm5, %v3763_v45, %v3764_v8 }
 0x27a   : > { %v3755_v53 = vsel %vm13741_vm5, %v10088_v29, %v3754_v44  ;;  %v10290_v44 = vcombine.low %v14284_v62, %v6751_v24  ;;  %v6752_v62 = vld [vmem:[#allocation2 + $0x2c] sm:$0xf]  ;;  %v6753_v29 = vld [vmem:[#allocation2 + $0x38] sm:$0xf]  ;;  %v3769_v54 = vsel %vm13741_vm5, %v10090_v28, %v3768_v4 }
 0x27b   : > { %v10104_v26 = vcombine.low %v3755_v53, %v3758_v19  ;;  %v10291_v8 = vcombine.low %v14296_v37, %v6752_v62  ;;  %v3634_v24 = vld [vmem:[#allocation2 + $0xec] sm:$0x1]  ;;  %v10292_v19 = vcombine.low %v14308_v34, %v6753_v29  ;;  %v10092_v37 = vrot.slane %v3632_v5, 9  ;;  %v6755_v34 = vld [vmem:[#allocation2 + $0x50] sm:$0xf] }
 0x27c   : > { %11548 = vmatpush3.bf16.msra.mxu1 %v13010_v2  ;;  %v3762_v2 = vsel %vm13741_vm5, %v10089_v16, %v3761_v23  ;;  %v3771_v23 = vrot.slane %v3628_v14, 5  ;;  %v3638_v62 = vld [vmem:[#allocation2 + $0xfc] sm:$0xe]  ;;  %v3640_v29 = vld [vmem:[#allocation2 + $0x104] sm:$0x1] }
 0x27d   : > { %11870 = vmatmul.mubr.bf16.gmra.mrb[60].mxu0 %v10279_v47  ;;  %11549 = vmatprep.subr.bf16.mxu1 %v13014_v60  ;;  %v3629_v47 = vld [vmem:[#allocation2 + $0xd8] sm:$0xe]  ;;  %v10105_v52 = vcombine.low %v3762_v2, %v3765_v40 }
 0x27e   : > { %11889 = vmatprep.mubr.bf16.mxu0 %v10288_v20  ;;  %v10091_v20 = vrot.slane %v3629_v47, 9  ;;  %v13012_v40 = vld [vmem:[#allocation7 + $0x318] sm:$0xff]  }
 0x27f   : > { %11518 = vmatmul.mubr.bf16.gmra.mrb[44].mxu1 %v10102_v15  ;;  %v14544_v15 = vld [vmem:[#allocation2 + $0xe8] sm:$0xf] }
 0x280   : > { %11521 = vmatprep.mubr.bf16.mxu1 %v10103_v27  ;;  %11550 = vmatpush3.bf16.msra.mxu1 %v13014_v60  ;;  %v3770_v60 = vrot.slane %v3768_v4, 4  ;;  %v14548_v27 = vld [vmem:[#allocation2 + $0xf4] sm:$0xf]  ;;  %v3782_v45 = vrot.slane %v14544_v15, 5  ;;  %v3635_v4 = vld [vmem:[#allocation2 + $0xf0] sm:$0xe] }
 0x281   : > { %11551 = vmatprep.subr.bf16.mxu1 %v13015_v0  ;;  %v3789_v53 = vrot.slane %v14548_v27, 5 }
 0x282   : > { %v3772_v16 = vsel %vm13741_vm5, %v3770_v60, %v3771_v23  ;;  %v3784_v14 = vrot.slane %v3782_v45, 4  ;;  %v3783_v28 = vsel %vm13741_vm5, %v10092_v37, %v3782_v45  ;;  %v4124_v45 = vld [vmem:[#allocation2 + $0x50] sm:$0x3] }
 0x283   : > { %v10106_v2 = vcombine.low %v3769_v54, %v3772_v16  ;;  %v3791_v47 = vrot.slane %v3789_v53, 4  ;;  %v10294_v54 = vcombine.low %v14352_v41, %v6755_v34  ;;  %v4123_v16 = vld [vmem:[#allocation2 + $0x48] sm:$0xc]  ;;  %v13023_v41 = vld [vmem:[#allocation7 + $0x330] sm:$0xff]   ;;  %v4127_v34 = vld [vmem:[#allocation2 + $0x60] sm:$0xc] }
 0x284   : > { %11552 = vmatpush3.bf16.msra.mxu1 %v13015_v0  ;;  %v3779_v0 = vsel %vm13741_vm5, %v3777_v39, %v3778_v56 }
 0x285   : > { %11890 = vmatmul.mubr.bf16.vlgmr.msra.gmra.mrb[32].mxu0 %v10289_v12  ;;  %11585 = vmatprep.subr.bf16.mxu1 %v14541_v30  ;;  %v3637_v12 = vld [vmem:[#allocation2 + $0xf8] sm:$0x1] }
 0x286   : > { %11922 = vmatpush3.bf16.msra.mxu0 %v14444_v9  ;;  %11893 = vmatprep.mubr.bf16.mxu0 %v10290_v44  ;;  %v3776_v9 = vsel %vm13741_vm5, %v10091_v20, %v3775_v43  ;;  %v3785_v44 = vrot.slane %v3634_v24, 5  ;;  %v10093_v43 = vrot.slane %v3635_v4, 9  ;;  %v3792_v38 = vrot.slane %v3637_v12, 5  ;;  %v6756_v12 = vld [vmem:[#allocation2 + $0x5c] sm:$0xf] }
 0x287   : > { %11522 = vmatmul.mubr.bf16.gmra.mrb[48].mxu1 %v10104_v26  ;;  %11923 = vmatprep.subr.bf16.mxu0 %v13002_v46  ;;  %v10107_v57 = vcombine.low %v3776_v9, %v3779_v0  ;;  %v14562_v26 = vld [vmem:[#allocation2 + $0x100] sm:$0xf]  ;;  %v13020_v9 = vld [vmem:[#allocation7 + $0x328] sm:$0xff]   ;;  %v3799_v24 = vrot.slane %v3640_v29, 5  ;;  %v4192_v4 = vrot.slane %v4124_v45, 6  ;;  %v10295_v37 = vcombine.low %v14358_v61, %v6756_v12 }
 0x288   : > { %11525 = vmatprep.mubr.bf16.mxu1 %v10105_v52  ;;  %v6754_v52 = vld [vmem:[#allocation2 + $0x44] sm:$0xf]  ;;  %v3786_v60 = vsel %vm13741_vm5, %v3784_v14, %v3785_v44  ;;  %v3796_v23 = vrot.slane %v14562_v26, 5  ;;  %v3790_v39 = vsel %vm13741_vm5, %v10093_v43, %v3789_v53  ;;  %v3793_v56 = vsel %vm13741_vm5, %v3791_v47, %v3792_v38  ;;  %v4125_v43 = vld [vmem:[#allocation2 + $0x54] sm:$0xc] }
 0x289   : > { %v10293_v20 = vcombine.low %v14326_v31, %v6754_v52  ;;  %v10109_v0 = vcombine.low %v3790_v39, %v3793_v56  ;;  %v10094_v31 = vrot.slane %v3638_v62, 9  ;;  %v10119_v53 = vrot.slane %v4123_v16, 10  ;;  %v4126_v47 = vld [vmem:[#allocation2 + $0x5c] sm:$0x3]  ;;  %v6758_v62 = vld [vmem:[#allocation2 + $0x74] sm:$0xf] }
 0x28a   : > { %11924 = vmatpush3.bf16.msra.mxu0 %v13002_v46  ;;  %v13017_v46 = vld [vmem:[#allocation7 + $0x320] sm:$0xff]   ;;  %v3798_v5 = vrot.slane %v3796_v23, 4  ;;  %v4203_v38 = vrot.slane %v14411_v33, 6  ;;  %v10120_v61 = vrot.slane %v4125_v43, 10  ;;  %v4206_v56 = vrot.slane %v4128_v21, 6  ;;  %v13036_v21 = vld [vmem:[#allocation7 + $0x210] sm:$0xff]  }
 0x28b   : > { %11925 = vmatprep.subr.bf16.mxu0 %v13007_v1  ;;  %v6759_v33 = vld [vmem:[#allocation2 + $0x80] sm:$0xf]  ;;  %v10297_v16 = vcombine.low %v14389_v59, %v6758_v62  ;;  %v6763_v62 = vld [vmem:[#allocation2 + $0xb0] sm:$0xf] }
 0x28c   : > { %v4205_v39 = vrot.slane %v4203_v38, 4 }
 0x28d   : > { %11894 = vmatmul.mubr.bf16.gmra.mrb[36].mxu0 %v10291_v8  ;;  %v10108_v8 = vcombine.low %v3783_v28, %v3786_v60 }
 0x28e   : > { %11897 = vmatprep.mubr.bf16.mxu0 %v10292_v19  ;;  %11926 = vmatpush3.bf16.msra.mxu0 %v13007_v1  ;;  %v4189_v1 = vrot.slane %v14380_v42, 6  ;;  %v6757_v42 = vld [vmem:[#allocation2 + $0x68] sm:$0xf] }
 0x28f   : > { %11526 = vmatmul.mubr.bf16.gmra.mrb[52].mxu1 %v10106_v2  ;;  %11927 = vmatprep.subr.bf16.mxu0 %v13012_v40  ;;  %v3797_v2 = vsel %vm13741_vm5, %v10094_v31, %v3796_v23  ;;  %v10296_v52 = vcombine.low %v14374_v25, %v6757_v42  ;;  %v4199_v23 = vrot.slane %v4126_v47, 6  ;;  %v14588_v25 = vld [vmem:[#allocation7 + $0x380] sm:$0xff]   ;;  %v4217_v31 = vrot.slane %v14435_v58, 6  ;;  %v6761_v58 = vld [vmem:[#allocation2 + $0x98] sm:$0xf] }
 0x290   : > { %11529 = vmatprep.mubr.bf16.mxu1 %v10107_v57  ;;  %v4191_v19 = vrot.slane %v4189_v1, 4  ;;  %v4196_v57 = vrot.slane %v14399_v35, 6  ;;  %v4190_v14 = vsel %vm13620_vm2, %v10119_v53, %v4189_v1  ;;  %v13026_v35 = vld [vmem:[#allocation7 + $0x338] sm:$0xff]   ;;  %v4132_v53 = vld [vmem:[#allocation2 + $0x80] sm:$0x3] }
 0x292   : > { %11928 = vmatpush3.bf16.msra.mxu0 %v13012_v40  ;;  %v3800_v40 = vsel %vm13741_vm5, %v3798_v5, %v3799_v24  ;;  %v4193_v44 = vsel %vm13620_vm2, %v4191_v19, %v4192_v4  ;;  %v4198_v60 = vrot.slane %v4196_v57, 4  ;;  %v4197_v29 = vsel %vm13620_vm2, %v10120_v61, %v4196_v57  ;;  %v4131_v24 = vld [vmem:[#allocation2 + $0x78] sm:$0xc]  ;;  %v6760_v57 = vld [vmem:[#allocation2 + $0x8c] sm:$0xf] }
 0x293   : > { %11929 = vmatprep.subr.bf16.mxu0 %v13017_v46  ;;  %v10135_v28 = vcombine.low %v4190_v14, %v4193_v44  ;;  %v10298_v5 = vcombine.low %v14401_v6, %v6759_v33  ;;  %v10123_v42 = vrot.slane %v4131_v24, 10  ;;  %v4224_v14 = vrot.slane %v14457_v13, 6  ;;  %v4136_v13 = vld [vmem:[#allocation2 + $0x98] sm:$0x3]  ;;  %v4140_v24 = vld [vmem:[#allocation2 + $0xb0] sm:$0x3] }
 0x294   : > { %v4200_v1 = vsel %vm13620_vm2, %v4198_v60, %v4199_v23  ;;  %v10299_v44 = vcombine.low %v14422_v63, %v6760_v57 }
 0x295   : > { %11898 = vmatmul.mubr.bf16.gmra.mrb[40].mxu0 %v10293_v20  ;;  %v10121_v20 = vrot.slane %v4127_v34, 10  ;;  %v10136_v19 = vcombine.low %v4197_v29, %v4200_v1  ;;  %v4218_v43 = vsel %vm13620_vm2, %v10123_v42, %v4217_v31  ;;  %v4231_v34 = vrot.slane %v14464_v22, 6  ;;  %v6762_v22 = vld [vmem:[#allocation2 + $0xa4] sm:$0xf]  ;;  %v13042_v42 = vld [vmem:[#allocation7 + $0x228] sm:$0xff]  }
 0x296   : > { %11901 = vmatprep.mubr.bf16.mxu0 %v10294_v54  ;;  %11930 = vmatpush3.bf16.msra.mxu0 %v13017_v46  ;;  %v10110_v46 = vcombine.low %v3797_v2, %v3800_v40  ;;  %v4210_v54 = vrot.slane %v14430_v17, 6  ;;  %v4220_v2 = vrot.slane %v4132_v53, 6  ;;  %v13032_v40 = vld [vmem:[#allocation7 + $0x208] sm:$0xff]   ;;  %v4226_v63 = vrot.slane %v4224_v14, 4 }
 0x297   : > { %11530 = vmatmul.mubr.bf16.gmra.mrb[56].mxu1 %v10108_v8  ;;  %11931 = vmatprep.subr.bf16.mxu0 %v13020_v9  ;;  %v4204_v45 = vsel %vm13620_vm2, %v10121_v20, %v4203_v38  ;;  %v4207_v8 = vsel %vm13620_vm2, %v4205_v39, %v4206_v56  ;;  %v4133_v38 = vld [vmem:[#allocation2 + $0x84] sm:$0xc]  ;;  %v4233_v20 = vrot.slane %v4231_v34, 4  ;;  %v4234_v39 = vrot.slane %v4136_v13, 6  ;;  %v13037_v56 = vld [vmem:[#allocation7 + $0x218] sm:$0xff]  }
 0x298   : > { %11533 = vmatprep.mubr.bf16.mxu1 %v10109_v0  ;;  %v4130_v0 = vld [vmem:[#allocation2 + $0x74] sm:$0x3]  ;;  %v10137_v17 = vcombine.low %v4204_v45, %v4207_v8  ;;  %v4212_v4 = vrot.slane %v4210_v54, 4  ;;  %v10124_v61 = vrot.slane %v4133_v38, 10  ;;  %v4238_v29 = vrot.slane %v14484_v32, 6 }
 0x299   : > { %v4213_v12 = vrot.slane %v4130_v0, 6  ;;  %v10301_v1 = vcombine.low %v14452_v48, %v6762_v22  ;;  %v4137_v45 = vld [vmem:[#allocation2 + $0x9c] sm:$0xc]  ;;  %v4138_v8 = vld [vmem:[#allocation2 + $0xa4] sm:$0x3] }
 0x29a   : > { %11932 = vmatpush3.bf16.msra.mxu0 %v13020_v9  ;;  %v4129_v9 = vld [vmem:[#allocation2 + $0x6c] sm:$0xc]  ;;  %v13041_v0 = vld [vmem:[#allocation7 + $0x220] sm:$0xff]   ;;  %v4240_v48 = vrot.slane %v4238_v29, 4  ;;  %v4144_v38 = vld [vmem:[#allocation2 + $0xc8] sm:$0x3] }
 0x29b   : > { %11933 = vmatprep.subr.bf16.mxu0 %v13023_v41  ;;  %v10122_v59 = vrot.slane %v4129_v9, 10  ;;  %v4245_v9 = vrot.slane %v14491_v18, 6  ;;  %v6764_v18 = vld [vmem:[#allocation2 + $0xbc] sm:$0xf]  ;;  %v4146_v22 = vld [vmem:[#allocation2 + $0xd4] sm:$0x3] }
 0x29d   : > { %11902 = vmatmul.mubr.bf16.gmra.mrb[44].mxu0 %v10295_v37  ;;  %v4211_v6 = vsel %vm13620_vm2, %v10122_v59, %v4210_v54  ;;  %v4214_v37 = vsel %vm13620_vm2, %v4212_v4, %v4213_v12  ;;  %v4247_v4 = vrot.slane %v4245_v9, 4  ;;  %v4248_v12 = vrot.slane %v4140_v24, 6  ;;  %v13039_v24 = vld [vmem:[#allocation7 + $0x390] sm:$0xff]  }
 0x29e   : > { %11905 = vmatprep.mubr.bf16.mxu0 %v10296_v52  ;;  %11934 = vmatpush3.bf16.msra.mxu0 %v13023_v41  ;;  %v4219_v41 = vrot.slane %v4217_v31, 4  ;;  %v4134_v52 = vld [vmem:[#allocation2 + $0x8c] sm:$0x3]  ;;  %v10302_v31 = vcombine.low %v14455_v11, %v6763_v62  ;;  %v4273_v62 = vrot.slane %v14528_v36, 6 }
 0x29f   : > { %11534 = vmatmul.mubr.bf16.gmra.mrb[60].mxu1 %v10110_v46  ;;  %11935 = vmatprep.subr.bf16.mxu0 %v13026_v35  ;;  %v10300_v46 = vcombine.low %v14426_v10, %v6761_v58  ;;  %v4227_v60 = vrot.slane %v4134_v52, 6  ;;  %v4225_v10 = vsel %vm13620_vm2, %v10124_v61, %v4224_v14  ;;  %v4249_v58 = vsel %vm13620_vm2, %v4247_v4, %v4248_v12  ;;  %v4150_v4 = vld [vmem:[#allocation2 + $0xec] sm:$0x3] }
 0x2a0   : > { %11553 = vmatprep.mubr.bf16.mxu1 %v10135_v28  ;;  %v4221_v47 = vsel %vm13620_vm2, %v4219_v41, %v4220_v2  ;;  %v10138_v28 = vcombine.low %v4211_v6, %v4214_v37  ;;  %v4252_v2 = vrot.slane %v14507_v7, 6  ;;  %v4141_v6 = vld [vmem:[#allocation2 + $0xb4] sm:$0xc]  ;;  %v4142_v37 = vld [vmem:[#allocation2 + $0xbc] sm:$0x3]  ;;  %v4259_v14 = vrot.slane %v14513_v50, 6 }
 0x2a1   : > { %v4228_v33 = vsel %vm13620_vm2, %v4226_v63, %v4227_v60  ;;  %v4266_v60 = vrot.slane %v14526_v55, 6  ;;  %v4287_v12 = vrot.slane %v14548_v27, 6 }
 0x2a2   : > { %11936 = vmatpush3.bf16.msra.mxu0 %v13026_v35  ;;  %v4135_v35 = vld [vmem:[#allocation2 + $0x90] sm:$0xc]  ;;  %v10140_v32 = vcombine.low %v4225_v10, %v4228_v33  ;;  %v4261_v13 = vrot.slane %v4259_v14, 4  ;;  %v13033_v10 = vld [vmem:[#allocation2 + $0x48] sm:$0xff]   ;;  %v4147_v33 = vld [vmem:[#allocation2 + $0xd8] sm:$0xc] }
 0x2a3   : > { %11969 = vmatprep.subr.bf16.mxu0 %v14588_v25  ;;  %v10125_v23 = vrot.slane %v4135_v35, 10 }
 0x2a5   : > { %11906 = vmatmul.mubr.bf16.gmra.mrb[48].mxu0 %v10297_v16  ;;  %v4232_v54 = vsel %vm13620_vm2, %v10125_v23, %v4231_v34  ;;  %v4235_v16 = vsel %vm13620_vm2, %v4233_v20, %v4234_v39  ;;  %v13030_v23 = vld [vmem:[#allocation2 + $0x3c] sm:$0xff]  }
 0x2a6   : > { %11909 = vmatprep.mubr.bf16.mxu0 %v10298_v5  ;;  %v4139_v5 = vld [vmem:[#allocation2 + $0xa8] sm:$0xc]  ;;  %v10141_v53 = vcombine.low %v4232_v54, %v4235_v16 }
 0x2a7   : > { %11554 = vmatmul.mubr.bf16.vlgmr.msra.gmra.mrb[32].mxu1 %v10136_v19  ;;  %v10126_v19 = vrot.slane %v4137_v45, 10  ;;  %v10127_v59 = vrot.slane %v4139_v5, 10  ;;  %v13034_v54 = vld [vmem:[#allocation7 + $0x388] sm:$0xff]  }
 0x2a8   : > { %11557 = vmatprep.mubr.bf16.mxu1 %v10137_v17  ;;  %11586 = vmatpush3.bf16.msra.mxu1 %v14541_v30  ;;  %v10139_v30 = vcombine.low %v4218_v43, %v4221_v47  ;;  %v4241_v17 = vrot.slane %v4138_v8, 6  ;;  %v13028_v43 = vld [vmem:[#allocation2 + $0x30] sm:$0xff]   ;;  %v4143_v47 = vld [vmem:[#allocation2 + $0xc0] sm:$0xc]  ;;  %v4268_v8 = vrot.slane %v4266_v60, 4 }
 0x2a9   : > { %11587 = vmatprep.subr.bf16.mxu1 %v13032_v40  ;;  %v4239_v11 = vsel %vm13620_vm2, %v10126_v19, %v4238_v29  ;;  %v4246_v57 = vsel %vm13620_vm2, %v10127_v59, %v4245_v9  ;;  %v10129_v35 = vrot.slane %v4143_v47, 10  ;;  %v4148_v29 = vld [vmem:[#allocation2 + $0xe0] sm:$0x3]  ;;  %v4269_v9 = vrot.slane %v4146_v22, 6  ;;  %v4149_v59 = vld [vmem:[#allocation2 + $0xe4] sm:$0xc] }
 0x2aa   : > { %v4242_v41 = vsel %vm13620_vm2, %v4240_v48, %v4241_v17  ;;  %v10143_v34 = vcombine.low %v4246_v57, %v4249_v58  ;;  %v4276_v5 = vrot.slane %v4148_v29, 6  ;;  %v4280_v19 = vrot.slane %v14544_v15, 6  ;;  %v13035_v48 = vld [vmem:[#allocation2 + $0x54] sm:$0xff]  }
 0x2ab   : > { %v10142_v52 = vcombine.low %v4239_v11, %v4242_v41  ;;  %v4260_v20 = vsel %vm13620_vm2, %v10129_v35, %v4259_v14  ;;  %v4152_v11 = vld [vmem:[#allocation2 + $0xf8] sm:$0x3]  ;;  %v10132_v57 = vrot.slane %v4149_v59, 10  ;;  %v4289_v14 = vrot.slane %v4287_v12, 4  ;;  %v4154_v35 = vld [vmem:[#allocation2 + $0x104] sm:$0x3] }
 0x2ac   : > { %11588 = vmatpush3.bf16.msra.mxu1 %v13032_v40  ;;  %v10303_v40 = vcombine.low %v14482_v51, %v6764_v18  ;;  %v4255_v51 = vrot.slane %v4142_v37, 6  ;;  %v4151_v18 = vld [vmem:[#allocation2 + $0xf0] sm:$0xc]  ;;  %v4282_v58 = vrot.slane %v4280_v19, 4  ;;  %v4297_v22 = vrot.slane %v4154_v35, 6 }
 0x2ad   : > { %11910 = vmatmul.mubr.bf16.gmra.mrb[52].mxu0 %v10299_v44  ;;  %11589 = vmatprep.subr.bf16.mxu1 %v13036_v21  ;;  %v13046_v44 = vld [vmem:[#allocation7 + $0x230] sm:$0xff]   ;;  %v10133_v37 = vrot.slane %v4151_v18, 10  ;;  %v4281_v47 = vsel %vm13620_vm2, %v10132_v57, %v4280_v19  ;;  %v4625_v19 = vld [vmem:[#allocation2 + $0x60] sm:$0x8] }
 0x2ae   : > { %11913 = vmatprep.mubr.bf16.mxu0 %v10300_v46  ;;  %v4254_v46 = vrot.slane %v4252_v2, 4  ;;  %v13055_v29 = vld [vmem:[#allocation7 + $0x3b0] sm:$0xff]   ;;  %v10161_v18 = vrot.slane %v4625_v19, 11 }
 0x2af   : > { %11558 = vmatmul.mubr.bf16.gmra.mrb[36].mxu1 %v10138_v28  ;;  %v4262_v28 = vrot.slane %v4144_v38, 6 }
 0x2b0   : > { %11561 = vmatprep.mubr.bf16.mxu1 %v10139_v30  ;;  %11590 = vmatpush3.bf16.msra.mxu1 %v13036_v21  ;;  %v10128_v21 = vrot.slane %v4141_v6, 10  ;;  %v13047_v30 = vld [vmem:[#allocation7 + $0x238] sm:$0xff]   ;;  %v4256_v63 = vsel %vm13620_vm2, %v4254_v46, %v4255_v51  ;;  %v4283_v6 = vrot.slane %v4150_v4, 6 }
 0x2b1   : > { %11591 = vmatprep.subr.bf16.mxu1 %v13037_v56  ;;  %v4263_v39 = vsel %vm13620_vm2, %v4261_v13, %v4262_v28  ;;  %v4153_v51 = vld [vmem:[#allocation2 + $0xfc] sm:$0xc]  ;;  %v13180_v13 = vld [vmem:[#allocation2 + $0x4c] sm:$0xf] }
 0x2b2   : > { %v4253_v61 = vsel %vm13620_vm2, %v10128_v21, %v4252_v2  ;;  %v10145_v16 = vcombine.low %v4260_v20, %v4263_v39  ;;  %v13044_v2 = vld [vmem:[#allocation7 + $0x398] sm:$0xff]   ;;  %v4284_v38 = vsel %vm13620_vm2, %v4282_v58, %v4283_v6  ;;  %v4288_v21 = vsel %vm13620_vm2, %v10133_v37, %v4287_v12  ;;  %v13183_v58 = vld [vmem:[#allocation2 + $0x70] sm:$0xf] }
 0x2b3   : > { %v4687_v28 = vrot.slane %v13180_v13, 7  ;;  %v10134_v39 = vrot.slane %v4153_v51, 10  ;;  %v4708_v6 = vrot.slane %v13183_v58, 7  ;;  %v13050_v37 = vld [vmem:[#allocation2 + $0x9c] sm:$0xff]   ;;  %v4637_v58 = vld [vmem:[#allocation2 + $0xa8] sm:$0x8] }
 0x2b4   : > { %11592 = vmatpush3.bf16.msra.mxu1 %v13037_v56  ;;  %v4145_v56 = vld [vmem:[#allocation2 + $0xcc] sm:$0xc] }
 0x2b5   : > { %11914 = vmatmul.mubr.bf16.gmra.mrb[56].mxu0 %v10301_v1  ;;  %11593 = vmatprep.subr.bf16.mxu1 %v13041_v0  ;;  %v10144_v1 = vcombine.low %v4253_v61, %v4256_v63  ;;  %v10130_v45 = vrot.slane %v4145_v56, 10  ;;  %v4621_v61 = vld [vmem:[#allocation2 + $0x48] sm:$0x8]  ;;  %v4622_v63 = vld [vmem:[#allocation2 + $0x50] sm:$0x7] }
 0x2b6   : > { %11917 = vmatprep.mubr.bf16.mxu0 %v10302_v31  ;;  %v4275_v31 = vrot.slane %v4273_v62, 4 }
 0x2b7   : > { %11562 = vmatmul.mubr.bf16.gmra.mrb[40].mxu1 %v10140_v32  ;;  %v4267_v32 = vsel %vm13620_vm2, %v10130_v45, %v4266_v60  ;;  %v10148_v60 = vcombine.low %v4281_v47, %v4284_v38  ;;  %v4628_v47 = vld [vmem:[#allocation2 + $0x74] sm:$0x7]  ;;  %v13184_v38 = vld [vmem:[#allocation2 + $0x7c] sm:$0xf] }
 0x2b8   : > { %11565 = vmatprep.mubr.bf16.mxu1 %v10141_v53  ;;  %11594 = vmatpush3.bf16.msra.mxu1 %v13041_v0  ;;  %v10131_v0 = vrot.slane %v4147_v33, 10  ;;  %v4270_v53 = vsel %vm13620_vm2, %v4268_v8, %v4269_v9  ;;  %v4690_v33 = vrot.slane %v4622_v63, 7  ;;  %v13045_v8 = vld [vmem:[#allocation2 + $0x84] sm:$0xff]  }
 0x2b9   : > { %11595 = vmatprep.subr.bf16.mxu1 %v13042_v42  ;;  %v10146_v41 = vcombine.low %v4267_v32, %v4270_v53  ;;  %v13048_v53 = vld [vmem:[#allocation2 + $0x90] sm:$0xff]  }
 0x2ba   : > { %v4274_v17 = vsel %vm13620_vm2, %v10131_v0, %v4273_v62  ;;  %v10159_v62 = vrot.slane %v4621_v61, 11 }
 0x2bc   : > { %11596 = vmatpush3.bf16.msra.mxu1 %v13042_v42  ;;  %v13038_v42 = vld [vmem:[#allocation2 + $0x60] sm:$0xff]   ;;  %v4688_v9 = vsel %vm13990_vm8, %v10159_v62, %v4687_v28 }
 0x2bd   : > { %11918 = vmatmul.mubr.bf16.gmra.mrb[60].mxu0 %v10303_v40  ;;  %11597 = vmatprep.subr.bf16.mxu1 %v13046_v44 }
 0x2be   : > { %11937 = vmatprep.mubr.bf16.mxu0 %v13028_v43  ;;  %v13049_v43 = vld [vmem:[#allocation7 + $0x3a0] sm:$0xff]  }
 0x2bf   : > { %11566 = vmatmul.mubr.bf16.gmra.mrb[44].mxu1 %v10142_v52  ;;  %v4294_v52 = vrot.slane %v14562_v26, 6 }
 0x2c0   : > { %11569 = vmatprep.mubr.bf16.mxu1 %v10143_v34  ;;  %11598 = vmatpush3.bf16.msra.mxu1 %v13046_v44  ;;  %v4290_v44 = vrot.slane %v4152_v11, 6  ;;  %v13040_v34 = vld [vmem:[#allocation2 + $0x6c] sm:$0xff]  }
 0x2c1   : > { %11599 = vmatprep.subr.bf16.mxu1 %v13047_v30  ;;  %v4296_v56 = vrot.slane %v4294_v52, 4 }
 0x2c2   : > { %v4291_v46 = vsel %vm13620_vm2, %v4289_v14, %v4290_v44 }
 0x2c3   : > { %v10149_v20 = vcombine.low %v4288_v21, %v4291_v46  ;;  %v4629_v21 = vld [vmem:[#allocation2 + $0x78] sm:$0x8]  ;;  %v4630_v46 = vld [vmem:[#allocation2 + $0x80] sm:$0x7] }
 0x2c4   : > { %11600 = vmatpush3.bf16.msra.mxu1 %v13047_v30  ;;  %v13043_v30 = vld [vmem:[#allocation2 + $0x78] sm:$0xff]   ;;  %v10163_v61 = vrot.slane %v4629_v21, 11 }
 0x2c5   : > { %11938 = vmatmul.mubr.bf16.vlgmr.msra.gmra.mrb[32].mxu0 %v13030_v23  ;;  %v13052_v23 = vld [vmem:[#allocation7 + $0x3a8] sm:$0xff]   ;;  %v7489_v21 = vld [vmem:[#allocation2 + $0x38] sm:$0xf] }
 0x2c6   : > { %11970 = vmatpush3.bf16.msra.mxu0 %v14588_v25  ;;  %11941 = vmatprep.mubr.bf16.mxu0 %v13033_v10  ;;  %v4277_v25 = vsel %vm13620_vm2, %v4275_v31, %v4276_v5  ;;  %v4689_v10 = vrot.slane %v4687_v28, 4  ;;  %v4623_v31 = vld [vmem:[#allocation2 + $0x54] sm:$0x8]  ;;  %v4624_v5 = vld [vmem:[#allocation2 + $0x5c] sm:$0x7]  ;;  %v4710_v28 = vrot.slane %v4708_v6, 4 }
 0x2c7   : > { %11570 = vmatmul.mubr.bf16.gmra.mrb[48].mxu1 %v10144_v1  ;;  %11971 = vmatprep.subr.bf16.mxu0 %v13034_v54  ;;  %v10147_v40 = vcombine.low %v4274_v17, %v4277_v25  ;;  %v4295_v1 = vsel %vm13620_vm2, %v10134_v39, %v4294_v52  ;;  %v13058_v25 = vld [vmem:[#allocation7 + $0x3b8] sm:$0xff]   ;;  %v10160_v4 = vrot.slane %v4623_v31, 11  ;;  %v4715_v52 = vrot.slane %v13184_v38, 7  ;;  %v13185_v39 = vld [vmem:[#allocation2 + $0x88] sm:$0xf] }
 0x2c8   : > { %11573 = vmatprep.mubr.bf16.mxu1 %v10145_v16  ;;  %v13181_v16 = vld [vmem:[#allocation2 + $0x58] sm:$0xf]  ;;  %v4691_v0 = vsel %vm13990_vm8, %v4689_v10, %v4690_v33  ;;  %v4631_v33 = vld [vmem:[#allocation2 + $0x84] sm:$0x8]  ;;  %v10167_v38 = vrot.slane %v4637_v58, 11 }
 0x2c9   : > { %v4694_v45 = vrot.slane %v13181_v16, 7  ;;  %v10175_v59 = vcombine.low %v4688_v9, %v4691_v0  ;;  %v4717_v63 = vrot.slane %v4715_v52, 4  ;;  %v4716_v62 = vsel %vm13990_vm8, %v10163_v61, %v4715_v52  ;;  %v13054_v16 = vld [vmem:[#allocation2 + $0xc0] sm:$0xff]   ;;  %v4639_v61 = vld [vmem:[#allocation2 + $0xb4] sm:$0x8] }
 0x2ca   : > { %11972 = vmatpush3.bf16.msra.mxu0 %v13034_v54  ;;  %v4298_v54 = vsel %vm13620_vm2, %v4296_v56, %v4297_v22  ;;  %v4722_v56 = vrot.slane %v13185_v39, 7  ;;  %v13053_v22 = vld [vmem:[#allocation2 + $0xb4] sm:$0xff]   ;;  %v10164_v31 = vrot.slane %v4631_v33, 11  ;;  %v4641_v39 = vld [vmem:[#allocation2 + $0xc0] sm:$0x8] }
 0x2cb   : > { %11973 = vmatprep.subr.bf16.mxu0 %v13039_v24  ;;  %v10150_v17 = vcombine.low %v4295_v1, %v4298_v54  ;;  %v4696_v12 = vrot.slane %v4694_v45, 4  ;;  %v13186_v1 = vld [vmem:[#allocation2 + $0x94] sm:$0xf]  ;;  %v7492_v58 = vld [vmem:[#allocation2 + $0x5c] sm:$0xf] }
 0x2cc   : > { %v4729_v54 = vrot.slane %v13186_v1, 7 }
 0x2cd   : > { %11942 = vmatmul.mubr.bf16.gmra.mrb[36].mxu0 %v13035_v48  ;;  %v4626_v48 = vld [vmem:[#allocation2 + $0x68] sm:$0x7] }
 0x2ce   : > { %11945 = vmatprep.mubr.bf16.mxu0 %v13038_v42  ;;  %11974 = vmatpush3.bf16.msra.mxu0 %v13039_v24  ;;  %v13182_v24 = vld [vmem:[#allocation2 + $0x64] sm:$0xf]  ;;  %v4697_v42 = vrot.slane %v4624_v5, 7  ;;  %v4724_v5 = vrot.slane %v4722_v56, 4 }
 0x2cf   : > { %11574 = vmatmul.mubr.bf16.gmra.mrb[52].mxu1 %v10146_v41  ;;  %11975 = vmatprep.subr.bf16.mxu0 %v13044_v2  ;;  %v4701_v32 = vrot.slane %v13182_v24, 7  ;;  %v4704_v41 = vrot.slane %v4626_v48, 7  ;;  %v4723_v48 = vsel %vm13990_vm8, %v10164_v31, %v4722_v56  ;;  %v4642_v56 = vld [vmem:[#allocation2 + $0xc8] sm:$0x7] }
 0x2d0   : > { %11577 = vmatprep.mubr.bf16.mxu1 %v10147_v40  ;;  %v4695_v40 = vsel %vm13990_vm8, %v10160_v4, %v4694_v45  ;;  %v4698_v57 = vsel %vm13990_vm8, %v4696_v12, %v4697_v42  ;;  %v4633_v45 = vld [vmem:[#allocation2 + $0x90] sm:$0x8] }
 0x2d1   : > { %v4703_v11 = vrot.slane %v4701_v32, 4  ;;  %v4702_v14 = vsel %vm13990_vm8, %v10161_v18, %v4701_v32  ;;  %v10176_v51 = vcombine.low %v4695_v40, %v4698_v57  ;;  %v10165_v32 = vrot.slane %v4633_v45, 11  ;;  %v13056_v4 = vld [vmem:[#allocation2 + $0xcc] sm:$0xff]   ;;  %v4635_v18 = vld [vmem:[#allocation2 + $0x9c] sm:$0x8] }
 0x2d2   : > { %11976 = vmatpush3.bf16.msra.mxu0 %v13044_v2  ;;  %v14677_v2 = vld [vmem:[#allocation7 + $0x3c0] sm:$0xff]   ;;  %v13057_v57 = vld [vmem:[#allocation2 + $0xd8] sm:$0xff]   ;;  %v7491_v45 = vld [vmem:[#allocation2 + $0x50] sm:$0xf] }
 0x2d3   : > { %11977 = vmatprep.subr.bf16.mxu0 %v13049_v43  ;;  %v4705_v44 = vsel %vm13990_vm8, %v4703_v11, %v4704_v41  ;;  %v4730_v12 = vsel %vm13990_vm8, %v10165_v32, %v4729_v54  ;;  %v4636_v11 = vld [vmem:[#allocation2 + $0xa4] sm:$0x7]  ;;  %v13188_v41 = vld [vmem:[#allocation2 + $0xac] sm:$0xf] }
 0x2d4   : > { %v10177_v35 = vcombine.low %v4702_v14, %v4705_v44  ;;  %v4743_v40 = vrot.slane %v13188_v41, 7  ;;  %v10166_v44 = vrot.slane %v4635_v18, 11  ;;  %v4643_v32 = vld [vmem:[#allocation2 + $0xcc] sm:$0x8] }
 0x2d5   : > { %11946 = vmatmul.mubr.bf16.gmra.mrb[40].mxu0 %v13040_v34  ;;  %v13051_v34 = vld [vmem:[#allocation2 + $0xa8] sm:$0xff]  }
 0x2d6   : > { %11949 = vmatprep.mubr.bf16.mxu0 %v13043_v30  ;;  %11978 = vmatpush3.bf16.msra.mxu0 %v13049_v43  ;;  %v4627_v43 = vld [vmem:[#allocation2 + $0x6c] sm:$0x8]  ;;  %v4711_v30 = vrot.slane %v4628_v47, 7  ;;  %v4739_v47 = vrot.slane %v4636_v11, 7  ;;  %v4745_v52 = vrot.slane %v4743_v40, 4 }
 0x2d7   : > { %11578 = vmatmul.mubr.bf16.gmra.mrb[56].mxu1 %v10148_v60  ;;  %11979 = vmatprep.subr.bf16.mxu0 %v13052_v23  ;;  %v10162_v13 = vrot.slane %v4627_v43, 11  ;;  %v4718_v60 = vrot.slane %v4630_v46, 7 }
 0x2d8   : > { %11581 = vmatprep.mubr.bf16.mxu1 %v10149_v20  ;;  %v4712_v20 = vsel %vm13990_vm8, %v4710_v28, %v4711_v30  ;;  %v4744_v28 = vsel %vm13990_vm8, %v10167_v38, %v4743_v40 }
 0x2d9   : > { %v4719_v10 = vsel %vm13990_vm8, %v4717_v63, %v4718_v60  ;;  %v4640_v63 = vld [vmem:[#allocation2 + $0xbc] sm:$0x7]  ;;  %v4757_v60 = vrot.slane %v14513_v50, 7 }
 0x2da   : > { %11980 = vmatpush3.bf16.msra.mxu0 %v13052_v23  ;;  %v4709_v23 = vsel %vm13990_vm8, %v10162_v13, %v4708_v6  ;;  %v10179_v0 = vcombine.low %v4716_v62, %v4719_v10  ;;  %v4638_v6 = vld [vmem:[#allocation2 + $0xb0] sm:$0x7]  ;;  %v13059_v13 = vld [vmem:[#allocation2 + $0xe4] sm:$0xff]   ;;  %v10168_v10 = vrot.slane %v4639_v61, 11 }
 0x2db   : > { %11981 = vmatprep.subr.bf16.mxu0 %v13055_v29  ;;  %v10178_v9 = vcombine.low %v4709_v23, %v4712_v20  ;;  %v13189_v23 = vld [vmem:[#allocation2 + $0x34] sm:$0xf]  ;;  %v4759_v1 = vrot.slane %v4757_v60, 4 }
 0x2dc   : > { %v10336_v20 = vcombine.low %v13189_v23, %v7489_v21  ;;  %v4785_v21 = vrot.slane %v14548_v27, 7  ;;  %v7495_v27 = vld [vmem:[#allocation2 + $0x80] sm:$0xf] }
 0x2dd   : > { %11950 = vmatmul.mubr.bf16.gmra.mrb[44].mxu0 %v13045_v8  ;;  %v4634_v8 = vld [vmem:[#allocation2 + $0x98] sm:$0x7] }
 0x2de   : > { %11953 = vmatprep.mubr.bf16.mxu0 %v13048_v53  ;;  %11982 = vmatpush3.bf16.msra.mxu0 %v13055_v29  ;;  %v4632_v29 = vld [vmem:[#allocation2 + $0x8c] sm:$0x7]  ;;  %v4731_v53 = vrot.slane %v4729_v54, 4  ;;  %v4732_v19 = vrot.slane %v4634_v8, 7  ;;  %v4760_v54 = vrot.slane %v4642_v56, 7 }
 0x2df   : > { %11582 = vmatmul.mubr.bf16.gmra.mrb[60].mxu1 %v10150_v17  ;;  %11983 = vmatprep.subr.bf16.mxu0 %v13058_v25  ;;  %v4725_v24 = vrot.slane %v4632_v29, 7  ;;  %v10169_v29 = vrot.slane %v4641_v39, 11  ;;  %v7494_v56 = vld [vmem:[#allocation2 + $0x74] sm:$0xf] }
 0x2e0   : > { %11601 = vmatprep.mubr.bf16.mxu1 %v10175_v59  ;;  %v4733_v42 = vsel %vm13990_vm8, %v4731_v53, %v4732_v19  ;;  %v4644_v53 = vld [vmem:[#allocation2 + $0xd4] sm:$0x7]  ;;  %v4771_v19 = vrot.slane %v14528_v36, 7  ;;  %v7493_v36 = vld [vmem:[#allocation2 + $0x68] sm:$0xf] }
 0x2e1   : > { %v4726_v17 = vsel %vm13990_vm8, %v4724_v5, %v4725_v24  ;;  %v10181_v14 = vcombine.low %v4730_v12, %v4733_v42  ;;  %v4758_v5 = vsel %vm13990_vm8, %v10169_v29, %v4757_v60  ;;  %v4761_v24 = vsel %vm13990_vm8, %v4759_v1, %v4760_v54  ;;  %v13064_v12 = vld [vmem:[#allocation7 + $0x3c8] sm:$0xff]  }
 0x2e2   : > { %11984 = vmatpush3.bf16.msra.mxu0 %v13058_v25  ;;  %v13187_v25 = vld [vmem:[#allocation2 + $0xa0] sm:$0xf]  ;;  %v10185_v42 = vcombine.low %v4758_v5, %v4761_v24  ;;  %v4767_v11 = vrot.slane %v4644_v53, 7  ;;  %v4773_v40 = vrot.slane %v4771_v19, 4  ;;  %v7497_v53 = vld [vmem:[#allocation2 + $0x98] sm:$0xf] }
 0x2e3   : > { %12017 = vmatprep.subr.bf16.mxu0 %v14677_v2  ;;  %v4736_v59 = vrot.slane %v13187_v25, 7  ;;  %v4645_v25 = vld [vmem:[#allocation2 + $0xd8] sm:$0x8] }
 0x2e4   : > { %v10171_v41 = vrot.slane %v4645_v25, 11  ;;  %v13196_v25 = vld [vmem:[#allocation2 + $0x88] sm:$0xf] }
 0x2e5   : > { %11954 = vmatmul.mubr.bf16.gmra.mrb[48].mxu0 %v13050_v37  ;;  %v10180_v37 = vcombine.low %v4723_v48, %v4726_v17  ;;  %v4738_v43 = vrot.slane %v4736_v59, 4  ;;  %v4737_v46 = vsel %vm13990_vm8, %v10166_v44, %v4736_v59  ;;  %v13191_v48 = vld [vmem:[#allocation2 + $0x4c] sm:$0xf]  ;;  %v4646_v59 = vld [vmem:[#allocation2 + $0xe0] sm:$0x7]  ;;  %v4778_v44 = vrot.slane %v14544_v15, 7 }
 0x2e6   : > { %11957 = vmatprep.mubr.bf16.mxu0 %v13051_v34  ;;  %v4746_v34 = vrot.slane %v4638_v6, 7  ;;  %v10338_v17 = vcombine.low %v13191_v48, %v7491_v45  ;;  %v13067_v6 = vld [vmem:[#allocation7 + $0x3d0] sm:$0xff]   ;;  %v13070_v15 = vld [vmem:[#allocation7 + $0x3d8] sm:$0xff]   ;;  %v4652_v45 = vld [vmem:[#allocation2 + $0x104] sm:$0x7] }
 0x2e7   : > { %11602 = vmatmul.mubr.bf16.vlgmr.msra.gmra.mrb[32].mxu1 %v10176_v51  ;;  %v4740_v51 = vsel %vm13990_vm8, %v4738_v43, %v4739_v47  ;;  %v13192_v43 = vld [vmem:[#allocation2 + $0x58] sm:$0xf] }
 0x2e8   : > { %11605 = vmatprep.mubr.bf16.mxu1 %v10177_v35  ;;  %v4750_v35 = vrot.slane %v14507_v7, 7  ;;  %v4747_v30 = vsel %vm13990_vm8, %v4745_v52, %v4746_v34  ;;  %v4753_v7 = vrot.slane %v4640_v63, 7  ;;  %v10339_v47 = vcombine.low %v13192_v43, %v7492_v58  ;;  %v4647_v52 = vld [vmem:[#allocation2 + $0xe4] sm:$0x8]  ;;  %v4648_v34 = vld [vmem:[#allocation2 + $0xec] sm:$0x7] }
 0x2e9   : > { %v10183_v62 = vcombine.low %v4744_v28, %v4747_v30  ;;  %v10172_v61 = vrot.slane %v4647_v52, 11  ;;  %v4780_v63 = vrot.slane %v4778_v44, 4  ;;  %v4781_v60 = vrot.slane %v4648_v34, 7  ;;  %v13199_v58 = vld [vmem:[#allocation2 + $0xac] sm:$0xf]  ;;  %v13117_v52 = vld [vmem:[#allocation9 + $0x58] sm:$0xff]  }
 0x2ea   : > { %v4752_v33 = vrot.slane %v4750_v35, 4  ;;  %v4751_v50 = vsel %vm13990_vm8, %v10168_v10, %v4750_v35  ;;  %v4649_v35 = vld [vmem:[#allocation2 + $0xf0] sm:$0x8]  ;;  %v13200_v43 = vld [vmem:[#allocation2 + $0xb8] sm:$0xf] }
 0x2eb   : > { %v10173_v23 = vrot.slane %v4649_v35, 11  ;;  %v4782_v10 = vsel %vm13990_vm8, %v4780_v63, %v4781_v60  ;;  %v7502_v34 = vld [vmem:[#allocation2 + $0xd4] sm:$0xf]  ;;  %v13084_v60 = vld [vmem:[#allocation2 + $0x60] sm:$0xff]  }
 0x2ec   : > { %v4754_v8 = vsel %vm13990_vm8, %v4752_v33, %v4753_v7  ;;  %v4792_v33 = vrot.slane %v14562_v26, 7  ;;  %v13194_v7 = vld [vmem:[#allocation2 + $0x70] sm:$0xf]  ;;  %v4795_v26 = vrot.slane %v4652_v45, 7  ;;  %v13095_v45 = vld [vmem:[#allocation2 + $0xb4] sm:$0xff]  }
 0x2ed   : > { %11958 = vmatmul.mubr.bf16.gmra.mrb[52].mxu0 %v13053_v22  ;;  %v10182_v22 = vcombine.low %v4737_v46, %v4740_v51  ;;  %v13193_v46 = vld [vmem:[#allocation2 + $0x64] sm:$0xf]  ;;  %v10341_v29 = vcombine.low %v13194_v7, %v7494_v56  ;;  %v4786_v1 = vsel %vm13990_vm8, %v10173_v23, %v4785_v21  ;;  %v13122_v23 = vld [vmem:[#allocation9 + $0x70] sm:$0xff]   ;;  %v13087_v56 = vld [vmem:[#allocation2 + $0x78] sm:$0xff]  }
 0x2ee   : > { %11961 = vmatprep.mubr.bf16.mxu0 %v13054_v16  ;;  %v7490_v16 = vld [vmem:[#allocation2 + $0x44] sm:$0xf]  ;;  %v10340_v51 = vcombine.low %v13193_v46, %v7493_v36  ;;  %v4794_v24 = vrot.slane %v4792_v33, 4  ;;  %v7503_v46 = vld [vmem:[#allocation2 + $0xe0] sm:$0xf] }
 0x2ef   : > { %11606 = vmatmul.mubr.bf16.gmra.mrb[36].mxu1 %v10178_v9  ;;  %v4764_v9 = vrot.slane %v14526_v55, 7  ;;  %v10170_v55 = vrot.slane %v4643_v32, 11  ;;  %v7496_v32 = vld [vmem:[#allocation2 + $0x8c] sm:$0xf]  ;;  %v13097_v7 = vld [vmem:[#allocation7 + $0x420] sm:$0xff]  }
 0x2f0   : > { %11609 = vmatprep.mubr.bf16.mxu1 %v10179_v0  ;;  %v13190_v0 = vld [vmem:[#allocation2 + $0x40] sm:$0xf] }
 0x2f1   : > { %v10337_v31 = vcombine.low %v13190_v0, %v7490_v16  ;;  %v4766_v18 = vrot.slane %v4764_v9, 4  ;;  %v4651_v16 = vld [vmem:[#allocation2 + $0xfc] sm:$0x8]  ;;  %v13076_v0 = vld [vmem:[#allocation7 + $0x3e8] sm:$0xff]  }
 0x2f2   : > { %v10174_v5 = vrot.slane %v4651_v16, 11  ;;  %v13103_v16 = vld [vmem:[#allocation7 + $0x430] sm:$0xff]  }
 0x2f4   : > { %v4793_v48 = vsel %vm13990_vm8, %v10174_v5, %v4792_v33  ;;  %v13094_v33 = vld [vmem:[#allocation7 + $0x418] sm:$0xff]   ;;  %v13101_v5 = vld [vmem:[#allocation2 + $0xe4] sm:$0xff]  }
 0x2f5   : > { %11962 = vmatmul.mubr.bf16.gmra.mrb[56].mxu0 %v13056_v4  ;;  %v10184_v4 = vcombine.low %v4751_v50, %v4754_v8  ;;  %v13195_v50 = vld [vmem:[#allocation2 + $0x7c] sm:$0xf] }
 0x2f6   : > { %11965 = vmatprep.mubr.bf16.mxu0 %v13057_v57  ;;  %v4774_v57 = vrot.slane %v4646_v59, 7  ;;  %v10342_v8 = vcombine.low %v13195_v50, %v7495_v27  ;;  %v10343_v59 = vcombine.low %v13196_v25, %v7496_v32  ;;  %v13088_v27 = vld [vmem:[#allocation7 + $0x408] sm:$0xff]   ;;  %v13096_v50 = vld [vmem:[#allocation2 + $0xc0] sm:$0xff]  }
 0x2f7   : > { %11610 = vmatmul.mubr.bf16.gmra.mrb[40].mxu1 %v10180_v37  ;;  %v4765_v37 = vsel %vm13990_vm8, %v10170_v55, %v4764_v9  ;;  %v13082_v55 = vld [vmem:[#allocation7 + $0x3f8] sm:$0xff]  }
 0x2f8   : > { %11613 = vmatprep.mubr.bf16.mxu1 %v10181_v14  ;;  %v4768_v14 = vsel %vm13990_vm8, %v4766_v18, %v4767_v11  ;;  %v4775_v38 = vsel %vm13990_vm8, %v4773_v40, %v4774_v57  ;;  %v7498_v18 = vld [vmem:[#allocation2 + $0xa4] sm:$0xf] }
 0x2f9   : > { %v10186_v28 = vcombine.low %v4765_v37, %v4768_v14  ;;  %v13113_v11 = vld [vmem:[#allocation9 + $0x40] sm:$0xff]   ;;  %v10345_v57 = vcombine.low %v13198_v49, %v7498_v18  ;;  %v7500_v37 = vld [vmem:[#allocation2 + $0xbc] sm:$0xf]  ;;  %v13116_v14 = vld [vmem:[#allocation9 + $0x50] sm:$0xff]  }
 0x2fa   : > { %v13085_v40 = vld [vmem:[#allocation7 + $0x400] sm:$0xff]   ;;  %11633 = vmatprep.subr.bf16.mxu1 %v13113_v11 }
 0x2fb   : > { %11634 = vmatpush3.bf16.msra.mxu1 %v13113_v11 }
 0x2fd   : > { %11966 = vmatmul.mubr.bf16.gmra.mrb[60].mxu0 %v13059_v13  ;;  %v4650_v13 = vld [vmem:[#allocation2 + $0xf8] sm:$0x7] }
 0x2fe   : > { %11985 = vmatprep.mubr.bf16.mxu0 %v10336_v20  ;;  %v4787_v20 = vrot.slane %v4785_v21, 4  ;;  %v4788_v39 = vrot.slane %v4650_v13, 7  ;;  %v13119_v21 = vld [vmem:[#allocation9 + $0x60] sm:$0xff]   ;;  %v13203_v13 = vld [vmem:[#allocation2 + $0xdc] sm:$0xf] }
 0x2ff   : > { %11614 = vmatmul.mubr.bf16.gmra.mrb[44].mxu1 %v10182_v22  ;;  %v13073_v22 = vld [vmem:[#allocation7 + $0x3e0] sm:$0xff]  }
 0x300   : > { %11617 = vmatprep.mubr.bf16.mxu1 %v10183_v62  ;;  %v4779_v62 = vsel %vm13990_vm8, %v10172_v61, %v4778_v44  ;;  %v4789_v54 = vsel %vm13990_vm8, %v4787_v20, %v4788_v39  ;;  %v7501_v44 = vld [vmem:[#allocation2 + $0xc8] sm:$0xf]  ;;  %v13123_v20 = vld [vmem:[#allocation9 + $0x78] sm:$0xff]   ;;  %v13086_v39 = vld [vmem:[#allocation2 + $0x6c] sm:$0xff]  }
 0x301   : > { %v10188_v9 = vcombine.low %v4779_v62, %v4782_v10  ;;  %v13204_v61 = vld [vmem:[#allocation2 + $0xe8] sm:$0xf]  ;;  %v13090_v10 = vld [vmem:[#allocation2 + $0x90] sm:$0xff]  }
 0x302   : > { %v13089_v62 = vld [vmem:[#allocation2 + $0x84] sm:$0xff]  }
 0x305   : > { %11986 = vmatmul.mubr.bf16.vlgmr.msra.gmra.mrb[32].mxu0 %v10337_v31  ;;  %v10189_v31 = vcombine.low %v4786_v1, %v4789_v54  ;;  %v13093_v1 = vld [vmem:[#allocation2 + $0xa8] sm:$0xff]  }
 0x306   : > { %12018 = vmatpush3.bf16.msra.mxu0 %v14677_v2  ;;  %11989 = vmatprep.mubr.bf16.mxu0 %v10338_v17  ;;  %v4772_v2 = vsel %vm13990_vm8, %v10171_v41, %v4771_v19  ;;  %v13079_v19 = vld [vmem:[#allocation7 + $0x3f0] sm:$0xff]   ;;  %v4796_v17 = vsel %vm13990_vm8, %v4794_v24, %v4795_v26  ;;  %v13100_v54 = vld [vmem:[#allocation7 + $0x428] sm:$0xff]   ;;  %v14751_v26 = vld [vmem:[#allocation2 + $0x64] sm:$0xf] }
 0x307   : > { %11618 = vmatmul.mubr.bf16.gmra.mrb[48].mxu1 %v10184_v4  ;;  %12019 = vmatprep.subr.bf16.mxu0 %v13064_v12  ;;  %v10187_v30 = vcombine.low %v4772_v2, %v4775_v38  ;;  %v13197_v4 = vld [vmem:[#allocation2 + $0x94] sm:$0xf]  ;;  %v7499_v41 = vld [vmem:[#allocation2 + $0xb0] sm:$0xf]  ;;  %v13201_v2 = vld [vmem:[#allocation2 + $0xc4] sm:$0xf] }
 0x308   : > { %11621 = vmatprep.mubr.bf16.mxu1 %v10185_v42  ;;  %v10190_v42 = vcombine.low %v4793_v48, %v4796_v17  ;;  %v10346_v36 = vcombine.low %v13199_v58, %v7499_v41  ;;  %v10348_v38 = vcombine.low %v13201_v2, %v7501_v44  ;;  %v13102_v24 = vld [vmem:[#allocation2 + $0xf0] sm:$0xff]   ;;  %v8328_v32 = vrot.slane %v14751_v26, 6  ;;  %v13104_v48 = vld [vmem:[#allocation2 + $0xfc] sm:$0xff]   ;;  %v13105_v17 = vld [vmem:[#allocation2 + $0x108] sm:$0xff]  }
 0x309   : > { %v8233_v41 = vld [vmem:[#allocation2 + $0x6c] sm:$0xc]  ;;  %v8238_v58 = vld [vmem:[#allocation2 + $0x80] sm:$0x3] }
 0x30a   : > { %12020 = vmatpush3.bf16.msra.mxu0 %v13064_v12  ;;  %v10344_v12 = vcombine.low %v13197_v4, %v7497_v53  ;;  %v8230_v53 = vld [vmem:[#allocation2 + $0x60] sm:$0xc]  ;;  %v8345_v2 = vrot.slane %v8238_v58, 6  ;;  %v8253_v58 = vld [vmem:[#allocation2 + $0xbc] sm:$0x3] }
 0x30b   : > { %12021 = vmatprep.subr.bf16.mxu0 %v13067_v6  ;;  %v10384_v25 = vrot.slane %v8230_v53, 10 }
 0x30d   : > { %11990 = vmatmul.mubr.bf16.gmra.mrb[36].mxu0 %v10339_v47  ;;  %v10347_v47 = vcombine.low %v13200_v43, %v7500_v37  ;;  %v8329_v18 = vsel %vm13620_vm2, %v10384_v25, %v8328_v32  ;;  %v10385_v37 = vrot.slane %v8233_v41, 10 }
 0x30e   : > { %11993 = vmatprep.mubr.bf16.mxu0 %v10340_v51  ;;  %12022 = vmatpush3.bf16.msra.mxu0 %v13067_v6  ;;  %v13114_v6 = vld [vmem:[#allocation9 + $0x48] sm:$0xff]   ;;  %v13202_v51 = vld [vmem:[#allocation2 + $0xd0] sm:$0xf] }
 0x30f   : > { %11622 = vmatmul.mubr.bf16.gmra.mrb[52].mxu1 %v10186_v28  ;;  %12023 = vmatprep.subr.bf16.mxu0 %v13070_v15  ;;  %v10349_v35 = vcombine.low %v13202_v51, %v7502_v34  ;;  %v10350_v28 = vcombine.low %v13203_v13, %v7503_v46  ;;  %v8239_v13 = vld [vmem:[#allocation2 + $0x84] sm:$0xc] }
 0x310   : > { %11625 = vmatprep.mubr.bf16.mxu1 %v10187_v30  ;;  %11635 = vmatprep.subr.bf16.mxu1 %v13114_v6  ;;  %v7504_v30 = vld [vmem:[#allocation2 + $0xec] sm:$0xf] }
 0x311   : > { %11636 = vmatpush3.bf16.msra.mxu1 %v13114_v6  ;;  %v10351_v63 = vcombine.low %v13204_v61, %v7504_v30  ;;  %v8242_v30 = vld [vmem:[#allocation2 + $0x90] sm:$0xc]  ;;  %v8244_v61 = vld [vmem:[#allocation2 + $0x98] sm:$0x3] }
 0x312   : > { %12024 = vmatpush3.bf16.msra.mxu0 %v13070_v15  ;;  %11637 = vmatprep.subr.bf16.mxu1 %v13116_v14  ;;  %v13120_v15 = vld [vmem:[#allocation9 + $0x68] sm:$0xff]  }
 0x313   : > { %12025 = vmatprep.subr.bf16.mxu0 %v13073_v22 }
 0x315   : > { %11994 = vmatmul.mubr.bf16.gmra.mrb[40].mxu0 %v10341_v29  ;;  %11638 = vmatpush3.bf16.msra.mxu1 %v13116_v14  ;;  %v13092_v29 = vld [vmem:[#allocation2 + $0x9c] sm:$0xff]  }
 0x316   : > { %11997 = vmatprep.mubr.bf16.mxu0 %v10342_v8  ;;  %12026 = vmatpush3.bf16.msra.mxu0 %v13073_v22  ;;  %v13091_v22 = vld [vmem:[#allocation7 + $0x410] sm:$0xff]   ;;  %v13106_v8 = vld [vmem:[#allocation7 + $0x438] sm:$0xff]  }
 0x317   : > { %11626 = vmatmul.mubr.bf16.gmra.mrb[56].mxu1 %v10188_v9  ;;  %12027 = vmatprep.subr.bf16.mxu0 %v13076_v0  ;;  %v14748_v9 = vld [vmem:[#allocation7 + $0x440] sm:$0xff]  }
 0x318   : > { %11629 = vmatprep.mubr.bf16.mxu1 %v10189_v31  ;;  %11639 = vmatprep.subr.bf16.mxu1 %v13117_v52  ;;  %v13099_v31 = vld [vmem:[#allocation2 + $0xd8] sm:$0xff]  }
 0x319   : > { %11640 = vmatpush3.bf16.msra.mxu1 %v13117_v52  ;;  %v14766_v52 = vld [vmem:[#allocation2 + $0x94] sm:$0xf] }
 0x31a   : > { %12028 = vmatpush3.bf16.msra.mxu0 %v13076_v0  ;;  %11641 = vmatprep.subr.bf16.mxu1 %v13119_v21  ;;  %v13098_v0 = vld [vmem:[#allocation2 + $0xcc] sm:$0xff]  }
 0x31b   : > { %12029 = vmatprep.subr.bf16.mxu0 %v13079_v19 }
 0x31d   : > { %11998 = vmatmul.mubr.bf16.gmra.mrb[44].mxu0 %v10343_v59  ;;  %11642 = vmatpush3.bf16.msra.mxu1 %v13119_v21  ;;  %v8330_v59 = vrot.slane %v8328_v32, 4 }
 0x31e   : > { %12001 = vmatprep.mubr.bf16.mxu0 %v10344_v12  ;;  %12030 = vmatpush3.bf16.msra.mxu0 %v13079_v19  ;;  %v8232_v19 = vld [vmem:[#allocation2 + $0x68] sm:$0x3]  ;;  %v14754_v12 = vld [vmem:[#allocation2 + $0x70] sm:$0xf] }
 0x31f   : > { %11630 = vmatmul.mubr.bf16.gmra.mrb[60].mxu1 %v10190_v42  ;;  %12031 = vmatprep.subr.bf16.mxu0 %v13082_v55  ;;  %v8331_v4 = vrot.slane %v8232_v19, 6  ;;  %v14756_v42 = vld [vmem:[#allocation2 + $0x7c] sm:$0xf] }
 0x320   : > { %11643 = vmatprep.subr.bf16.mxu1 %v13120_v15  ;;  %v8342_v49 = vrot.slane %v14756_v42, 6 }
 0x321   : > { %11644 = vmatpush3.bf16.msra.mxu1 %v13120_v15  ;;  %v8332_v11 = vsel %vm13620_vm2, %v8330_v59, %v8331_v4  ;;  %v8356_v15 = vrot.slane %v14766_v52, 6  ;;  %v13111_v59 = vld [vmem:[#allocation7 + $0x458] sm:$0xff]  }
 0x322   : > { %12032 = vmatpush3.bf16.msra.mxu0 %v13082_v55  ;;  %11645 = vmatprep.subr.bf16.mxu1 %v13122_v23  ;;  %v8335_v55 = vrot.slane %v14754_v12, 6  ;;  %v10400_v6 = vcombine.low %v8329_v18, %v8332_v11  ;;  %v14793_v4 = vld [vmem:[#allocation2 + $0xb8] sm:$0xf] }
 0x323   : > { %12065 = vmatprep.subr.bf16.mxu0 %v13085_v40  ;;  %v8377_v41 = vrot.slane %v14793_v4, 6 }
 0x324   : > { %v8337_v14 = vrot.slane %v8335_v55, 4  ;;  %v8336_v34 = vsel %vm13620_vm2, %v10385_v37, %v8335_v55  ;;  %v14795_v55 = vld [vmem:[#allocation2 + $0xc4] sm:$0xf]  ;;  %v8254_v37 = vld [vmem:[#allocation2 + $0xc0] sm:$0xc] }
 0x325   : > { %12002 = vmatmul.mubr.bf16.gmra.mrb[48].mxu0 %v10345_v57  ;;  %11646 = vmatpush3.bf16.msra.mxu1 %v13122_v23  ;;  %v8236_v57 = vld [vmem:[#allocation2 + $0x78] sm:$0xc]  ;;  %v10387_v23 = vrot.slane %v8239_v13, 10  ;;  %v13115_v13 = vld [vmem:[#allocation7 + $0x468] sm:$0xff]  }
 0x326   : > { %12005 = vmatprep.mubr.bf16.mxu0 %v10346_v36  ;;  %11647 = vmatprep.subr.bf16.mxu1 %v13123_v20  ;;  %v13107_v36 = vld [vmem:[#allocation2 + $0x114] sm:$0xff]   ;;  %v10386_v43 = vrot.slane %v8236_v57, 10 }
 0x327   : > { %v8251_v57 = vld [vmem:[#allocation2 + $0xb4] sm:$0xc] }
 0x328   : > { %v8343_v51 = vsel %vm13620_vm2, %v10386_v43, %v8342_v49 }
 0x329   : > { %11648 = vmatpush3.bf16.msra.mxu1 %v13123_v20 }
 0x32d   : > { %12006 = vmatmul.mubr.bf16.gmra.mrb[52].mxu0 %v10347_v47  ;;  %v8344_v47 = vrot.slane %v8342_v49, 4 }
 0x32e   : > { %12009 = vmatprep.mubr.bf16.mxu0 %v10348_v38  ;;  %v14764_v38 = vld [vmem:[#allocation2 + $0x88] sm:$0xf] }
 0x32f   : > { %v8349_v46 = vrot.slane %v14764_v38, 6 }
 0x331   : > { %v8351_v20 = vrot.slane %v8349_v46, 4 }
 0x335   : > { %12010 = vmatmul.mubr.bf16.gmra.mrb[56].mxu0 %v10349_v35  ;;  %v8346_v35 = vsel %vm13620_vm2, %v8344_v47, %v8345_v2  ;;  %v10391_v47 = vrot.slane %v8251_v57, 10  ;;  %v8379_v2 = vrot.slane %v8377_v41, 4 }
 0x336   : > { %12013 = vmatprep.mubr.bf16.mxu0 %v10350_v28  ;;  %v8241_v28 = vld [vmem:[#allocation2 + $0x8c] sm:$0x3] }
 0x33d   : > { %12014 = vmatmul.mubr.bf16.gmra.mrb[60].mxu0 %v10351_v63 }
 0x33e   : > { %12033 = vmatprep.mubr.bf16.mxu0 %v13084_v60  ;;  %v10402_v60 = vcombine.low %v8343_v51, %v8346_v35  ;;  %v14807_v35 = vld [vmem:[#allocation2 + $0xd0] sm:$0xf] }
 0x345   : > { %12034 = vmatmul.mubr.bf16.vlgmr.msra.gmra.mrb[32].mxu0 %v13086_v39  ;;  %v8352_v39 = vrot.slane %v8241_v28, 6  ;;  %v14809_v28 = vld [vmem:[#allocation2 + $0xdc] sm:$0xf] }
 0x346   : > { %12066 = vmatpush3.bf16.msra.mxu0 %v13085_v40  ;;  %12037 = vmatprep.mubr.bf16.mxu0 %v13087_v56  ;;  %v8235_v40 = vld [vmem:[#allocation2 + $0x74] sm:$0x3]  ;;  %v13109_v56 = vld [vmem:[#allocation7 + $0x448] sm:$0xff]  }
 0x347   : > { %12067 = vmatprep.subr.bf16.mxu0 %v13088_v27  ;;  %v8338_v44 = vrot.slane %v8235_v40, 6 }
 0x349   : > { %v8339_v21 = vsel %vm13620_vm2, %v8337_v14, %v8338_v44  ;;  %v8256_v14 = vld [vmem:[#allocation2 + $0xc8] sm:$0x3] }
 0x34a   : > { %12068 = vmatpush3.bf16.msra.mxu0 %v13088_v27  ;;  %v10401_v63 = vcombine.low %v8336_v34, %v8339_v21  ;;  %v10388_v27 = vrot.slane %v8242_v30, 10  ;;  %v8380_v34 = vrot.slane %v8253_v58, 6  ;;  %v10392_v21 = vrot.slane %v8254_v37, 10  ;;  %v14837_v37 = vld [vmem:[#allocation2 + $0x100] sm:$0xf] }
 0x34b   : > { %12069 = vmatprep.subr.bf16.mxu0 %v13091_v22  ;;  %v8387_v51 = vrot.slane %v8256_v14, 6  ;;  %v14840_v14 = vld [vmem:[#allocation2 + $0x10c] sm:$0xf] }
 0x34c   : > { %v8381_v30 = vsel %vm13620_vm2, %v8379_v2, %v8380_v34 }
 0x34d   : > { %12038 = vmatmul.mubr.bf16.gmra.mrb[36].mxu0 %v13089_v62  ;;  %v8359_v62 = vrot.slane %v8244_v61, 6  ;;  %v8391_v61 = vrot.slane %v14807_v35, 6 }
 0x34e   : > { %12041 = vmatprep.mubr.bf16.mxu0 %v13090_v10  ;;  %12070 = vmatpush3.bf16.msra.mxu0 %v13091_v22  ;;  %v8358_v22 = vrot.slane %v8356_v15, 4  ;;  %v14778_v10 = vld [vmem:[#allocation2 + $0xa0] sm:$0xf] }
 0x34f   : > { %12071 = vmatprep.subr.bf16.mxu0 %v13094_v33 }
 0x352   : > { %12072 = vmatpush3.bf16.msra.mxu0 %v13094_v33  ;;  %v14780_v33 = vld [vmem:[#allocation2 + $0xac] sm:$0xf] }
 0x353   : > { %12073 = vmatprep.subr.bf16.mxu0 %v13097_v7 }
 0x355   : > { %12042 = vmatmul.mubr.bf16.gmra.mrb[40].mxu0 %v13092_v29  ;;  %v8353_v29 = vsel %vm13620_vm2, %v8351_v20, %v8352_v39  ;;  %v8259_v20 = vld [vmem:[#allocation2 + $0xd4] sm:$0x3]  ;;  %v8398_v39 = vrot.slane %v14809_v28, 6 }
 0x356   : > { %12045 = vmatprep.mubr.bf16.mxu0 %v13093_v1  ;;  %12074 = vmatpush3.bf16.msra.mxu0 %v13097_v7  ;;  %v8350_v7 = vsel %vm13620_vm2, %v10387_v23, %v8349_v46  ;;  %v8363_v1 = vrot.slane %v14778_v10, 6  ;;  %v8257_v23 = vld [vmem:[#allocation2 + $0xcc] sm:$0xc] }
 0x357   : > { %12075 = vmatprep.subr.bf16.mxu0 %v13100_v54 }
 0x358   : > { %v8365_v53 = vrot.slane %v8363_v1, 4 }
 0x35a   : > { %12076 = vmatpush3.bf16.msra.mxu0 %v13100_v54  ;;  %v8357_v54 = vsel %vm13620_vm2, %v10388_v27, %v8356_v15  ;;  %v8378_v15 = vsel %vm13620_vm2, %v10391_v47, %v8377_v41  ;;  %v8260_v27 = vld [vmem:[#allocation2 + $0xd8] sm:$0xc]  ;;  %v8419_v47 = vrot.slane %v14837_v37, 6 }
 0x35b   : > { %12077 = vmatprep.subr.bf16.mxu0 %v13103_v16 }
 0x35d   : > { %12046 = vmatmul.mubr.bf16.gmra.mrb[44].mxu0 %v13095_v45  ;;  %v13110_v45 = vld [vmem:[#allocation7 + $0x450] sm:$0xff]  }
 0x35e   : > { %12049 = vmatprep.mubr.bf16.mxu0 %v13096_v50  ;;  %12078 = vmatpush3.bf16.msra.mxu0 %v13103_v16  ;;  %v8360_v16 = vsel %vm13620_vm2, %v8358_v22, %v8359_v62  ;;  %v8245_v50 = vld [vmem:[#allocation2 + $0x9c] sm:$0xc]  ;;  %v8262_v22 = vld [vmem:[#allocation2 + $0xe0] sm:$0x3]  ;;  %v10407_v62 = vcombine.low %v8378_v15, %v8381_v30  ;;  %v8274_v15 = vld [vmem:[#allocation2 + $0x110] sm:$0x3] }
 0x35f   : > { %12079 = vmatprep.subr.bf16.mxu0 %v13106_v8  ;;  %v10389_v32 = vrot.slane %v8245_v50, 10  ;;  %v8401_v50 = vrot.slane %v8262_v22, 6 }
 0x361   : > { %v8364_v18 = vsel %vm13620_vm2, %v10389_v32, %v8363_v1  ;;  %v8393_v1 = vrot.slane %v8391_v61, 4 }
 0x362   : > { %12080 = vmatpush3.bf16.msra.mxu0 %v13106_v8  ;;  %v8247_v8 = vld [vmem:[#allocation2 + $0xa4] sm:$0x3] }
 0x363   : > { %12113 = vmatprep.subr.bf16.mxu0 %v14748_v9  ;;  %v8366_v19 = vrot.slane %v8247_v8, 6  ;;  %v14821_v8 = vld [vmem:[#allocation2 + $0xe8] sm:$0xf] }
 0x365   : > { %12050 = vmatmul.mubr.bf16.gmra.mrb[48].mxu0 %v13098_v0  ;;  %v8248_v0 = vld [vmem:[#allocation2 + $0xa8] sm:$0xc]  ;;  %v8367_v11 = vsel %vm13620_vm2, %v8365_v53, %v8366_v19  ;;  %v8263_v19 = vld [vmem:[#allocation2 + $0xe4] sm:$0xc] }
 0x366   : > { %12053 = vmatprep.mubr.bf16.mxu0 %v13099_v31  ;;  %v8250_v31 = vld [vmem:[#allocation2 + $0xb0] sm:$0x3]  ;;  %v10405_v44 = vcombine.low %v8364_v18, %v8367_v11  ;;  %v8268_v18 = vld [vmem:[#allocation2 + $0xf8] sm:$0x3] }
 0x367   : > { %v8373_v25 = vrot.slane %v8250_v31, 6 }
 0x36d   : > { %12054 = vmatmul.mubr.bf16.gmra.mrb[52].mxu0 %v13101_v5  ;;  %v10403_v5 = vcombine.low %v8350_v7, %v8353_v29  ;;  %v10393_v29 = vrot.slane %v8257_v23, 10 }
 0x36e   : > { %12057 = vmatprep.mubr.bf16.mxu0 %v13102_v24  ;;  %v10404_v24 = vcombine.low %v8357_v54, %v8360_v16  ;;  %v8394_v54 = vrot.slane %v8259_v20, 6  ;;  %v10394_v16 = vrot.slane %v8260_v27, 10  ;;  %v14852_v27 = vld [vmem:[#allocation2 + $0x118] sm:$0xf] }
 0x36f   : > { %v8392_v31 = vsel %vm13620_vm2, %v10393_v29, %v8391_v61 }
 0x370   : > { %v8399_v32 = vsel %vm13620_vm2, %v10394_v16, %v8398_v39  ;;  %v8277_v16 = vld [vmem:[#allocation2 + $0x11c] sm:$0x3] }
 0x375   : > { %12058 = vmatmul.mubr.bf16.gmra.mrb[56].mxu0 %v13104_v48  ;;  %v10390_v48 = vrot.slane %v8248_v0, 10  ;;  %v14823_v0 = vld [vmem:[#allocation2 + $0xf4] sm:$0xf] }
 0x376   : > { %12061 = vmatprep.mubr.bf16.mxu0 %v13105_v17 }
 0x37d   : > { %12062 = vmatmul.mubr.bf16.gmra.mrb[60].mxu0 %v13107_v36  ;;  %v8384_v36 = vrot.slane %v14795_v55, 6 }
 0x37e   : > { %12081 = vmatprep.mubr.bf16.mxu0 %v10400_v6  ;;  %v13112_v6 = vld [vmem:[#allocation7 + $0x460] sm:$0xff]  }
 0x37f   : > { %v8386_v46 = vrot.slane %v8384_v36, 4 }
 0x385   : > { %12082 = vmatmul.mubr.bf16.vlgmr.msra.gmra.mrb[32].mxu0 %v10401_v63  ;;  %v8385_v63 = vsel %vm13620_vm2, %v10392_v21, %v8384_v36  ;;  %v8269_v21 = vld [vmem:[#allocation2 + $0xfc] sm:$0xc] }
 0x386   : > { %12114 = vmatpush3.bf16.msra.mxu0 %v14748_v9  ;;  %12085 = vmatprep.mubr.bf16.mxu0 %v10402_v60  ;;  %v8370_v9 = vrot.slane %v14780_v33, 6  ;;  %v8388_v60 = vsel %vm13620_vm2, %v8386_v46, %v8387_v51  ;;  %v8271_v46 = vld [vmem:[#allocation2 + $0x104] sm:$0x3]  ;;  %v8426_v51 = vrot.slane %v14840_v14, 6 }
 0x387   : > { %12115 = vmatprep.subr.bf16.mxu0 %v13109_v56  ;;  %v10408_v7 = vcombine.low %v8385_v63, %v8388_v60  ;;  %v10397_v63 = vrot.slane %v8269_v21, 10  ;;  %v8421_v60 = vrot.slane %v8419_v47, 4  ;;  %v8422_v23 = vrot.slane %v8271_v46, 6 }
 0x388   : > { %v8372_v17 = vrot.slane %v8370_v9, 4  ;;  %v8371_v40 = vsel %vm13620_vm2, %v10390_v48, %v8370_v9  ;;  %v13121_v9 = vld [vmem:[#allocation7 + $0x478] sm:$0xff]   ;;  %v8265_v48 = vld [vmem:[#allocation2 + $0xec] sm:$0x3] }
 0x389   : > { %v8408_v57 = vrot.slane %v8265_v48, 6  ;;  %v8420_v22 = vsel %vm13620_vm2, %v10397_v63, %v8419_v47 }
 0x38a   : > { %12116 = vmatpush3.bf16.msra.mxu0 %v13109_v56  ;;  %v8374_v49 = vsel %vm13620_vm2, %v8372_v17, %v8373_v25  ;;  %v13118_v56 = vld [vmem:[#allocation7 + $0x470] sm:$0xff]   ;;  %v8412_v17 = vrot.slane %v14823_v0, 6  ;;  %v14835_v25 = vld [vmem:[#allocation9 + $0x80] sm:$0xff]  }
 0x38b   : > { %12117 = vmatprep.subr.bf16.mxu0 %v13110_v45  ;;  %v10406_v43 = vcombine.low %v8371_v40, %v8374_v49  ;;  %v10395_v40 = vrot.slane %v8263_v19, 10  ;;  %v14870_v19 = vld [vmem:[%s15171_s5 + $0x1] ss:$0 sm:$0xff] }
 0x38c   : > { %v8414_v36 = vrot.slane %v8412_v17, 4 }
 0x38d   : > { %12086 = vmatmul.mubr.bf16.gmra.mrb[36].mxu0 %v10403_v5  ;;  %v8395_v5 = vsel %vm13620_vm2, %v8393_v1, %v8394_v54  ;;  %v8275_v54 = vld [vmem:[#allocation2 + $0x114] sm:$0xc] }
 0x38e   : > { %12089 = vmatprep.mubr.bf16.mxu0 %v10404_v24  ;;  %12118 = vmatpush3.bf16.msra.mxu0 %v13110_v45  ;;  %v8400_v45 = vrot.slane %v8398_v39, 4  ;;  %v8405_v24 = vrot.slane %v14821_v8, 6  ;;  %v10409_v11 = vcombine.low %v8392_v31, %v8395_v5  ;;  %v8428_v39 = vrot.slane %v8426_v51, 4 }
 0x38f   : > { %12119 = vmatprep.subr.bf16.mxu0 %v13111_v59  ;;  %v8436_v5 = vrot.slane %v8277_v16, 6 }
 0x390   : > { %v8402_v53 = vsel %vm13620_vm2, %v8400_v45, %v8401_v50  ;;  %v8407_v49 = vrot.slane %v8405_v24, 4 }
 0x391   : > { %v10410_v41 = vcombine.low %v8399_v32, %v8402_v53  ;;  %v8760_v53 = vld [vmem:[#allocation2 + $0x68] sm:$0xf] }
 0x392   : > { %12120 = vmatpush3.bf16.msra.mxu0 %v13111_v59  ;;  %v8266_v59 = vld [vmem:[#allocation2 + $0xf0] sm:$0xc] }
 0x393   : > { %12121 = vmatprep.subr.bf16.mxu0 %v13112_v6  ;;  %v10396_v58 = vrot.slane %v8266_v59, 10  ;;  %v10424_v59 = vcombine.low %v14751_v26, %v8760_v53 }
 0x395   : > { %12090 = vmatmul.mubr.bf16.gmra.mrb[40].mxu0 %v10405_v44  ;;  %v8406_v44 = vsel %vm13620_vm2, %v10395_v40, %v8405_v24  ;;  %v8413_v2 = vsel %vm13620_vm2, %v10396_v58, %v8412_v17  ;;  %v8761_v58 = vld [vmem:[#allocation2 + $0x74] sm:$0xf] }
 0x396   : > { %12093 = vmatprep.mubr.bf16.mxu0 %v10406_v43  ;;  %12122 = vmatpush3.bf16.msra.mxu0 %v13112_v6  ;;  %v8415_v6 = vrot.slane %v8268_v18, 6  ;;  %v8409_v43 = vsel %vm13620_vm2, %v8407_v49, %v8408_v57 }
 0x397   : > { %12123 = vmatprep.subr.bf16.mxu0 %v13115_v13  ;;  %v10411_v30 = vcombine.low %v8406_v44, %v8409_v43  ;;  %v8762_v44 = vld [vmem:[#allocation2 + $0x80] sm:$0xf] }
 0x398   : > { %v8416_v34 = vsel %vm13620_vm2, %v8414_v36, %v8415_v6  ;;  %v10426_v46 = vcombine.low %v14756_v42, %v8762_v44 }
 0x399   : > { %v10412_v61 = vcombine.low %v8413_v2, %v8416_v34  ;;  %v10425_v2 = vcombine.low %v14754_v12, %v8761_v58  ;;  %v8763_v12 = vld [vmem:[#allocation2 + $0x8c] sm:$0xf] }
 0x39a   : > { %12124 = vmatpush3.bf16.msra.mxu0 %v13115_v13  ;;  %v8272_v13 = vld [vmem:[#allocation2 + $0x108] sm:$0xc] }
 0x39b   : > { %12125 = vmatprep.subr.bf16.mxu0 %v13118_v56  ;;  %v10398_v20 = vrot.slane %v8272_v13, 10 }
 0x39d   : > { %12094 = vmatmul.mubr.bf16.gmra.mrb[44].mxu0 %v10407_v62  ;;  %v8423_v62 = vsel %vm13620_vm2, %v8421_v60, %v8422_v23  ;;  %v8427_v29 = vsel %vm13620_vm2, %v10398_v20, %v8426_v51 }
 0x39e   : > { %12097 = vmatprep.mubr.bf16.mxu0 %v10408_v7  ;;  %12126 = vmatpush3.bf16.msra.mxu0 %v13118_v56  ;;  %v8429_v56 = vrot.slane %v8274_v15, 6  ;;  %v8433_v7 = vrot.slane %v14852_v27, 6  ;;  %v10413_v45 = vcombine.low %v8420_v22, %v8423_v62  ;;  %v13141_v15 = vld [vmem:[#allocation9 + $0x88] sm:$0xff]  }
 0x39f   : > { %12127 = vmatprep.subr.bf16.mxu0 %v13121_v9 }
 0x3a0   : > { %v8430_v1 = vsel %vm13620_vm2, %v8428_v39, %v8429_v56  ;;  %v8435_v31 = vrot.slane %v8433_v7, 4  ;;  %v8764_v39 = vld [vmem:[#allocation2 + $0x98] sm:$0xf]  ;;  %v13142_v56 = vld [vmem:[#allocation9 + $0x90] sm:$0xff]  }
 0x3a1   : > { %v10414_v50 = vcombine.low %v8427_v29, %v8430_v1  ;;  %v10427_v29 = vcombine.low %v14764_v38, %v8763_v12  ;;  %v10428_v16 = vcombine.low %v14766_v52, %v8764_v39 }
 0x3a2   : > { %12128 = vmatpush3.bf16.msra.mxu0 %v13121_v9  ;;  %v10399_v9 = vrot.slane %v8275_v54, 10  ;;  %v8437_v32 = vsel %vm13620_vm2, %v8435_v31, %v8436_v5 }
 0x3a3   : > { %12161 = vmatprep.subr.bf16.mxu0 %v14835_v25 }
 0x3a4   : > { %v8434_v24 = vsel %vm13620_vm2, %v10399_v9, %v8433_v7 }
 0x3a5   : > { %12098 = vmatmul.mubr.bf16.gmra.mrb[48].mxu0 %v10409_v11  ;;  %v10415_v48 = vcombine.low %v8434_v24, %v8437_v32  ;;  %v8765_v32 = vld [vmem:[#allocation2 + $0xa4] sm:$0xf] }
 0x3a6   : > { %12101 = vmatprep.mubr.bf16.mxu0 %v10410_v41 }
 0x3ad   : > { %12102 = vmatmul.mubr.bf16.gmra.mrb[52].mxu0 %v10411_v30 }
 0x3ae   : > { %12105 = vmatprep.mubr.bf16.mxu0 %v10412_v61 }
 0x3b5   : > { %12106 = vmatmul.mubr.bf16.gmra.mrb[56].mxu0 %v10413_v45 }
 0x3b6   : > { %12109 = vmatprep.mubr.bf16.mxu0 %v10414_v50 }
 0x3ba   : > { %v11603_v17 = vpop.f32.mrb[32].mxu1 }
 0x3bb   : > { %v5126_v18 = vadd.f32 %v11603_v17, %v14870_v19  ;;  %v4960_v11 = vpop.f32.mrb[33].mxu1  ;;  %v13144_v17 = vld [vmem:[#allocation9 + $0xa0] sm:$0xff]  }
 0x3bc   : > { %v5124_v41 = vadd.f32 %v14870_v19, %v4960_v11  ;;  %v11604_v40 = vpop.f32.mrb[34].mxu1 }
 0x3bd   : > { %v5127_v49 = vadd.f32 %v11604_v40, %v14870_v19  ;;  %v4963_v3 = vpop.f32.mrb[35].mxu1  ;;  %12110 = vmatmul.mubr.bf16.gmra.mrb[60].mxu0 %v10415_v48  ;;  %v5158_v36 = vmax.f32 %v5126_v18, 0.0  ;;  %v8766_v48 = vld [vmem:[#allocation2 + $0xb0] sm:$0xf] }
 0x3be   : > { %v5125_v57 = vadd.f32 %v14870_v19, %v4963_v3  ;;  %12129 = vmatprep.mubr.bf16.mxu0 %v10424_v59  ;;  %v5156_v43 = vmax.f32 %v5124_v41, 0.0  ;;  %v10429_v41 = vcombine.low %v14778_v10, %v8765_v32  ;;  %v10430_v3 = vcombine.low %v14780_v33, %v8766_v48  ;;  %v8772_v48 = vld [vmem:[#allocation2 + $0xf8] sm:$0xf] }
 0x3bf   : > { %v5159_v6 = vmax.f32 %v5127_v49, 0.0 }
 0x3c0   : > { %v5157_v47 = vmax.f32 %v5125_v57, 0.0 }
 0x3c1   : > { %v5189_v26 = vpack.c.bf16 %v5159_v6, %v5158_v36  ;;  %v13145_v36 = vld [vmem:[#allocation9 + $0xa8] sm:$0xff]  }
 0x3c2   : > { %v5188_v34 = vpack.c.bf16 %v5157_v47, %v5156_v43  ;;  %v11607_v21 = vpop.f32.mrb[36].mxu1 }
 0x3c3   : > { %v5130_v51 = vadd.f32 %v11607_v21, %v14870_v19  ;;  %v4976_v13 = vpop.f32.mrb[37].mxu1  ;;  %v13146_v21 = vld [vmem:[#allocation9 + $0xb0] sm:$0xff]  }
 0x3c4   : > { %v5128_v30 = vadd.f32 %v14870_v19, %v4976_v13  ;;  %v11608_v61 = vpop.f32.mrb[38].mxu1  ;;  %11649 = vmatprep.mubr.bf16.mxu1 %v5188_v34  ;;  %v8768_v34 = vld [vmem:[#allocation2 + $0xc8] sm:$0xf] }
 0x3c5   : > { %v5131_v63 = vadd.f32 %v11608_v61, %v14870_v19  ;;  %v4979_v60 = vpop.f32.mrb[39].mxu1  ;;  %11650 = vmatmul.mubr.bf16.vlgmr.msra.gmra.mrb[64].mxu1 %v5189_v26  ;;  %12130 = vmatmul.mubr.bf16.vlgmr.msra.gmra.mrb[32].mxu0 %v10425_v2  ;;  %v5162_v42 = vmax.f32 %v5130_v51, 0.0  ;;  %v8767_v26 = vld [vmem:[#allocation2 + $0xbc] sm:$0xf] }
 0x3c6   : > { %v5129_v23 = vadd.f32 %v14870_v19, %v4979_v60  ;;  %12133 = vmatprep.mubr.bf16.mxu0 %v10426_v46  ;;  %12162 = vmatpush3.bf16.msra.mxu0 %v14835_v25  ;;  %v5160_v22 = vmax.f32 %v5128_v30, 0.0  ;;  %v13143_v25 = vld [vmem:[#allocation9 + $0x98] sm:$0xff]  }
 0x3c7   : > { %v5163_v20 = vmax.f32 %v5131_v63, 0.0  ;;  %12163 = vmatprep.subr.bf16.mxu0 %v13141_v15  ;;  %v10432_v63 = vcombine.low %v14795_v55, %v8768_v34 }
 0x3c8   : > { %v5161_v62 = vmax.f32 %v5129_v23, 0.0 }
 0x3c9   : > { %v5191_v7 = vpack.c.bf16 %v5163_v20, %v5162_v42 }
 0x3ca   : > { %v5190_v1 = vpack.c.bf16 %v5161_v62, %v5160_v22  ;;  %v11611_v54 = vpop.f32.mrb[40].mxu1  ;;  %12164 = vmatpush3.bf16.msra.mxu0 %v13141_v15  ;;  %v10431_v15 = vcombine.low %v14793_v4, %v8767_v26  ;;  %v8770_v62 = vld [vmem:[#allocation2 + $0xe0] sm:$0xf] }
 0x3cb   : > { %v5134_v45 = vadd.f32 %v11611_v54, %v14870_v19  ;;  %v4992_v50 = vpop.f32.mrb[41].mxu1  ;;  %12165 = vmatprep.subr.bf16.mxu0 %v13142_v56 }
 0x3cc   : > { %v5132_v9 = vadd.f32 %v14870_v19, %v4992_v50  ;;  %v11612_v31 = vpop.f32.mrb[42].mxu1  ;;  %11653 = vmatprep.mubr.bf16.mxu1 %v5190_v1  ;;  %v10434_v50 = vcombine.low %v14809_v28, %v8770_v62 }
 0x3cd   : > { %v5135_v5 = vadd.f32 %v11612_v31, %v14870_v19  ;;  %v4995_v24 = vpop.f32.mrb[43].mxu1  ;;  %11654 = vmatmul.mubr.bf16.gmra.mrb[68].mxu1 %v5191_v7  ;;  %12134 = vmatmul.mubr.bf16.gmra.mrb[36].mxu0 %v10427_v29  ;;  %v5166_v52 = vmax.f32 %v5134_v45, 0.0 }
 0x3ce   : > { %v5133_v38 = vadd.f32 %v14870_v19, %v4995_v24  ;;  %12137 = vmatprep.mubr.bf16.mxu0 %v10428_v16  ;;  %12166 = vmatpush3.bf16.msra.mxu0 %v13142_v56  ;;  %v5164_v59 = vmax.f32 %v5132_v9, 0.0  ;;  %v8769_v56 = vld [vmem:[#allocation2 + $0xd4] sm:$0xf] }
 0x3cf   : > { %v5167_v53 = vmax.f32 %v5135_v5, 0.0  ;;  %12167 = vmatprep.subr.bf16.mxu0 %v13143_v25  ;;  %v10433_v54 = vcombine.low %v14807_v35, %v8769_v56  ;;  %v8771_v35 = vld [vmem:[#allocation2 + $0xec] sm:$0xf]  ;;  %v13147_v56 = vld [vmem:[#allocation9 + $0xb8] sm:$0xff]  }
 0x3d0   : > { %v5165_v18 = vmax.f32 %v5133_v38, 0.0 }
 0x3d1   : > { %v5193_v11 = vpack.c.bf16 %v5167_v53, %v5166_v52 }
 0x3d2   : > { %v5192_v40 = vpack.c.bf16 %v5165_v18, %v5164_v59  ;;  %v11615_v49 = vpop.f32.mrb[44].mxu1  ;;  %12168 = vmatpush3.bf16.msra.mxu0 %v13143_v25  ;;  %v10435_v18 = vcombine.low %v14821_v8, %v8771_v35  ;;  %v8773_v8 = vld [vmem:[#allocation2 + $0x104] sm:$0xf] }
 0x3d3   : > { %v5138_v57 = vadd.f32 %v11615_v49, %v14870_v19  ;;  %v5008_v58 = vpop.f32.mrb[45].mxu1  ;;  %12169 = vmatprep.subr.bf16.mxu0 %v13144_v17 }
 0x3d4   : > { %v5136_v6 = vadd.f32 %v14870_v19, %v5008_v58  ;;  %v11616_v44 = vpop.f32.mrb[46].mxu1  ;;  %11657 = vmatprep.mubr.bf16.mxu1 %v5192_v40  ;;  %v10436_v40 = vcombine.low %v14823_v0, %v8772_v48 }
 0x3d5   : > { %v5139_v43 = vadd.f32 %v11616_v44, %v14870_v19  ;;  %v5011_v47 = vpop.f32.mrb[47].mxu1  ;;  %11658 = vmatmul.mubr.bf16.gmra.mrb[72].mxu1 %v5193_v11  ;;  %12138 = vmatmul.mubr.bf16.gmra.mrb[40].mxu0 %v10429_v41  ;;  %v5170_v33 = vmax.f32 %v5138_v57, 0.0 }
 0x3d6   : > { %v5137_v10 = vadd.f32 %v14870_v19, %v5011_v47  ;;  %12141 = vmatprep.mubr.bf16.mxu0 %v10430_v3  ;;  %12170 = vmatpush3.bf16.msra.mxu0 %v13144_v17  ;;  %v5168_v46 = vmax.f32 %v5136_v6, 0.0 }
 0x3d7   : > { %v5171_v2 = vmax.f32 %v5139_v43, 0.0  ;;  %12171 = vmatprep.subr.bf16.mxu0 %v13145_v36 }
 0x3d8   : > { %v5169_v51 = vmax.f32 %v5137_v10, 0.0  ;;  %v8774_v10 = vld [vmem:[#allocation2 + $0x110] sm:$0xf] }
 0x3d9   : > { %v5195_v13 = vpack.c.bf16 %v5171_v2, %v5170_v33  ;;  %v10437_v2 = vcombine.low %v14837_v37, %v8773_v8  ;;  %v8775_v37 = vld [vmem:[#allocation2 + $0x11c] sm:$0xf] }
 0x3da   : > { %v5194_v30 = vpack.c.bf16 %v5169_v51, %v5168_v46  ;;  %v11619_v61 = vpop.f32.mrb[48].mxu1  ;;  %12172 = vmatpush3.bf16.msra.mxu0 %v13145_v36  ;;  %v10438_v46 = vcombine.low %v14840_v14, %v8774_v10 }
 0x3db   : > { %v5142_v60 = vadd.f32 %v11619_v61, %v14870_v19  ;;  %v5024_v23 = vpop.f32.mrb[49].mxu1  ;;  %12173 = vmatprep.subr.bf16.mxu0 %v13146_v21 }
 0x3dc   : > { %v5140_v12 = vadd.f32 %v14870_v19, %v5024_v23  ;;  %v11620_v42 = vpop.f32.mrb[50].mxu1  ;;  %11661 = vmatprep.mubr.bf16.mxu1 %v5194_v30 }
 0x3dd   : > { %v5143_v20 = vadd.f32 %v11620_v42, %v14870_v19  ;;  %v5027_v39 = vpop.f32.mrb[51].mxu1  ;;  %11662 = vmatmul.mubr.bf16.gmra.mrb[76].mxu1 %v5195_v13  ;;  %12142 = vmatmul.mubr.bf16.gmra.mrb[44].mxu0 %v10431_v15  ;;  %v5174_v55 = vmax.f32 %v5142_v60, 0.0 }
 0x3de   : > { %v5141_v4 = vadd.f32 %v14870_v19, %v5027_v39  ;;  %12145 = vmatprep.mubr.bf16.mxu0 %v10432_v63  ;;  %12174 = vmatpush3.bf16.msra.mxu0 %v13146_v21  ;;  %v5172_v7 = vmax.f32 %v5140_v12, 0.0  ;;  %v10439_v39 = vcombine.low %v14852_v27, %v8775_v37 }
 0x3df   : > { %v5175_v22 = vmax.f32 %v5143_v20, 0.0  ;;  %12175 = vmatprep.subr.bf16.mxu0 %v13147_v56 }
 0x3e0   : > { %v5173_v29 = vmax.f32 %v5141_v4, 0.0 }
 0x3e1   : > { %v5197_v1 = vpack.c.bf16 %v5175_v22, %v5174_v55 }
 0x3e2   : > { %v5196_v16 = vpack.c.bf16 %v5173_v29, %v5172_v7  ;;  %v11623_v45 = vpop.f32.mrb[52].mxu1  ;;  %12176 = vmatpush3.bf16.msra.mxu0 %v13147_v56 }
 0x3e3   : > { %v5146_v25 = vadd.f32 %v11623_v45, %v14870_v19  ;;  %v5040_v9 = vpop.f32.mrb[53].mxu1 }
 0x3e4   : > { %v5144_v31 = vadd.f32 %v14870_v19, %v5040_v9  ;;  %v11624_v5 = vpop.f32.mrb[54].mxu1  ;;  %11665 = vmatprep.mubr.bf16.mxu1 %v5196_v16 }
 0x3e5   : > { %v5147_v24 = vadd.f32 %v11624_v5, %v14870_v19  ;;  %v5043_v38 = vpop.f32.mrb[55].mxu1  ;;  %11666 = vmatmul.mubr.bf16.gmra.mrb[80].mxu1 %v5197_v1  ;;  %12146 = vmatmul.mubr.bf16.gmra.mrb[48].mxu0 %v10433_v54  ;;  %v5178_v52 = vmax.f32 %v5146_v25, 0.0 }
 0x3e6   : > { %v5145_v32 = vadd.f32 %v14870_v19, %v5043_v38  ;;  %12149 = vmatprep.mubr.bf16.mxu0 %v10434_v50  ;;  %v5176_v28 = vmax.f32 %v5144_v31, 0.0 }
 0x3e7   : > { %v5179_v53 = vmax.f32 %v5147_v24, 0.0 }
 0x3e8   : > { %v5177_v17 = vmax.f32 %v5145_v32, 0.0 }
 0x3e9   : > { %v5199_v59 = vpack.c.bf16 %v5179_v53, %v5178_v52 }
 0x3ea   : > { %v5198_v11 = vpack.c.bf16 %v5177_v17, %v5176_v28  ;;  %v11627_v41 = vpop.f32.mrb[56].mxu1 }
 0x3eb   : > { %v5150_v49 = vadd.f32 %v11627_v41, %v14870_v19  ;;  %v5056_v3 = vpop.f32.mrb[57].mxu1 }
 0x3ec   : > { %v5148_v57 = vadd.f32 %v14870_v19, %v5056_v3  ;;  %v11628_v58 = vpop.f32.mrb[58].mxu1  ;;  %11669 = vmatprep.mubr.bf16.mxu1 %v5198_v11 }
 0x3ed   : > { %v5151_v36 = vadd.f32 %v11628_v58, %v14870_v19  ;;  %v5059_v6 = vpop.f32.mrb[59].mxu1  ;;  %11670 = vmatmul.mubr.bf16.gmra.mrb[84].mxu1 %v5199_v59  ;;  %12150 = vmatmul.mubr.bf16.gmra.mrb[52].mxu0 %v10435_v18  ;;  %v5182_v43 = vmax.f32 %v5150_v49, 0.0 }
 0x3ee   : > { %v5149_v44 = vadd.f32 %v14870_v19, %v5059_v6  ;;  %12153 = vmatprep.mubr.bf16.mxu0 %v10436_v40  ;;  %v5180_v0 = vmax.f32 %v5148_v57, 0.0 }
 0x3ef   : > { %v5183_v47 = vmax.f32 %v5151_v36, 0.0 }
 0x3f0   : > { %v5181_v26 = vmax.f32 %v5149_v44, 0.0 }
 0x3f1   : > { %v5201_v33 = vpack.c.bf16 %v5183_v47, %v5182_v43 }
 0x3f2   : > { %v5200_v34 = vpack.c.bf16 %v5181_v26, %v5180_v0  ;;  %v11631_v21 = vpop.f32.mrb[60].mxu1 }
 0x3f3   : > { %v5154_v51 = vadd.f32 %v11631_v21, %v14870_v19  ;;  %v5072_v13 = vpop.f32.mrb[61].mxu1 }
 0x3f4   : > { %v5152_v15 = vadd.f32 %v14870_v19, %v5072_v13  ;;  %v11632_v30 = vpop.f32.mrb[62].mxu1  ;;  %11673 = vmatprep.mubr.bf16.mxu1 %v5200_v34 }
 0x3f5   : > { %v5155_v61 = vadd.f32 %v11632_v30, %v14870_v19  ;;  %v5075_v63 = vpop.f32.mrb[63].mxu1  ;;  %11674 = vmatmul.mubr.bf16.gmra.mrb[88].mxu1 %v5201_v33  ;;  %12154 = vmatmul.mubr.bf16.gmra.mrb[56].mxu0 %v10437_v2  ;;  %v5186_v23 = vmax.f32 %v5154_v51, 0.0 }
 0x3f6   : > { %v5153_v60 = vadd.f32 %v14870_v19, %v5075_v63  ;;  %12157 = vmatprep.mubr.bf16.mxu0 %v10438_v46  ;;  %v5184_v42 = vmax.f32 %v5152_v15, 0.0  ;;  %v14924_v19 = vld [vmem:[%s15171_s5 + $0x2] ss:$0 sm:$0xff] }
 0x3f7   : > { %v5187_v12 = vmax.f32 %v5155_v61, 0.0 }
 0x3f8   : > { %v5185_v14 = vmax.f32 %v5153_v60, 0.0 }
 0x3f9   : > { %v5203_v20 = vpack.c.bf16 %v5187_v12, %v5186_v23 }
 0x3fa   : > { %v5202_v4 = vpack.c.bf16 %v5185_v14, %v5184_v42 }
 0x3fc   : > { %11677 = vmatprep.mubr.bf16.mxu1 %v5202_v4 }
 0x3fd   : > { %11678 = vmatmul.mubr.bf16.gmra.mrb[92].mxu1 %v5203_v20  ;;  %12158 = vmatmul.mubr.bf16.gmra.mrb[60].mxu0 %v10439_v39 }
 0x498   : > { %v14926_v55 = vpop.f32.mrb[64].mxu1  ;;  %v12131_v22 = vpop.f32.mrb[32].mxu0 }
 0x499   : > { %v9121_v62 = vadd.f32 %v12131_v22, %v14924_v19  ;;  %v14929_v7 = vpop.f32.mrb[65].mxu1  ;;  %v8955_v27 = vpop.f32.mrb[33].mxu0 }
 0x49a   : > { %v9119_v29 = vadd.f32 %v14924_v19, %v8955_v27  ;;  %v14932_v1 = vpop.f32.mrb[66].mxu1  ;;  %v12132_v54 = vpop.f32.mrb[34].mxu0 }
 0x49b   : > { %v9122_v16 = vadd.f32 %v12132_v54, %v14924_v19  ;;  %v14935_v45 = vpop.f32.mrb[67].mxu1  ;;  %v8958_v50 = vpop.f32.mrb[35].mxu0  ;;  %v9153_v9 = vmax.f32 %v9121_v62, 0.0 }
 0x49c   : > { %v9120_v25 = vadd.f32 %v14924_v19, %v8958_v50  ;;  %v9151_v5 = vmax.f32 %v9119_v29, 0.0 }
 0x49d   : > { %v9154_v31 = vmax.f32 %v9122_v16, 0.0 }
 0x49e   : > { %v9152_v24 = vmax.f32 %v9120_v25, 0.0 }
 0x49f   : > { %v9184_v38 = vpack.c.bf16 %v9154_v31, %v9153_v9 }
 0x4a0   : > { %v9183_v32 = vpack.c.bf16 %v9152_v24, %v9151_v5  ;;  %v14938_v35 = vpop.f32.mrb[68].mxu1  ;;  %v12135_v52 = vpop.f32.mrb[36].mxu0 }
 0x4a1   : > { %v9125_v53 = vadd.f32 %v12135_v52, %v14924_v19  ;;  %v14941_v48 = vpop.f32.mrb[69].mxu1  ;;  %v8971_v28 = vpop.f32.mrb[37].mxu0 }
 0x4a2   : > { %v9123_v17 = vadd.f32 %v14924_v19, %v8971_v28  ;;  %v14944_v59 = vpop.f32.mrb[70].mxu1  ;;  %v12136_v18 = vpop.f32.mrb[38].mxu0  ;;  %12177 = vmatprep.mubr.bf16.mxu0 %v9183_v32 }
 0x4a3   : > { %v9126_v11 = vadd.f32 %v12136_v18, %v14924_v19  ;;  %v14947_v41 = vpop.f32.mrb[71].mxu1  ;;  %v8974_v40 = vpop.f32.mrb[39].mxu0  ;;  %12178 = vmatmul.mubr.bf16.vlgmr.msra.gmra.mrb[0].mxu0 %v9184_v38  ;;  %v9157_v3 = vmax.f32 %v9125_v53, 0.0 }
 0x4a4   : > { %v9124_v49 = vadd.f32 %v14924_v19, %v8974_v40  ;;  %v9155_v58 = vmax.f32 %v9123_v17, 0.0 }
 0x4a5   : > { %v9158_v57 = vmax.f32 %v9126_v11, 0.0 }
 0x4a6   : > { %v9156_v36 = vmax.f32 %v9124_v49, 0.0 }
 0x4a7   : > { %v9186_v6 = vpack.c.bf16 %v9158_v57, %v9157_v3 }
 0x4a8   : > { %v9185_v44 = vpack.c.bf16 %v9156_v36, %v9155_v58  ;;  %v14950_v8 = vpop.f32.mrb[72].mxu1  ;;  %v12139_v43 = vpop.f32.mrb[40].mxu0 }
 0x4a9   : > { %v9129_v47 = vadd.f32 %v12139_v43, %v14924_v19  ;;  %v14953_v10 = vpop.f32.mrb[73].mxu1  ;;  %v8987_v0 = vpop.f32.mrb[41].mxu0 }
 0x4aa   : > { %v9127_v26 = vadd.f32 %v14924_v19, %v8987_v0  ;;  %v14956_v33 = vpop.f32.mrb[74].mxu1  ;;  %v12140_v2 = vpop.f32.mrb[42].mxu0  ;;  %12181 = vmatprep.mubr.bf16.mxu0 %v9185_v44 }
 0x4ab   : > { %v9130_v34 = vadd.f32 %v12140_v2, %v14924_v19  ;;  %v14959_v21 = vpop.f32.mrb[75].mxu1  ;;  %v8990_v46 = vpop.f32.mrb[43].mxu0  ;;  %12182 = vmatmul.mubr.bf16.gmra.mrb[4].mxu0 %v9186_v6  ;;  %v9161_v13 = vmax.f32 %v9129_v47, 0.0 }
 0x4ac   : > { %v9128_v51 = vadd.f32 %v14924_v19, %v8990_v46  ;;  %v9159_v30 = vmax.f32 %v9127_v26, 0.0 }
 0x4ad   : > { %v9162_v15 = vmax.f32 %v9130_v34, 0.0 }
 0x4ae   : > { %v9160_v61 = vmax.f32 %v9128_v51, 0.0 }
 0x4af   : > { %v9188_v63 = vpack.c.bf16 %v9162_v15, %v9161_v13 }
 0x4b0   : > { %v9187_v60 = vpack.c.bf16 %v9160_v61, %v9159_v30  ;;  %v14962_v37 = vpop.f32.mrb[76].mxu1  ;;  %v12143_v23 = vpop.f32.mrb[44].mxu0 }
 0x4b1   : > { %v9133_v12 = vadd.f32 %v12143_v23, %v14924_v19  ;;  %v14965_v42 = vpop.f32.mrb[77].mxu1  ;;  %v9003_v14 = vpop.f32.mrb[45].mxu0 }
 0x4b2   : > { %v9131_v20 = vadd.f32 %v14924_v19, %v9003_v14  ;;  %v14968_v39 = vpop.f32.mrb[78].mxu1  ;;  %v12144_v4 = vpop.f32.mrb[46].mxu0  ;;  %12185 = vmatprep.mubr.bf16.mxu0 %v9187_v60 }
 0x4b3   : > { %v9134_v56 = vadd.f32 %v12144_v4, %v14924_v19  ;;  %v14971_v22 = vpop.f32.mrb[79].mxu1  ;;  %v9006_v62 = vpop.f32.mrb[47].mxu0  ;;  %12186 = vmatmul.mubr.bf16.gmra.mrb[8].mxu0 %v9188_v63  ;;  %v9165_v29 = vmax.f32 %v9133_v12, 0.0 }
 0x4b4   : > { %v9132_v27 = vadd.f32 %v14924_v19, %v9006_v62  ;;  %v9163_v16 = vmax.f32 %v9131_v20, 0.0 }
 0x4b5   : > { %v9166_v54 = vmax.f32 %v9134_v56, 0.0 }
 0x4b6   : > { %v9164_v50 = vmax.f32 %v9132_v27, 0.0 }
 0x4b7   : > { %v9190_v25 = vpack.c.bf16 %v9166_v54, %v9165_v29 }
 0x4b8   : > { %v9189_v9 = vpack.c.bf16 %v9164_v50, %v9163_v16  ;;  %v14974_v31 = vpop.f32.mrb[80].mxu1  ;;  %v12147_v5 = vpop.f32.mrb[48].mxu0 }
 0x4b9   : > { %v9137_v24 = vadd.f32 %v12147_v5, %v14924_v19  ;;  %v14977_v38 = vpop.f32.mrb[81].mxu1  ;;  %v9019_v32 = vpop.f32.mrb[49].mxu0 }
 0x4ba   : > { %v9135_v52 = vadd.f32 %v14924_v19, %v9019_v32  ;;  %v14980_v53 = vpop.f32.mrb[82].mxu1  ;;  %v12148_v28 = vpop.f32.mrb[50].mxu0  ;;  %12189 = vmatprep.mubr.bf16.mxu0 %v9189_v9 }
 0x4bb   : > { %v9138_v17 = vadd.f32 %v12148_v28, %v14924_v19  ;;  %v14983_v18 = vpop.f32.mrb[83].mxu1  ;;  %v9022_v11 = vpop.f32.mrb[51].mxu0  ;;  %12190 = vmatmul.mubr.bf16.gmra.mrb[12].mxu0 %v9190_v25  ;;  %v9169_v49 = vmax.f32 %v9137_v24, 0.0 }
 0x4bc   : > { %v9136_v40 = vadd.f32 %v14924_v19, %v9022_v11  ;;  %v9167_v57 = vmax.f32 %v9135_v52, 0.0 }
 0x4bd   : > { %v9170_v3 = vmax.f32 %v9138_v17, 0.0 }
 0x4be   : > { %v9168_v58 = vmax.f32 %v9136_v40, 0.0 }
 0x4bf   : > { %v9192_v36 = vpack.c.bf16 %v9170_v3, %v9169_v49 }
 0x4c0   : > { %v9191_v6 = vpack.c.bf16 %v9168_v58, %v9167_v57  ;;  %v14986_v44 = vpop.f32.mrb[84].mxu1  ;;  %v12151_v43 = vpop.f32.mrb[52].mxu0 }
 0x4c1   : > { %v9141_v47 = vadd.f32 %v12151_v43, %v14924_v19  ;;  %v14989_v0 = vpop.f32.mrb[85].mxu1  ;;  %v9035_v26 = vpop.f32.mrb[53].mxu0 }
 0x4c2   : > { %v9139_v2 = vadd.f32 %v14924_v19, %v9035_v26  ;;  %v14992_v34 = vpop.f32.mrb[86].mxu1  ;;  %v12152_v46 = vpop.f32.mrb[54].mxu0  ;;  %12193 = vmatprep.mubr.bf16.mxu0 %v9191_v6 }
 0x4c3   : > { %v9142_v51 = vadd.f32 %v12152_v46, %v14924_v19  ;;  %v14995_v13 = vpop.f32.mrb[87].mxu1  ;;  %v9038_v15 = vpop.f32.mrb[55].mxu0  ;;  %12194 = vmatmul.mubr.bf16.gmra.mrb[16].mxu0 %v9192_v36  ;;  %v9173_v61 = vmax.f32 %v9141_v47, 0.0 }
 0x4c4   : > { %v9140_v30 = vadd.f32 %v14924_v19, %v9038_v15  ;;  %v9171_v60 = vmax.f32 %v9139_v2, 0.0 }
 0x4c5   : > { %v9174_v63 = vmax.f32 %v9142_v51, 0.0 }
 0x4c6   : > { %v9172_v23 = vmax.f32 %v9140_v30, 0.0 }
 0x4c7   : > { %v9194_v12 = vpack.c.bf16 %v9174_v63, %v9173_v61 }
 0x4c8   : > { %v9193_v14 = vpack.c.bf16 %v9172_v23, %v9171_v60  ;;  %v14998_v20 = vpop.f32.mrb[88].mxu1  ;;  %v12155_v4 = vpop.f32.mrb[56].mxu0 }
 0x4c9   : > { %v9145_v56 = vadd.f32 %v12155_v4, %v14924_v19  ;;  %v15001_v62 = vpop.f32.mrb[89].mxu1  ;;  %v9051_v27 = vpop.f32.mrb[57].mxu0 }
 0x4ca   : > { %v9143_v29 = vadd.f32 %v14924_v19, %v9051_v27  ;;  %v15004_v54 = vpop.f32.mrb[90].mxu1  ;;  %v12156_v16 = vpop.f32.mrb[58].mxu0  ;;  %12197 = vmatprep.mubr.bf16.mxu0 %v9193_v14 }
 0x4cb   : > { %v9146_v50 = vadd.f32 %v12156_v16, %v14924_v19  ;;  %v15007_v25 = vpop.f32.mrb[91].mxu1  ;;  %v9054_v9 = vpop.f32.mrb[59].mxu0  ;;  %12198 = vmatmul.mubr.bf16.gmra.mrb[20].mxu0 %v9194_v12  ;;  %v9177_v24 = vmax.f32 %v9145_v56, 0.0  ;;  %v15027_v12 = vld [vmem:[%s275_s8] ss:$0 sm:$0xff]  ;;  %s9705_s8 = sshll.u32 %s13618_s19, 4  ;;  %s15114_s8 = int_to_ptr.vmem [resolvable:$true] %s9705_s8 }
 0x4cc   : > { %v9144_v5 = vadd.f32 %v14924_v19, %v9054_v9  ;;  %v9175_v52 = vmax.f32 %v9143_v29, 0.0  ;;  %s13313_s3 = scalar_lea.vmem %s15114_s8, 2048  ;;  %p13320_p11 = scmp.lt.s32.totalorder %s15114_s8, %s13318_s30 }
 0x4cd   : > { %v9178_v32 = vmax.f32 %v9146_v50, 0.0  ;;  %p13314_p1 = scmp.ne.s32.totalorder %s15114_s8, %s13313_s3  ;;  %p13321_p0 = scmp.lt.s32.totalorder %s13319_s11, %s13313_s3 }
 0x4ce   : > { %v9176_v28 = vmax.f32 %v9144_v5, 0.0 }
 0x4cf   : > { %v9196_v17 = vpack.c.bf16 %v9178_v32, %v9177_v24  ;;  %p13315_p8 = pnand %p13314_p1, %p15198_p13  ;;  %p13322_p2 = por %p13321_p0, %p13320_p11 }
 0x4d0   : > { %v9195_v11 = vpack.c.bf16 %v9176_v28, %v9175_v52  ;;  %v15010_v40 = vpop.f32.mrb[92].mxu1  ;;  %v12159_v49 = vpop.f32.mrb[60].mxu0 }
 0x4d1   : > { %v9149_v3 = vadd.f32 %v12159_v49, %v14924_v19  ;;  %v15013_v57 = vpop.f32.mrb[93].mxu1  ;;  %v9067_v58 = vpop.f32.mrb[61].mxu0  ;;  %p13316_p10 = pneg %p13315_p8 }
 0x4d2   : > { %v9147_v36 = vadd.f32 %v14924_v19, %v9067_v58  ;;  %v15016_v6 = vpop.f32.mrb[94].mxu1  ;;  %v12160_v43 = vpop.f32.mrb[62].mxu0  ;;  %12201 = vmatprep.mubr.bf16.mxu0 %v9195_v11 }
 0x4d3   : > { %v9150_v47 = vadd.f32 %v12160_v43, %v14924_v19  ;;  %v15019_v26 = vpop.f32.mrb[95].mxu1  ;;  %v9070_v2 = vpop.f32.mrb[63].mxu0  ;;  %12202 = vmatmul.mubr.bf16.gmra.mrb[24].mxu0 %v9196_v17  ;;  %v9181_v51 = vmax.f32 %v9149_v3, 0.0  ;;  %p13323_p3 = pnand %p13322_p2, %p13316_p10 }
 0x4d4   : > { %v9148_v46 = vadd.f32 %v14924_v19, %v9070_v2  ;;  %v9179_v30 = vmax.f32 %v9147_v36, 0.0 }
 0x4d5   : > { %v9182_v15 = vmax.f32 %v9150_v47, 0.0 }
 0x4d6   : > { %v9180_v61 = vmax.f32 %v9148_v46, 0.0 }
 0x4d7   : > { %v9198_v63 = vpack.c.bf16 %v9182_v15, %v9181_v51 }
 0x4d8   : > { %v9197_v60 = vpack.c.bf16 %v9180_v61, %v9179_v30 }
 0x4da   : > { %12205 = vmatprep.mubr.bf16.mxu0 %v9197_v60 }
 0x4db   : > { %12206 = vmatmul.mubr.bf16.gmra.mrb[28].mxu0 %v9198_v63 }
 0x576   : > { %v12179_v23 = vpop.f32.mrb[0].mxu0 }
 0x577   : > { %v12209_v14 = vadd.f32 %v12179_v23, %v14926_v55  ;;  %v9298_v4 = vpop.f32.mrb[1].mxu0 }
 0x578   : > { %v12210_v19 = vadd.f32 %v9298_v4, %v14929_v7  ;;  %v12180_v56 = vpop.f32.mrb[2].mxu0 }
 0x579   : > { %v9466_v27 = vadd.f32 %v12209_v14, %v15027_v12  ;;  %v12211_v29 = vadd.f32 %v12180_v56, %v14932_v1  ;;  %v9301_v16 = vpop.f32.mrb[3].mxu0 }
 0x57a   : > { %v9464_v50 = vadd.f32 %v12210_v19, %v15027_v12  ;;  %v12212_v9 = vadd.f32 %v9301_v16, %v14935_v45 }
 0x57b   : > { %v9467_v5 = vadd.f32 %v12211_v29, %v15027_v12  ;;  %v9498_v55 = vmax.f32 %v9466_v27, 0.0 }
 0x57c   : > { %v9465_v24 = vadd.f32 %v12212_v9, %v15027_v12  ;;  %v9496_v52 = vmax.f32 %v9464_v50, 0.0 }
 0x57d   : > { %v9499_v32 = vmax.f32 %v9467_v5, 0.0 }
 0x57e   : > { %v9497_v7 = vmax.f32 %v9465_v24, 0.0  ;;  %v12183_v28 = vpop.f32.mrb[4].mxu0 }
 0x57f   : > { %v10538_v17 = vpack.c.bf16 %v9499_v32, %v9498_v55  ;;  %v12213_v11 = vadd.f32 %v12183_v28, %v14938_v35  ;;  %v9314_v1 = vpop.f32.mrb[5].mxu0 }
 0x580   : > { %v10533_v49 = vpack.c.bf16 %v9497_v7, %v9496_v52  ;;  %v12214_v3 = vadd.f32 %v9314_v1, %v14941_v48  ;;  %v12184_v58 = vpop.f32.mrb[6].mxu0 }
 0x581   : > { %10610 = vst [vmem:[%s13618_s19 + $0x8] sm:$0xff] %v10538_v17   ;;  %v9470_v45 = vadd.f32 %v12213_v11, %v15027_v12  ;;  %v12215_v36 = vadd.f32 %v12184_v58, %v14944_v59  ;;  %v9317_v43 = vpop.f32.mrb[7].mxu0 }
 0x582   : > { %10534 = vst [vmem:[%s13618_s19] sm:$0xff] %v10533_v49   ;;  %v9468_v47 = vadd.f32 %v12214_v3, %v15027_v12  ;;  %v12216_v2 = vadd.f32 %v9317_v43, %v14947_v41 }
 0x583   : > { %v9471_v46 = vadd.f32 %v12215_v36, %v15027_v12  ;;  %v9502_v51 = vmax.f32 %v9470_v45, 0.0 }
 0x584   : > { %v9469_v35 = vadd.f32 %v12216_v2, %v15027_v12  ;;  %v9500_v15 = vmax.f32 %v9468_v47, 0.0 }
 0x585   : > { %v9503_v48 = vmax.f32 %v9471_v46, 0.0 }
 0x586   : > { %v9501_v30 = vmax.f32 %v9469_v35, 0.0  ;;  %v12187_v61 = vpop.f32.mrb[8].mxu0 }
 0x587   : > { %v10548_v63 = vpack.c.bf16 %v9503_v48, %v9502_v51  ;;  %v12217_v59 = vadd.f32 %v12187_v61, %v14950_v8  ;;  %v9330_v60 = vpop.f32.mrb[9].mxu0 }
 0x588   : > { %v10543_v23 = vpack.c.bf16 %v9501_v30, %v9500_v15  ;;  %v12218_v14 = vadd.f32 %v9330_v60, %v14953_v10  ;;  %v12188_v4 = vpop.f32.mrb[10].mxu0 }
 0x589   : > { %10612 = vst [vmem:[%s13618_s19 + $0x18] sm:$0xff] %v10548_v63   ;;  %v9474_v41 = vadd.f32 %v12217_v59, %v15027_v12  ;;  %v12219_v19 = vadd.f32 %v12188_v4, %v14956_v33  ;;  %v9333_v56 = vpop.f32.mrb[11].mxu0 }
 0x58a   : > { %10611 = vst [vmem:[%s13618_s19 + $0x10] sm:$0xff] %v10543_v23   ;;  %v9472_v27 = vadd.f32 %v12218_v14, %v15027_v12  ;;  %v12220_v29 = vadd.f32 %v9333_v56, %v14959_v21 }
 0x58b   : > { %v9475_v16 = vadd.f32 %v12219_v19, %v15027_v12  ;;  %v9506_v50 = vmax.f32 %v9474_v41, 0.0 }
 0x58c   : > { %v9473_v8 = vadd.f32 %v12220_v29, %v15027_v12  ;;  %v9504_v9 = vmax.f32 %v9472_v27, 0.0 }
 0x58d   : > { %v9507_v10 = vmax.f32 %v9475_v16, 0.0 }
 0x58e   : > { %v9505_v5 = vmax.f32 %v9473_v8, 0.0  ;;  %v12191_v24 = vpop.f32.mrb[12].mxu0 }
 0x58f   : > { %v10558_v55 = vpack.c.bf16 %v9507_v10, %v9506_v50  ;;  %v12221_v33 = vadd.f32 %v12191_v24, %v14962_v37  ;;  %v9346_v32 = vpop.f32.mrb[13].mxu0 }
 0x590   : > { %v10553_v52 = vpack.c.bf16 %v9505_v5, %v9504_v9  ;;  %v12222_v7 = vadd.f32 %v9346_v32, %v14965_v42  ;;  %v12192_v28 = vpop.f32.mrb[14].mxu0 }
 0x591   : > { %10614 = vst [vmem:[%s13618_s19 + $0x28] sm:$0xff] %v10558_v55   ;;  %v9478_v21 = vadd.f32 %v12221_v33, %v15027_v12  ;;  %v12223_v17 = vadd.f32 %v12192_v28, %v14968_v39  ;;  %v9349_v11 = vpop.f32.mrb[15].mxu0 }
 0x592   : > { %10613 = vst [vmem:[%s13618_s19 + $0x20] sm:$0xff] %v10553_v52   ;;  %v9476_v1 = vadd.f32 %v12222_v7, %v15027_v12  ;;  %v12224_v49 = vadd.f32 %v9349_v11, %v14971_v22 }
 0x593   : > { %v9479_v3 = vadd.f32 %v12223_v17, %v15027_v12  ;;  %v9510_v58 = vmax.f32 %v9478_v21, 0.0 }
 0x594   : > { %v9477_v37 = vadd.f32 %v12224_v49, %v15027_v12  ;;  %v9508_v45 = vmax.f32 %v9476_v1, 0.0 }
 0x595   : > { %v9511_v42 = vmax.f32 %v9479_v3, 0.0 }
 0x596   : > { %v9509_v36 = vmax.f32 %v9477_v37, 0.0  ;;  %v12195_v43 = vpop.f32.mrb[16].mxu0 }
 0x597   : > { %v10568_v47 = vpack.c.bf16 %v9511_v42, %v9510_v58  ;;  %v12225_v39 = vadd.f32 %v12195_v43, %v14974_v31  ;;  %v9362_v2 = vpop.f32.mrb[17].mxu0 }
 0x598   : > { %v10563_v46 = vpack.c.bf16 %v9509_v36, %v9508_v45  ;;  %v12226_v35 = vadd.f32 %v9362_v2, %v14977_v38  ;;  %v12196_v51 = vpop.f32.mrb[18].mxu0 }
 0x599   : > { %10616 = vst [vmem:[%s13618_s19 + $0x38] sm:$0xff] %v10568_v47   ;;  %v9482_v22 = vadd.f32 %v12225_v39, %v15027_v12  ;;  %v12227_v48 = vadd.f32 %v12196_v51, %v14980_v53  ;;  %v9365_v15 = vpop.f32.mrb[19].mxu0 }
 0x59a   : > { %10615 = vst [vmem:[%s13618_s19 + $0x30] sm:$0xff] %v10563_v46   ;;  %v9480_v30 = vadd.f32 %v12226_v35, %v15027_v12  ;;  %v12228_v61 = vadd.f32 %v9365_v15, %v14983_v18 }
 0x59b   : > { %v9483_v63 = vadd.f32 %v12227_v48, %v15027_v12  ;;  %v9514_v59 = vmax.f32 %v9482_v22, 0.0 }
 0x59c   : > { %v9481_v31 = vadd.f32 %v12228_v61, %v15027_v12  ;;  %v9512_v60 = vmax.f32 %v9480_v30, 0.0 }
 0x59d   : > { %v9515_v38 = vmax.f32 %v9483_v63, 0.0 }
 0x59e   : > { %v9513_v23 = vmax.f32 %v9481_v31, 0.0  ;;  %v12199_v14 = vpop.f32.mrb[20].mxu0 }
 0x59f   : > { %v10578_v4 = vpack.c.bf16 %v9515_v38, %v9514_v59  ;;  %v12229_v53 = vadd.f32 %v12199_v14, %v14986_v44  ;;  %v9378_v41 = vpop.f32.mrb[21].mxu0 }
 0x5a0   : > { %v10573_v19 = vpack.c.bf16 %v9513_v23, %v9512_v60  ;;  %v12230_v56 = vadd.f32 %v9378_v41, %v14989_v0  ;;  %v12200_v27 = vpop.f32.mrb[22].mxu0 }
 0x5a1   : > { %10618 = vst [vmem:[%s13618_s19 + $0x48] sm:$0xff] %v10578_v4   ;;  %v9486_v18 = vadd.f32 %v12229_v53, %v15027_v12  ;;  %v12231_v29 = vadd.f32 %v12200_v27, %v14992_v34  ;;  %v9381_v16 = vpop.f32.mrb[23].mxu0 }
 0x5a2   : > { %10617 = vst [vmem:[%s13618_s19 + $0x40] sm:$0xff] %v10573_v19   ;;  %v9484_v8 = vadd.f32 %v12230_v56, %v15027_v12  ;;  %v12232_v50 = vadd.f32 %v9381_v16, %v14995_v13 }
 0x5a3   : > { %v9487_v10 = vadd.f32 %v12231_v29, %v15027_v12  ;;  %v9518_v9 = vmax.f32 %v9486_v18, 0.0 }
 0x5a4   : > { %v9485_v44 = vadd.f32 %v12232_v50, %v15027_v12  ;;  %v9516_v5 = vmax.f32 %v9484_v8, 0.0 }
 0x5a5   : > { %v9519_v0 = vmax.f32 %v9487_v10, 0.0 }
 0x5a6   : > { %v9517_v24 = vmax.f32 %v9485_v44, 0.0  ;;  %v12203_v55 = vpop.f32.mrb[24].mxu0 }
 0x5a7   : > { %v10588_v33 = vpack.c.bf16 %v9519_v0, %v9518_v9  ;;  %v12233_v34 = vadd.f32 %v12203_v55, %v14998_v20  ;;  %v9394_v32 = vpop.f32.mrb[25].mxu0 }
 0x5a8   : > { %v10583_v52 = vpack.c.bf16 %v9517_v24, %v9516_v5  ;;  %v12234_v7 = vadd.f32 %v9394_v32, %v15001_v62  ;;  %v12204_v28 = vpop.f32.mrb[26].mxu0 }
 0x5a9   : > { %10620 = vst [vmem:[%s13618_s19 + $0x58] sm:$0xff] %v10588_v33   ;;  %v9490_v13 = vadd.f32 %v12233_v34, %v15027_v12  ;;  %v12235_v21 = vadd.f32 %v12204_v28, %v15004_v54  ;;  %v9397_v17 = vpop.f32.mrb[27].mxu0 }
 0x5aa   : > { %10619 = vst [vmem:[%s13618_s19 + $0x50] sm:$0xff] %v10583_v52   ;;  %v9488_v11 = vadd.f32 %v12234_v7, %v15027_v12  ;;  %v12236_v1 = vadd.f32 %v9397_v17, %v15007_v25 }
 0x5ab   : > { %v9491_v49 = vadd.f32 %v12235_v21, %v15027_v12  ;;  %v9522_v3 = vmax.f32 %v9490_v13, 0.0 }
 0x5ac   : > { %v9489_v20 = vadd.f32 %v12236_v1, %v15027_v12  ;;  %v9520_v37 = vmax.f32 %v9488_v11, 0.0 }
 0x5ad   : > { %v9523_v62 = vmax.f32 %v9491_v49, 0.0 }
 0x5ae   : > { %v9521_v58 = vmax.f32 %v9489_v20, 0.0  ;;  %v12207_v42 = vpop.f32.mrb[28].mxu0 }
 0x5af   : > { %v10598_v45 = vpack.c.bf16 %v9523_v62, %v9522_v3  ;;  %v12237_v54 = vadd.f32 %v12207_v42, %v15010_v40  ;;  %v9410_v36 = vpop.f32.mrb[29].mxu0 }
 0x5b0   : > { %v10593_v43 = vpack.c.bf16 %v9521_v58, %v9520_v37  ;;  %v12238_v47 = vadd.f32 %v9410_v36, %v15013_v57  ;;  %v12208_v25 = vpop.f32.mrb[30].mxu0 }
 0x5b1   : > { %10622 = vst [vmem:[%s13618_s19 + $0x68] sm:$0xff] %v10598_v45   ;;  %v9494_v39 = vadd.f32 %v12237_v54, %v15027_v12  ;;  %v12239_v2 = vadd.f32 %v12208_v25, %v15016_v6  ;;  %v9413_v46 = vpop.f32.mrb[31].mxu0 }
 0x5b2   : > { %10621 = vst [vmem:[%s13618_s19 + $0x60] sm:$0xff] %v10593_v43   ;;  %v9492_v35 = vadd.f32 %v12238_v47, %v15027_v12  ;;  %v12240_v51 = vadd.f32 %v9413_v46, %v15019_v26 }
 0x5b3   : > { %v9495_v40 = vadd.f32 %v12239_v2, %v15027_v12  ;;  %v9526_v57 = vmax.f32 %v9494_v39, 0.0 }
 0x5b4   : > { %v9493_v22 = vadd.f32 %v12240_v51, %v15027_v12  ;;  %v9524_v15 = vmax.f32 %v9492_v35, 0.0 }
 0x5b5   : > { %v9527_v48 = vmax.f32 %v9495_v40, 0.0 }
 0x5b6   : > { %v9525_v6 = vmax.f32 %v9493_v22, 0.0 }
 0x5b7   : > { %v10608_v30 = vpack.c.bf16 %v9527_v48, %v9526_v57 }
 0x5b8   : > { %v10603_v26 = vpack.c.bf16 %v9525_v6, %v9524_v15 }
 0x5b9   : > { %10624 = vst [vmem:[%s13618_s19 + $0x78] sm:$0xff] %v10608_v30  }
 0x5ba   : > { %10623 = vst [vmem:[%s13618_s19 + $0x70] sm:$0xff] %v10603_v26  }
 0x5bb   : > { %13326 = shalt.err (!%p13323_p3)
}
 0x5bc   : > { %s13327_s15 = scalar_lea.hbm %s15112_s17, 2048  ;;  %s13331_s10 = scalar_lea.hbm %s15172_s6, 4096 }
 0x5bd   : > { %p13328_p5 = scmp.ne.s32.totalorder %s15112_s17, %s13327_s15  ;;  %p13332_p9 = scmp.lt.u32.totalorder %s15112_s17, %s15172_s6 }
 0x5be   : > { %p13333_p12 = scmp.lt.u32.totalorder %s13331_s10, %s13327_s15  ;;  %p13335_p1 = scmp.lt.u32.totalorder %s13327_s15, %s15112_s17 }
 0x5bf   : > { %p13329_p6 = pnand %p13328_p5, %p15198_p13 }
 0x5c0   : > { %p13334_p4 = por %p13333_p12, %p13332_p9 }
 0x5c1   : > { %p13330_p7 = pneg %p13329_p6 }
 0x5c2   : > { %p13336_p8 = por %p13335_p1, %p13334_p4 }
 0x5c4   : > { %p13337_p10 = pnand %p13336_p8, %p13330_p7 }
 0x5c6   : > { %13340 = shalt.err (!%p13337_p10)
}
 0x5c7   : > { %s13410_s27 = smov 64   ;;  %s13411_s28 = smov 4  }
 0x5c8   : > { %12797 = dma.vmem_to_hbm [thread:$0]  (%p15198_p13), %s15114_s8, 2048, %s15112_s17, %s15120_s24, %s13410_s27, %s13410_s27, %s13411_s28  }
 0x5c9 PF: > { %p12819_p11 = scmp.ge.s32.totalorder %s13401_s26, 2  ;;  %s9720_s13 = sand.u32 1, %s13381_s21  }
 0x5ca   : > { %p15199_p0 = scmp.ne.s32.totalorder %s15183_s9, 0  ;;  %s9721_s18 = scalar_lea.sflag [#allocation6], %s9720_s13 }
 0x5cc   : > { %p12810_p2 = pnand %p12819_p11, %p15199_p0 }
 0x5ce   : > { %13376 = dma.done.wait (!%p12810_p2), %s9721_s18, 2048  }
 0x5cf   : > { %13378 = vsyncadd (!%p12810_p2), %s9721_s18, 4294965248  ;;  %s21_s26 = sadd.s32 1, %s13401_s26   ;;  %s15200_s16 = sld [smem:[#allocation21_spill]] }
 0x5d0   : > { %p18_p3 = scmp.ge.s32.totalorder %s21_s26, 4   ;;  %s15201_s24 = sld [smem:[#allocation19_spill]] }
 0x5d1   : > { %s15202_s25 = sld [smem:[#allocation20_spill]]  ;;  %s15203_s21 = smov %s13385_s22 }
 0x5d2   : > { %s15204_s22 = smov %s13389_s23  ;;  %20 = sbr.rel (!%p18_p3) target bundleno = 8 (0x8), region = 116 }
 0x5d5   : > { %s15205_s23 = smov %s15200_s16 }
 0x5d9   :  { %9726 = vsyncpa [#allocation5], 1 }
 0x5da   :  { %9728 = vsyncpa [#allocation5 + $0x1], 1 }
 0x5db   :  { %9729 = vsyncpa [#allocation8], 1 }
 0x5dc   :  { %9730 = vsyncpa [#allocation6], 1 }
 0x5dd   :  { %9732 = vsyncpa [#allocation6 + $0x1], 1 }
 0x5de   :  { %9733 = vsyncmov [#allocation3] }
 0x5e1   :  { %s9734_s7 = vpop.sfrf %9733 }
 0x5e2   :  { %p10495_p13 = scmp.ne.s32.totalorder %s9734_s7, 0 }
 0x5e4   :  { %9738 = shalt.err (%p10495_p13)  }

</bundles_post_ra>
